<compile_context>
chip_gen: v7x
topology: tpu7x:2x2x1
jax: 0.10.0
libtpu: 0.0.40
codegen_flags: <defaults>
</compile_context>

<pallas_src>
import functools

import jax
import jax.numpy as jnp
from jax.experimental import pallas as pl


# ----------------------------- config --------------------------------------
N_CHANNELS = 1      # config.n_channels (must be 1, see note above)
LEN_SEQ = 8         # config.len_seq    (acts as the LSTM batch dimension)
N_HIDDEN = 32       # self.n_hidden
N_CODE = 16         # self.n_code
T_STEPS = 4         # the "-1" axis of x.reshape((-1, len_seq, n_channels))

B1 = LEN_SEQ                 # batch for lstm1 / lstm2
REP = LEN_SEQ                # repeat factor of torch .repeat(1, len_seq, 1)
B3 = LEN_SEQ * LEN_SEQ       # batch for lstm3 / lstm4 (after the repeat)

WCOLS = 4 * N_HIDDEN         # 128: weight-slab lane width == padded gate width
S_COLS = N_HIDDEN            # 32:  state-slab lane width


def _align8(n):
    return ((n + 7) // 8) * 8


def _layout(items):
    """Row offsets for packing named 2-D blocks into one slab (8-row aligned)."""
    off, r = {}, 0
    for name, rows in items:
        off[name] = r
        r += _align8(rows)
    return off, r


# ---- packed weight slab layout: (W_ROWS, 128) f32, one DMA ----
W_OFF, W_ROWS = _layout([
    ("wih1", N_CHANNELS), ("b1", 1), ("whh1", N_HIDDEN),
    ("wih2", N_HIDDEN), ("whh2", N_CODE), ("b2", 1),
    ("wih3", N_CODE), ("whh3", N_CODE), ("b3", 1),
    ("wih4", N_CODE), ("whh4", N_HIDDEN), ("b4", 1),
    ("wout", 1), ("bout", 1),
])

# ---- packed state slab layout: (S_ROWS, 32) f32, one DMA in / one out ----
S_OFF, S_ROWS = _layout([
    ("h1", B1), ("c1", B1), ("h2", B1), ("c2", B1),
    ("h3", B3), ("c3", B3), ("h4", B3), ("c4", B3),
])


# ----------------------- fused forward kernel -------------------------------
def _fused_forward_kernel(x_ref, w_ref, s_in_ref, out_ref, s_out_ref, *, T):
    """Whole autoencoder forward in one kernel; everything lives in VMEM."""
    H1, H2 = N_HIDDEN, N_CODE
    f32 = jnp.float32

    def dot(a, b):
        return jnp.dot(a, b, preferred_element_type=f32)

    def w(name, rows, cols=WCOLS):
        r = W_OFF[name]
        return w_ref[r:r + rows, :cols]

    def state_in(name, rows, cols):
        r = S_OFF[name]
        return s_in_ref[r:r + rows, :cols]

    def gates(g, c, H):
        # Gate columns were pre-permuted to [i | f | o | g] in prepare_params:
        # one wide sigmoid over (B, 3H) + one tanh over (B, H).
        sig = jax.nn.sigmoid(g[:, :3 * H])
        i_g = sig[:, 0:H]
        f_g = sig[:, H:2 * H]
        o_g = sig[:, 2 * H:3 * H]
        g_g = jnp.tanh(g[:, 3 * H:4 * H])
        c_new = f_g * c + i_g * g_g
        h_new = o_g * jnp.tanh(c_new)
        return h_new, c_new

    # --- weights / biases, sliced once from the packed slab (zero-padded to
    #     128 lanes; the padded gate columns stay exactly zero and are never
    #     read by gates()) ---
    wih1, b1, whh1 = w("wih1", N_CHANNELS), w("b1", 1), w("whh1", H1)
    wih2, whh2, b2 = w("wih2", H1), w("whh2", H2), w("b2", 1)
    wih3, whh3, b3 = w("wih3", H2), w("whh3", H2), w("b3", 1)
    wih4, whh4, b4 = w("wih4", H2), w("whh4", H1), w("b4", 1)
    wout = w("wout", 1, H1)                       # (1, H1)
    bout = w("bout", 1, 1)                        # (1, 1)

    # --- initial states ---
    h1, c1 = state_in("h1", B1, H1), state_in("c1", B1, H1)
    h2, c2 = state_in("h2", B1, H2), state_in("c2", B1, H2)
    h3, c3 = state_in("h3", B3, H2), state_in("c3", B3, H2)
    h4, c4 = state_in("h4", B3, H1), state_in("c4", B3, H1)

    # --- fully unrolled time loop; all 4 layers advance inside each step so
    #     the critical path is a wavefront of T + 3 cells, not 4 * T. ---
    for t in range(T):
        x_t = x_ref[t * B1:(t + 1) * B1, :]                     # (B1, 1)

        # layer 1 (Din = 1): input projection is a VPU broadcast multiply
        g1 = x_t * wih1 + b1 + dot(h1, whh1)
        h1, c1 = gates(g1, c1, H1)

        # layer 2: per-step input projection (no whole-sequence barrier)
        g2 = dot(h1, wih2) + b2 + dot(h2, whh2)
        h2, c2 = gates(g2, c2, H2)

        # layer 3: torch repeat(1, len_seq, 1) == tile along batch.  Project
        # the small (B1, H2) block once, then broadcast-add it onto the
        # (REP, B1, 4H) recurrent gates -- never materialized as a copy.
        p3 = dot(h2, wih3) + b3                                  # (B1, 128)
        g3 = (dot(h3, whh3).reshape(REP, B1, WCOLS) + p3[None, :, :]
              ).reshape(B3, WCOLS)
        h3, c3 = gates(g3, c3, H2)

        # layer 4
        g4 = dot(h3, wih4) + b4 + dot(h4, whh4)
        h4, c4 = gates(g4, c4, H1)

        # output linear for this step, written into the lane-dense (1, T*B3)
        # output: (C, H1) . (B3, H1)^T -> (C, B3)
        ob = jax.lax.dot_general(wout, h4, (((1,), (1,)), ((), ())),
                                 preferred_element_type=f32) + bout
        out_ref[:, t * B3:(t + 1) * B3] = ob

    # --- final states, packed into one output slab (aliased with s_in) ---
    s_out_ref[S_OFF["h1"]:S_OFF["h1"] + B1, :H1] = h1
    s_out_ref[S_OFF["c1"]:S_OFF["c1"] + B1, :H1] = c1
    s_out_ref[S_OFF["h2"]:S_OFF["h2"] + B1, :H2] = h2
    s_out_ref[S_OFF["c2"]:S_OFF["c2"] + B1, :H2] = c2
    s_out_ref[S_OFF["h3"]:S_OFF["h3"] + B3, :H2] = h3
    s_out_ref[S_OFF["c3"]:S_OFF["c3"] + B3, :H2] = c3
    s_out_ref[S_OFF["h4"]:S_OFF["h4"] + B3, :H1] = h4
    s_out_ref[S_OFF["c4"]:S_OFF["c4"] + B3, :H1] = c4


# --------------------------- parameter handling ------------------------------
def _uniform(key, shape, k):
    return jax.random.uniform(key, shape, jnp.float32, minval=-k, maxval=k)


def init_lstm_params(key, input_size, hidden_size):
    k = 1.0 / jnp.sqrt(hidden_size)
    k1, k2, k3, k4 = jax.random.split(key, 4)
    return dict(
        w_ih=_uniform(k1, (4 * hidden_size, input_size), k),
        w_hh=_uniform(k2, (4 * hidden_size, hidden_size), k),
        b_ih=_uniform(k3, (4 * hidden_size,), k),
        b_hh=_uniform(k4, (4 * hidden_size,), k),
    )


def init_params(key):
    ks = jax.random.split(key, 6)
    k = 1.0 / jnp.sqrt(N_HIDDEN)
    return dict(
        lstm1=init_lstm_params(ks[0], N_CHANNELS, N_HIDDEN),
        lstm2=init_lstm_params(ks[1], N_HIDDEN, N_CODE),
        lstm3=init_lstm_params(ks[2], N_CODE, N_CODE),
        lstm4=init_lstm_params(ks[3], N_CODE, N_HIDDEN),
        out_w=_uniform(ks[4], (N_CHANNELS, N_HIDDEN), k),
        out_b=_uniform(ks[5], (N_CHANNELS,), k),
    )


def prepare_params(raw):
    """One-time layout prep: transpose, fuse biases, reorder gate columns to
    [i|f|o|g], zero-pad to 128 lanes and pack everything into one slab."""

    def reorder(mat_t, H):
        # columns [i | f | g | o] (PyTorch order) -> [i | f | o | g]
        return jnp.concatenate(
            [mat_t[:, :2 * H], mat_t[:, 3 * H:4 * H], mat_t[:, 2 * H:3 * H]],
            axis=1)

    slab = jnp.zeros((W_ROWS, WCOLS), jnp.float32)

    def put(slab, name, block):
        r = W_OFF[name]
        rows, cols = block.shape
        return slab.at[r:r + rows, :cols].set(block.astype(jnp.float32))

    for lname, key, H in (("1", "lstm1", N_HIDDEN), ("2", "lstm2", N_CODE),
                          ("3", "lstm3", N_CODE), ("4", "lstm4", N_HIDDEN)):
        p = raw[key]
        wih_t = reorder(jnp.asarray(p["w_ih"], jnp.float32).T, H)   # (Din, 4H)
        whh_t = reorder(jnp.asarray(p["w_hh"], jnp.float32).T, H)   # (H,   4H)
        b = reorder((p["b_ih"] + p["b_hh"]).reshape(1, -1), H)      # (1,   4H)
        slab = put(slab, "wih" + lname, wih_t)
        slab = put(slab, "whh" + lname, whh_t)
        slab = put(slab, "b" + lname, b)

    slab = put(slab, "wout", jnp.asarray(raw["out_w"], jnp.float32))   # (C, H1)
    slab = put(slab, "bout", raw["out_b"].reshape(1, 1))
    return dict(w_slab=slab)


# ------------------------------ forward -------------------------------------
@jax.jit
def forward(pp, x, hidden):
    """Mirrors LSTMAutoEncoder.forward: returns (output, new_hidden)."""
    x = x.reshape(-1, LEN_SEQ, N_CHANNELS)                 # (T, len_seq, C)
    T = x.shape[0]
    x_flat = x.reshape(T * B1, N_CHANNELS).astype(jnp.float32)

    # Pack the 8 initial h/c states into one (S_ROWS, S_COLS) slab.
    s_in = jnp.zeros((S_ROWS, S_COLS), jnp.float32)
    state_vals = (
        ("h1", hidden[0][0][0]), ("c1", hidden[0][1][0]),
        ("h2", hidden[1][0][0]), ("c2", hidden[1][1][0]),
        ("h3", hidden[2][0][0]), ("c3", hidden[2][1][0]),
        ("h4", hidden[3][0][0]), ("c4", hidden[3][1][0]),
    )
    for name, v in state_vals:
        r = S_OFF[name]
        s_in = s_in.at[r:r + v.shape[0], :v.shape[1]].set(v.astype(jnp.float32))

    kernel = functools.partial(_fused_forward_kernel, T=T)

    # Rough cost hint for the XLA scheduler.
    H1, H2 = N_HIDDEN, N_CODE
    mm = (B1 * H1 + B1 * H1 + B1 * H2 + B1 * H2 + B3 * H2 + B3 * H2 + B3 * H1)
    flops = int(2 * T * (WCOLS * mm + H1 * B3))
    trans = int(5 * T * (B1 * H1 + B1 * H2 + B3 * H2 + B3 * H1))
    bytes_acc = int(4 * (x_flat.size + pp["w_slab"].size + 2 * s_in.size + T * B3))

    out_t, s_out = pl.pallas_call(
        kernel,
        out_shape=(
            jax.ShapeDtypeStruct((N_CHANNELS, T * B3), jnp.float32),  # lane-dense
            jax.ShapeDtypeStruct((S_ROWS, S_COLS), jnp.float32),      # packed states
        ),
        input_output_aliases={2: 1},      # state slab in -> state slab out
        cost_estimate=pl.CostEstimate(flops=flops, transcendentals=trans,
                                      bytes_accessed=bytes_acc),
    )(x_flat, pp["w_slab"], s_in)

    out = jnp.swapaxes(out_t, 0, 1).reshape(T, B3, N_CHANNELS)

    def st(name, rows, cols):
        r = S_OFF[name]
        return s_out[r:r + rows, :cols]

    new_hidden = [
        (st("h1", B1, N_HIDDEN)[None], st("c1", B1, N_HIDDEN)[None]),
        (st("h2", B1, N_CODE)[None], st("c2", B1, N_CODE)[None]),
        (st("h3", B3, N_CODE)[None], st("c3", B3, N_CODE)[None]),
        (st("h4", B3, N_HIDDEN)[None], st("c4", B3, N_HIDDEN)[None]),
    ]
    return out, new_hidden


# ----------------------- pure-JAX reference (check) --------------------------
def _lstm_ref(p, x, h0, c0):
    H = p["w_hh"].shape[1]

    def step(carry, x_t):
        h, c = carry
        g = x_t @ p["w_ih"].T + p["b_ih"] + h @ p["w_hh"].T + p["b_hh"]
        i = jax.nn.sigmoid(g[:, :H])
        f = jax.nn.sigmoid(g[:, H:2 * H])
        gg = jnp.tanh(g[:, 2 * H:3 * H])
        o = jax.nn.sigmoid(g[:, 3 * H:])
        c = f * c + i * gg
        h = o * jnp.tanh(c)
        return (h, c), h

    (hT, cT), ys = jax.lax.scan(step, (h0, c0), x)
    return ys, (hT[None], cT[None])


def forward_ref(params, x, hidden):
    x = x.reshape(-1, LEN_SEQ, N_CHANNELS)
    x, h0 = _lstm_ref(params["lstm1"], x, hidden[0][0][0], hidden[0][1][0])
    x, h1 = _lstm_ref(params["lstm2"], x, hidden[1][0][0], hidden[1][1][0])
    x = jnp.tile(x, (1, LEN_SEQ, N_CHANNELS))
    x, h2 = _lstm_ref(params["lstm3"], x, hidden[2][0][0], hidden[2][1][0])
    x, h3 = _lstm_ref(params["lstm4"], x, hidden[3][0][0], hidden[3][1][0])
    out = x @ params["out_w"].T + params["out_b"]
    return out, [h0, h1, h2, h3]


# --------------------------------- main --------------------------------------
if __name__ == "__main__":
    key = jax.random.PRNGKey(0)
    kx, kp = jax.random.split(key)

    raw_params = init_params(kp)
    prepped = prepare_params(raw_params)      # one-time weight packing

    # x: (T, len_seq, n_channels) -> reshape(-1, len_seq, n_channels) is identity.
    x = jax.random.normal(kx, (T_STEPS, LEN_SEQ, N_CHANNELS), jnp.float32)

    zeros = lambda b, h: (jnp.zeros((1, b, h), jnp.float32),
                          jnp.zeros((1, b, h), jnp.float32))
    hidden = [
        zeros(LEN_SEQ, N_HIDDEN),                 # lstm1
        zeros(LEN_SEQ, N_CODE),                   # lstm2
        zeros(LEN_SEQ * LEN_SEQ, N_CODE),         # lstm3 (batch grows via repeat)
        zeros(LEN_SEQ * LEN_SEQ, N_HIDDEN),       # lstm4
    ]

    out, new_hidden = forward(prepped, x, hidden)
    out = jax.block_until_ready(out)

    # Numerical check against a pure-JAX reference of the same forward pass.
    out_ref, new_hidden_ref = forward_ref(raw_params, x, hidden)
    assert out.shape == (T_STEPS, LEN_SEQ * LEN_SEQ, N_CHANNELS)
    assert jnp.allclose(out, out_ref, atol=1e-4, rtol=1e-4)
    for (ha, ca), (hb, cb) in zip(new_hidden, new_hidden_ref):
        assert jnp.allclose(ha, hb, atol=1e-4, rtol=1e-4)
        assert jnp.allclose(ca, cb, atol=1e-4, rtol=1e-4)

    print("KERNEL_OK")
</pallas_src>

<mosaic_0001>
module attributes {stable_mosaic.version = 11 : i64} {
  func.func @_fused_forward_kernel(%arg0: memref<32x1xf32, #tpu.memory_space<vmem>>, %arg1: memref<216x128xf32, #tpu.memory_space<vmem>>, %arg2: memref<288x32xf32, #tpu.memory_space<vmem>>, %arg3: memref<1x256xf32, #tpu.memory_space<vmem>>, %arg4: memref<288x32xf32, #tpu.memory_space<vmem>>) attributes {dimension_semantics = [], scalar_prefetch = 0 : i64, scratch_operands = 0 : i64, tpu.core_type = #tpu.core_type<tc>} {
    %c0 = arith.constant 0 : index
    %c0_0 = arith.constant 0 : index
    %0 = vector.load %arg1[%c0, %c0_0] : memref<216x128xf32, #tpu.memory_space<vmem>>, vector<1x128xf32>
    %c8 = arith.constant 8 : index
    %c0_1 = arith.constant 0 : index
    %1 = vector.load %arg1[%c8, %c0_1] : memref<216x128xf32, #tpu.memory_space<vmem>>, vector<1x128xf32>
    %c16 = arith.constant 16 : index
    %c0_2 = arith.constant 0 : index
    %2 = vector.load %arg1[%c16, %c0_2] : memref<216x128xf32, #tpu.memory_space<vmem>>, vector<32x128xf32>
    %c48 = arith.constant 48 : index
    %c0_3 = arith.constant 0 : index
    %3 = vector.load %arg1[%c48, %c0_3] : memref<216x128xf32, #tpu.memory_space<vmem>>, vector<32x128xf32>
    %c80 = arith.constant 80 : index
    %c0_4 = arith.constant 0 : index
    %4 = vector.load %arg1[%c80, %c0_4] : memref<216x128xf32, #tpu.memory_space<vmem>>, vector<16x128xf32>
    %c96 = arith.constant 96 : index
    %c0_5 = arith.constant 0 : index
    %5 = vector.load %arg1[%c96, %c0_5] : memref<216x128xf32, #tpu.memory_space<vmem>>, vector<1x128xf32>
    %c104 = arith.constant 104 : index
    %c0_6 = arith.constant 0 : index
    %6 = vector.load %arg1[%c104, %c0_6] : memref<216x128xf32, #tpu.memory_space<vmem>>, vector<16x128xf32>
    %c120 = arith.constant 120 : index
    %c0_7 = arith.constant 0 : index
    %7 = vector.load %arg1[%c120, %c0_7] : memref<216x128xf32, #tpu.memory_space<vmem>>, vector<16x128xf32>
    %c136 = arith.constant 136 : index
    %c0_8 = arith.constant 0 : index
    %8 = vector.load %arg1[%c136, %c0_8] : memref<216x128xf32, #tpu.memory_space<vmem>>, vector<1x128xf32>
    %c144 = arith.constant 144 : index
    %c0_9 = arith.constant 0 : index
    %9 = vector.load %arg1[%c144, %c0_9] : memref<216x128xf32, #tpu.memory_space<vmem>>, vector<16x128xf32>
    %c160 = arith.constant 160 : index
    %c0_10 = arith.constant 0 : index
    %10 = vector.load %arg1[%c160, %c0_10] : memref<216x128xf32, #tpu.memory_space<vmem>>, vector<32x128xf32>
    %c192 = arith.constant 192 : index
    %c0_11 = arith.constant 0 : index
    %11 = vector.load %arg1[%c192, %c0_11] : memref<216x128xf32, #tpu.memory_space<vmem>>, vector<1x128xf32>
    %c200 = arith.constant 200 : index
    %c0_12 = arith.constant 0 : index
    %12 = vector.load %arg1[%c200, %c0_12] : memref<216x128xf32, #tpu.memory_space<vmem>>, vector<1x32xf32>
    %c208 = arith.constant 208 : index
    %c0_13 = arith.constant 0 : index
    %13 = vector.load %arg1[%c208, %c0_13] : memref<216x128xf32, #tpu.memory_space<vmem>>, vector<1x1xf32>
    %c0_14 = arith.constant 0 : index
    %c0_15 = arith.constant 0 : index
    %14 = vector.load %arg2[%c0_14, %c0_15] : memref<288x32xf32, #tpu.memory_space<vmem>>, vector<8x32xf32>
    %c8_16 = arith.constant 8 : index
    %c0_17 = arith.constant 0 : index
    %15 = vector.load %arg2[%c8_16, %c0_17] : memref<288x32xf32, #tpu.memory_space<vmem>>, vector<8x32xf32>
    %c16_18 = arith.constant 16 : index
    %c0_19 = arith.constant 0 : index
    %16 = vector.load %arg2[%c16_18, %c0_19] : memref<288x32xf32, #tpu.memory_space<vmem>>, vector<8x16xf32>
    %c24 = arith.constant 24 : index
    %c0_20 = arith.constant 0 : index
    %17 = vector.load %arg2[%c24, %c0_20] : memref<288x32xf32, #tpu.memory_space<vmem>>, vector<8x16xf32>
    %c32 = arith.constant 32 : index
    %c0_21 = arith.constant 0 : index
    %18 = vector.load %arg2[%c32, %c0_21] : memref<288x32xf32, #tpu.memory_space<vmem>>, vector<64x16xf32>
    %c96_22 = arith.constant 96 : index
    %c0_23 = arith.constant 0 : index
    %19 = vector.load %arg2[%c96_22, %c0_23] : memref<288x32xf32, #tpu.memory_space<vmem>>, vector<64x16xf32>
    %c160_24 = arith.constant 160 : index
    %c0_25 = arith.constant 0 : index
    %20 = vector.load %arg2[%c160_24, %c0_25] : memref<288x32xf32, #tpu.memory_space<vmem>>, vector<64x32xf32>
    %c224 = arith.constant 224 : index
    %c0_26 = arith.constant 0 : index
    %21 = vector.load %arg2[%c224, %c0_26] : memref<288x32xf32, #tpu.memory_space<vmem>>, vector<64x32xf32>
    %c0_27 = arith.constant 0 : index
    %c0_28 = arith.constant 0 : index
    %22 = vector.load %arg0[%c0_27, %c0_28] : memref<32x1xf32, #tpu.memory_space<vmem>>, vector<8x1xf32>
    %23 = vector.broadcast %22 : vector<8x1xf32> to vector<8x128xf32>
    %24 = vector.broadcast %0 : vector<1x128xf32> to vector<8x128xf32>
    %25 = arith.mulf %23, %24 : vector<8x128xf32>
    %26 = vector.broadcast %1 : vector<1x128xf32> to vector<8x128xf32>
    %27 = arith.addf %25, %26 : vector<8x128xf32>
    %cst = arith.constant dense<0.000000e+00> : vector<8x128xf32>
    %28 = tpu.matmul %14, %2, %cst {dimension_numbers = #tpu.dot_dimension_numbers<[1], [0], [0], [1], [0, 0, 1, 1], [], []>} : vector<8x32xf32>, vector<32x128xf32>, vector<8x128xf32> -> vector<8x128xf32>
    %29 = arith.addf %27, %28 : vector<8x128xf32>
    %30 = vector.extract_strided_slice %29 {offsets = [0, 0], sizes = [8, 96], strides = [1, 1]} : vector<8x128xf32> to vector<8x96xf32>
    %31 = arith.negf %30 : vector<8x96xf32>
    %32 = math.exp %31 : vector<8x96xf32>
    %cst_29 = arith.constant 1.000000e+00 : f32
    %33 = vector.broadcast %cst_29 : f32 to vector<8x96xf32>
    %34 = arith.addf %33, %32 : vector<8x96xf32>
    %35 = arith.divf %33, %34 : vector<8x96xf32>
    %36 = vector.extract_strided_slice %35 {offsets = [0, 0], sizes = [8, 32], strides = [1, 1]} : vector<8x96xf32> to vector<8x32xf32>
    %37 = vector.extract_strided_slice %35 {offsets = [0, 32], sizes = [8, 32], strides = [1, 1]} : vector<8x96xf32> to vector<8x32xf32>
    %38 = vector.extract_strided_slice %35 {offsets = [0, 64], sizes = [8, 32], strides = [1, 1]} : vector<8x96xf32> to vector<8x32xf32>
    %39 = vector.extract_strided_slice %29 {offsets = [0, 96], sizes = [8, 32], strides = [1, 1]} : vector<8x128xf32> to vector<8x32xf32>
    %40 = math.tanh %39 : vector<8x32xf32>
    %41 = arith.mulf %37, %15 : vector<8x32xf32>
    %42 = arith.mulf %36, %40 : vector<8x32xf32>
    %43 = arith.addf %41, %42 : vector<8x32xf32>
    %44 = math.tanh %43 : vector<8x32xf32>
    %45 = arith.mulf %38, %44 : vector<8x32xf32>
    %cst_30 = arith.constant dense<0.000000e+00> : vector<8x128xf32>
    %46 = tpu.matmul %45, %3, %cst_30 {dimension_numbers = #tpu.dot_dimension_numbers<[1], [0], [0], [1], [0, 0, 1, 1], [], []>} : vector<8x32xf32>, vector<32x128xf32>, vector<8x128xf32> -> vector<8x128xf32>
    %47 = vector.broadcast %5 : vector<1x128xf32> to vector<8x128xf32>
    %48 = arith.addf %46, %47 : vector<8x128xf32>
    %cst_31 = arith.constant dense<0.000000e+00> : vector<8x128xf32>
    %49 = tpu.matmul %16, %4, %cst_31 {dimension_numbers = #tpu.dot_dimension_numbers<[1], [0], [0], [1], [0, 0, 1, 1], [], []>} : vector<8x16xf32>, vector<16x128xf32>, vector<8x128xf32> -> vector<8x128xf32>
    %50 = arith.addf %48, %49 : vector<8x128xf32>
    %51 = vector.extract_strided_slice %50 {offsets = [0, 0], sizes = [8, 48], strides = [1, 1]} : vector<8x128xf32> to vector<8x48xf32>
    %52 = arith.negf %51 : vector<8x48xf32>
    %53 = math.exp %52 : vector<8x48xf32>
    %cst_32 = arith.constant 1.000000e+00 : f32
    %54 = vector.broadcast %cst_32 : f32 to vector<8x48xf32>
    %55 = arith.addf %54, %53 : vector<8x48xf32>
    %56 = arith.divf %54, %55 : vector<8x48xf32>
    %57 = vector.extract_strided_slice %56 {offsets = [0, 0], sizes = [8, 16], strides = [1, 1]} : vector<8x48xf32> to vector<8x16xf32>
    %58 = vector.extract_strided_slice %56 {offsets = [0, 16], sizes = [8, 16], strides = [1, 1]} : vector<8x48xf32> to vector<8x16xf32>
    %59 = vector.extract_strided_slice %56 {offsets = [0, 32], sizes = [8, 16], strides = [1, 1]} : vector<8x48xf32> to vector<8x16xf32>
    %60 = vector.extract_strided_slice %50 {offsets = [0, 48], sizes = [8, 16], strides = [1, 1]} : vector<8x128xf32> to vector<8x16xf32>
    %61 = math.tanh %60 : vector<8x16xf32>
    %62 = arith.mulf %58, %17 : vector<8x16xf32>
    %63 = arith.mulf %57, %61 : vector<8x16xf32>
    %64 = arith.addf %62, %63 : vector<8x16xf32>
    %65 = math.tanh %64 : vector<8x16xf32>
    %66 = arith.mulf %59, %65 : vector<8x16xf32>
    %cst_33 = arith.constant dense<0.000000e+00> : vector<8x128xf32>
    %67 = tpu.matmul %66, %6, %cst_33 {dimension_numbers = #tpu.dot_dimension_numbers<[1], [0], [0], [1], [0, 0, 1, 1], [], []>} : vector<8x16xf32>, vector<16x128xf32>, vector<8x128xf32> -> vector<8x128xf32>
    %68 = vector.broadcast %8 : vector<1x128xf32> to vector<8x128xf32>
    %69 = arith.addf %67, %68 : vector<8x128xf32>
    %cst_34 = arith.constant dense<0.000000e+00> : vector<64x128xf32>
    %70 = tpu.matmul %18, %7, %cst_34 {dimension_numbers = #tpu.dot_dimension_numbers<[1], [0], [0], [1], [0, 0, 1, 1], [], []>} : vector<64x16xf32>, vector<16x128xf32>, vector<64x128xf32> -> vector<64x128xf32>
    %71 = vector.shape_cast %70 : vector<64x128xf32> to vector<8x8x128xf32>
    %72 = vector.shape_cast %69 : vector<8x128xf32> to vector<1x8x128xf32>
    %73 = vector.broadcast %72 : vector<1x8x128xf32> to vector<8x8x128xf32>
    %74 = arith.addf %71, %73 : vector<8x8x128xf32>
    %75 = vector.shape_cast %74 : vector<8x8x128xf32> to vector<64x128xf32>
    %76 = vector.extract_strided_slice %75 {offsets = [0, 0], sizes = [64, 48], strides = [1, 1]} : vector<64x128xf32> to vector<64x48xf32>
    %77 = arith.negf %76 : vector<64x48xf32>
    %78 = math.exp %77 : vector<64x48xf32>
    %cst_35 = arith.constant 1.000000e+00 : f32
    %79 = vector.broadcast %cst_35 : f32 to vector<64x48xf32>
    %80 = arith.addf %79, %78 : vector<64x48xf32>
    %81 = arith.divf %79, %80 : vector<64x48xf32>
    %82 = vector.extract_strided_slice %81 {offsets = [0, 0], sizes = [64, 16], strides = [1, 1]} : vector<64x48xf32> to vector<64x16xf32>
    %83 = vector.extract_strided_slice %81 {offsets = [0, 16], sizes = [64, 16], strides = [1, 1]} : vector<64x48xf32> to vector<64x16xf32>
    %84 = vector.extract_strided_slice %81 {offsets = [0, 32], sizes = [64, 16], strides = [1, 1]} : vector<64x48xf32> to vector<64x16xf32>
    %85 = vector.extract_strided_slice %75 {offsets = [0, 48], sizes = [64, 16], strides = [1, 1]} : vector<64x128xf32> to vector<64x16xf32>
    %86 = math.tanh %85 : vector<64x16xf32>
    %87 = arith.mulf %83, %19 : vector<64x16xf32>
    %88 = arith.mulf %82, %86 : vector<64x16xf32>
    %89 = arith.addf %87, %88 : vector<64x16xf32>
    %90 = math.tanh %89 : vector<64x16xf32>
    %91 = arith.mulf %84, %90 : vector<64x16xf32>
    %cst_36 = arith.constant dense<0.000000e+00> : vector<64x128xf32>
    %92 = tpu.matmul %91, %9, %cst_36 {dimension_numbers = #tpu.dot_dimension_numbers<[1], [0], [0], [1], [0, 0, 1, 1], [], []>} : vector<64x16xf32>, vector<16x128xf32>, vector<64x128xf32> -> vector<64x128xf32>
    %93 = vector.broadcast %11 : vector<1x128xf32> to vector<64x128xf32>
    %94 = arith.addf %92, %93 : vector<64x128xf32>
    %cst_37 = arith.constant dense<0.000000e+00> : vector<64x128xf32>
    %95 = tpu.matmul %20, %10, %cst_37 {dimension_numbers = #tpu.dot_dimension_numbers<[1], [0], [0], [1], [0, 0, 1, 1], [], []>} : vector<64x32xf32>, vector<32x128xf32>, vector<64x128xf32> -> vector<64x128xf32>
    %96 = arith.addf %94, %95 : vector<64x128xf32>
    %97 = vector.extract_strided_slice %96 {offsets = [0, 0], sizes = [64, 96], strides = [1, 1]} : vector<64x128xf32> to vector<64x96xf32>
    %98 = arith.negf %97 : vector<64x96xf32>
    %99 = math.exp %98 : vector<64x96xf32>
    %cst_38 = arith.constant 1.000000e+00 : f32
    %100 = vector.broadcast %cst_38 : f32 to vector<64x96xf32>
    %101 = arith.addf %100, %99 : vector<64x96xf32>
    %102 = arith.divf %100, %101 : vector<64x96xf32>
    %103 = vector.extract_strided_slice %102 {offsets = [0, 0], sizes = [64, 32], strides = [1, 1]} : vector<64x96xf32> to vector<64x32xf32>
    %104 = vector.extract_strided_slice %102 {offsets = [0, 32], sizes = [64, 32], strides = [1, 1]} : vector<64x96xf32> to vector<64x32xf32>
    %105 = vector.extract_strided_slice %102 {offsets = [0, 64], sizes = [64, 32], strides = [1, 1]} : vector<64x96xf32> to vector<64x32xf32>
    %106 = vector.extract_strided_slice %96 {offsets = [0, 96], sizes = [64, 32], strides = [1, 1]} : vector<64x128xf32> to vector<64x32xf32>
    %107 = math.tanh %106 : vector<64x32xf32>
    %108 = arith.mulf %104, %21 : vector<64x32xf32>
    %109 = arith.mulf %103, %107 : vector<64x32xf32>
    %110 = arith.addf %108, %109 : vector<64x32xf32>
    %111 = math.tanh %110 : vector<64x32xf32>
    %112 = arith.mulf %105, %111 : vector<64x32xf32>
    %cst_39 = arith.constant dense<0.000000e+00> : vector<1x64xf32>
    %113 = tpu.matmul %12, %112, %cst_39 {dimension_numbers = #tpu.dot_dimension_numbers<[1], [1], [0], [0], [0, 0, 1, 0], [], []>} : vector<1x32xf32>, vector<64x32xf32>, vector<1x64xf32> -> vector<1x64xf32>
    %114 = vector.broadcast %13 : vector<1x1xf32> to vector<1x64xf32>
    %115 = arith.addf %113, %114 : vector<1x64xf32>
    %c0_40 = arith.constant 0 : index
    %c0_41 = arith.constant 0 : index
    %116 = vector.load %arg3[%c0_40, %c0_41] : memref<1x256xf32, #tpu.memory_space<vmem>>, vector<1x64xf32>
    tpu.vector_store %arg3[%c0_40, %c0_41], %115 {strides = array<i32>} : memref<1x256xf32, #tpu.memory_space<vmem>>, vector<1x64xf32>,
    %c8_42 = arith.constant 8 : index
    %c0_43 = arith.constant 0 : index
    %117 = vector.load %arg0[%c8_42, %c0_43] : memref<32x1xf32, #tpu.memory_space<vmem>>, vector<8x1xf32>
    %118 = vector.broadcast %117 : vector<8x1xf32> to vector<8x128xf32>
    %119 = vector.broadcast %0 : vector<1x128xf32> to vector<8x128xf32>
    %120 = arith.mulf %118, %119 : vector<8x128xf32>
    %121 = vector.broadcast %1 : vector<1x128xf32> to vector<8x128xf32>
    %122 = arith.addf %120, %121 : vector<8x128xf32>
    %cst_44 = arith.constant dense<0.000000e+00> : vector<8x128xf32>
    %123 = tpu.matmul %45, %2, %cst_44 {dimension_numbers = #tpu.dot_dimension_numbers<[1], [0], [0], [1], [0, 0, 1, 1], [], []>} : vector<8x32xf32>, vector<32x128xf32>, vector<8x128xf32> -> vector<8x128xf32>
    %124 = arith.addf %122, %123 : vector<8x128xf32>
    %125 = vector.extract_strided_slice %124 {offsets = [0, 0], sizes = [8, 96], strides = [1, 1]} : vector<8x128xf32> to vector<8x96xf32>
    %126 = arith.negf %125 : vector<8x96xf32>
    %127 = math.exp %126 : vector<8x96xf32>
    %cst_45 = arith.constant 1.000000e+00 : f32
    %128 = vector.broadcast %cst_45 : f32 to vector<8x96xf32>
    %129 = arith.addf %128, %127 : vector<8x96xf32>
    %130 = arith.divf %128, %129 : vector<8x96xf32>
    %131 = vector.extract_strided_slice %130 {offsets = [0, 0], sizes = [8, 32], strides = [1, 1]} : vector<8x96xf32> to vector<8x32xf32>
    %132 = vector.extract_strided_slice %130 {offsets = [0, 32], sizes = [8, 32], strides = [1, 1]} : vector<8x96xf32> to vector<8x32xf32>
    %133 = vector.extract_strided_slice %130 {offsets = [0, 64], sizes = [8, 32], strides = [1, 1]} : vector<8x96xf32> to vector<8x32xf32>
    %134 = vector.extract_strided_slice %124 {offsets = [0, 96], sizes = [8, 32], strides = [1, 1]} : vector<8x128xf32> to vector<8x32xf32>
    %135 = math.tanh %134 : vector<8x32xf32>
    %136 = arith.mulf %132, %43 : vector<8x32xf32>
    %137 = arith.mulf %131, %135 : vector<8x32xf32>
    %138 = arith.addf %136, %137 : vector<8x32xf32>
    %139 = math.tanh %138 : vector<8x32xf32>
    %140 = arith.mulf %133, %139 : vector<8x32xf32>
    %cst_46 = arith.constant dense<0.000000e+00> : vector<8x128xf32>
    %141 = tpu.matmul %140, %3, %cst_46 {dimension_numbers = #tpu.dot_dimension_numbers<[1], [0], [0], [1], [0, 0, 1, 1], [], []>} : vector<8x32xf32>, vector<32x128xf32>, vector<8x128xf32> -> vector<8x128xf32>
    %142 = vector.broadcast %5 : vector<1x128xf32> to vector<8x128xf32>
    %143 = arith.addf %141, %142 : vector<8x128xf32>
    %cst_47 = arith.constant dense<0.000000e+00> : vector<8x128xf32>
    %144 = tpu.matmul %66, %4, %cst_47 {dimension_numbers = #tpu.dot_dimension_numbers<[1], [0], [0], [1], [0, 0, 1, 1], [], []>} : vector<8x16xf32>, vector<16x128xf32>, vector<8x128xf32> -> vector<8x128xf32>
    %145 = arith.addf %143, %144 : vector<8x128xf32>
    %146 = vector.extract_strided_slice %145 {offsets = [0, 0], sizes = [8, 48], strides = [1, 1]} : vector<8x128xf32> to vector<8x48xf32>
    %147 = arith.negf %146 : vector<8x48xf32>
    %148 = math.exp %147 : vector<8x48xf32>
    %cst_48 = arith.constant 1.000000e+00 : f32
    %149 = vector.broadcast %cst_48 : f32 to vector<8x48xf32>
    %150 = arith.addf %149, %148 : vector<8x48xf32>
    %151 = arith.divf %149, %150 : vector<8x48xf32>
    %152 = vector.extract_strided_slice %151 {offsets = [0, 0], sizes = [8, 16], strides = [1, 1]} : vector<8x48xf32> to vector<8x16xf32>
    %153 = vector.extract_strided_slice %151 {offsets = [0, 16], sizes = [8, 16], strides = [1, 1]} : vector<8x48xf32> to vector<8x16xf32>
    %154 = vector.extract_strided_slice %151 {offsets = [0, 32], sizes = [8, 16], strides = [1, 1]} : vector<8x48xf32> to vector<8x16xf32>
    %155 = vector.extract_strided_slice %145 {offsets = [0, 48], sizes = [8, 16], strides = [1, 1]} : vector<8x128xf32> to vector<8x16xf32>
    %156 = math.tanh %155 : vector<8x16xf32>
    %157 = arith.mulf %153, %64 : vector<8x16xf32>
    %158 = arith.mulf %152, %156 : vector<8x16xf32>
    %159 = arith.addf %157, %158 : vector<8x16xf32>
    %160 = math.tanh %159 : vector<8x16xf32>
    %161 = arith.mulf %154, %160 : vector<8x16xf32>
    %cst_49 = arith.constant dense<0.000000e+00> : vector<8x128xf32>
    %162 = tpu.matmul %161, %6, %cst_49 {dimension_numbers = #tpu.dot_dimension_numbers<[1], [0], [0], [1], [0, 0, 1, 1], [], []>} : vector<8x16xf32>, vector<16x128xf32>, vector<8x128xf32> -> vector<8x128xf32>
    %163 = vector.broadcast %8 : vector<1x128xf32> to vector<8x128xf32>
    %164 = arith.addf %162, %163 : vector<8x128xf32>
    %cst_50 = arith.constant dense<0.000000e+00> : vector<64x128xf32>
    %165 = tpu.matmul %91, %7, %cst_50 {dimension_numbers = #tpu.dot_dimension_numbers<[1], [0], [0], [1], [0, 0, 1, 1], [], []>} : vector<64x16xf32>, vector<16x128xf32>, vector<64x128xf32> -> vector<64x128xf32>
    %166 = vector.shape_cast %165 : vector<64x128xf32> to vector<8x8x128xf32>
    %167 = vector.shape_cast %164 : vector<8x128xf32> to vector<1x8x128xf32>
    %168 = vector.broadcast %167 : vector<1x8x128xf32> to vector<8x8x128xf32>
    %169 = arith.addf %166, %168 : vector<8x8x128xf32>
    %170 = vector.shape_cast %169 : vector<8x8x128xf32> to vector<64x128xf32>
    %171 = vector.extract_strided_slice %170 {offsets = [0, 0], sizes = [64, 48], strides = [1, 1]} : vector<64x128xf32> to vector<64x48xf32>
    %172 = arith.negf %171 : vector<64x48xf32>
    %173 = math.exp %172 : vector<64x48xf32>
    %cst_51 = arith.constant 1.000000e+00 : f32
    %174 = vector.broadcast %cst_51 : f32 to vector<64x48xf32>
    %175 = arith.addf %174, %173 : vector<64x48xf32>
    %176 = arith.divf %174, %175 : vector<64x48xf32>
    %177 = vector.extract_strided_slice %176 {offsets = [0, 0], sizes = [64, 16], strides = [1, 1]} : vector<64x48xf32> to vector<64x16xf32>
    %178 = vector.extract_strided_slice %176 {offsets = [0, 16], sizes = [64, 16], strides = [1, 1]} : vector<64x48xf32> to vector<64x16xf32>
    %179 = vector.extract_strided_slice %176 {offsets = [0, 32], sizes = [64, 16], strides = [1, 1]} : vector<64x48xf32> to vector<64x16xf32>
    %180 = vector.extract_strided_slice %170 {offsets = [0, 48], sizes = [64, 16], strides = [1, 1]} : vector<64x128xf32> to vector<64x16xf32>
    %181 = math.tanh %180 : vector<64x16xf32>
    %182 = arith.mulf %178, %89 : vector<64x16xf32>
    %183 = arith.mulf %177, %181 : vector<64x16xf32>
    %184 = arith.addf %182, %183 : vector<64x16xf32>
    %185 = math.tanh %184 : vector<64x16xf32>
    %186 = arith.mulf %179, %185 : vector<64x16xf32>
    %cst_52 = arith.constant dense<0.000000e+00> : vector<64x128xf32>
    %187 = tpu.matmul %186, %9, %cst_52 {dimension_numbers = #tpu.dot_dimension_numbers<[1], [0], [0], [1], [0, 0, 1, 1], [], []>} : vector<64x16xf32>, vector<16x128xf32>, vector<64x128xf32> -> vector<64x128xf32>
    %188 = vector.broadcast %11 : vector<1x128xf32> to vector<64x128xf32>
    %189 = arith.addf %187, %188 : vector<64x128xf32>
    %cst_53 = arith.constant dense<0.000000e+00> : vector<64x128xf32>
    %190 = tpu.matmul %112, %10, %cst_53 {dimension_numbers = #tpu.dot_dimension_numbers<[1], [0], [0], [1], [0, 0, 1, 1], [], []>} : vector<64x32xf32>, vector<32x128xf32>, vector<64x128xf32> -> vector<64x128xf32>
    %191 = arith.addf %189, %190 : vector<64x128xf32>
    %192 = vector.extract_strided_slice %191 {offsets = [0, 0], sizes = [64, 96], strides = [1, 1]} : vector<64x128xf32> to vector<64x96xf32>
    %193 = arith.negf %192 : vector<64x96xf32>
    %194 = math.exp %193 : vector<64x96xf32>
    %cst_54 = arith.constant 1.000000e+00 : f32
    %195 = vector.broadcast %cst_54 : f32 to vector<64x96xf32>
    %196 = arith.addf %195, %194 : vector<64x96xf32>
    %197 = arith.divf %195, %196 : vector<64x96xf32>
    %198 = vector.extract_strided_slice %197 {offsets = [0, 0], sizes = [64, 32], strides = [1, 1]} : vector<64x96xf32> to vector<64x32xf32>
    %199 = vector.extract_strided_slice %197 {offsets = [0, 32], sizes = [64, 32], strides = [1, 1]} : vector<64x96xf32> to vector<64x32xf32>
    %200 = vector.extract_strided_slice %197 {offsets = [0, 64], sizes = [64, 32], strides = [1, 1]} : vector<64x96xf32> to vector<64x32xf32>
    %201 = vector.extract_strided_slice %191 {offsets = [0, 96], sizes = [64, 32], strides = [1, 1]} : vector<64x128xf32> to vector<64x32xf32>
    %202 = math.tanh %201 : vector<64x32xf32>
    %203 = arith.mulf %199, %110 : vector<64x32xf32>
    %204 = arith.mulf %198, %202 : vector<64x32xf32>
    %205 = arith.addf %203, %204 : vector<64x32xf32>
    %206 = math.tanh %205 : vector<64x32xf32>
    %207 = arith.mulf %200, %206 : vector<64x32xf32>
    %cst_55 = arith.constant dense<0.000000e+00> : vector<1x64xf32>
    %208 = tpu.matmul %12, %207, %cst_55 {dimension_numbers = #tpu.dot_dimension_numbers<[1], [1], [0], [0], [0, 0, 1, 0], [], []>} : vector<1x32xf32>, vector<64x32xf32>, vector<1x64xf32> -> vector<1x64xf32>
    %209 = vector.broadcast %13 : vector<1x1xf32> to vector<1x64xf32>
    %210 = arith.addf %208, %209 : vector<1x64xf32>
    %c0_56 = arith.constant 0 : index
    %c64 = arith.constant 64 : index
    %211 = vector.load %arg3[%c0_56, %c64] : memref<1x256xf32, #tpu.memory_space<vmem>>, vector<1x64xf32>
    tpu.vector_store %arg3[%c0_56, %c64], %210 {strides = array<i32>} : memref<1x256xf32, #tpu.memory_space<vmem>>, vector<1x64xf32>,
    %c16_57 = arith.constant 16 : index
    %c0_58 = arith.constant 0 : index
    %212 = vector.load %arg0[%c16_57, %c0_58] : memref<32x1xf32, #tpu.memory_space<vmem>>, vector<8x1xf32>
    %213 = vector.broadcast %212 : vector<8x1xf32> to vector<8x128xf32>
    %214 = vector.broadcast %0 : vector<1x128xf32> to vector<8x128xf32>
    %215 = arith.mulf %213, %214 : vector<8x128xf32>
    %216 = vector.broadcast %1 : vector<1x128xf32> to vector<8x128xf32>
    %217 = arith.addf %215, %216 : vector<8x128xf32>
    %cst_59 = arith.constant dense<0.000000e+00> : vector<8x128xf32>
    %218 = tpu.matmul %140, %2, %cst_59 {dimension_numbers = #tpu.dot_dimension_numbers<[1], [0], [0], [1], [0, 0, 1, 1], [], []>} : vector<8x32xf32>, vector<32x128xf32>, vector<8x128xf32> -> vector<8x128xf32>
    %219 = arith.addf %217, %218 : vector<8x128xf32>
    %220 = vector.extract_strided_slice %219 {offsets = [0, 0], sizes = [8, 96], strides = [1, 1]} : vector<8x128xf32> to vector<8x96xf32>
    %221 = arith.negf %220 : vector<8x96xf32>
    %222 = math.exp %221 : vector<8x96xf32>
    %cst_60 = arith.constant 1.000000e+00 : f32
    %223 = vector.broadcast %cst_60 : f32 to vector<8x96xf32>
    %224 = arith.addf %223, %222 : vector<8x96xf32>
    %225 = arith.divf %223, %224 : vector<8x96xf32>
    %226 = vector.extract_strided_slice %225 {offsets = [0, 0], sizes = [8, 32], strides = [1, 1]} : vector<8x96xf32> to vector<8x32xf32>
    %227 = vector.extract_strided_slice %225 {offsets = [0, 32], sizes = [8, 32], strides = [1, 1]} : vector<8x96xf32> to vector<8x32xf32>
    %228 = vector.extract_strided_slice %225 {offsets = [0, 64], sizes = [8, 32], strides = [1, 1]} : vector<8x96xf32> to vector<8x32xf32>
    %229 = vector.extract_strided_slice %219 {offsets = [0, 96], sizes = [8, 32], strides = [1, 1]} : vector<8x128xf32> to vector<8x32xf32>
    %230 = math.tanh %229 : vector<8x32xf32>
    %231 = arith.mulf %227, %138 : vector<8x32xf32>
    %232 = arith.mulf %226, %230 : vector<8x32xf32>
    %233 = arith.addf %231, %232 : vector<8x32xf32>
    %234 = math.tanh %233 : vector<8x32xf32>
    %235 = arith.mulf %228, %234 : vector<8x32xf32>
    %cst_61 = arith.constant dense<0.000000e+00> : vector<8x128xf32>
    %236 = tpu.matmul %235, %3, %cst_61 {dimension_numbers = #tpu.dot_dimension_numbers<[1], [0], [0], [1], [0, 0, 1, 1], [], []>} : vector<8x32xf32>, vector<32x128xf32>, vector<8x128xf32> -> vector<8x128xf32>
    %237 = vector.broadcast %5 : vector<1x128xf32> to vector<8x128xf32>
    %238 = arith.addf %236, %237 : vector<8x128xf32>
    %cst_62 = arith.constant dense<0.000000e+00> : vector<8x128xf32>
    %239 = tpu.matmul %161, %4, %cst_62 {dimension_numbers = #tpu.dot_dimension_numbers<[1], [0], [0], [1], [0, 0, 1, 1], [], []>} : vector<8x16xf32>, vector<16x128xf32>, vector<8x128xf32> -> vector<8x128xf32>
    %240 = arith.addf %238, %239 : vector<8x128xf32>
    %241 = vector.extract_strided_slice %240 {offsets = [0, 0], sizes = [8, 48], strides = [1, 1]} : vector<8x128xf32> to vector<8x48xf32>
    %242 = arith.negf %241 : vector<8x48xf32>
    %243 = math.exp %242 : vector<8x48xf32>
    %cst_63 = arith.constant 1.000000e+00 : f32
    %244 = vector.broadcast %cst_63 : f32 to vector<8x48xf32>
    %245 = arith.addf %244, %243 : vector<8x48xf32>
    %246 = arith.divf %244, %245 : vector<8x48xf32>
    %247 = vector.extract_strided_slice %246 {offsets = [0, 0], sizes = [8, 16], strides = [1, 1]} : vector<8x48xf32> to vector<8x16xf32>
    %248 = vector.extract_strided_slice %246 {offsets = [0, 16], sizes = [8, 16], strides = [1, 1]} : vector<8x48xf32> to vector<8x16xf32>
    %249 = vector.extract_strided_slice %246 {offsets = [0, 32], sizes = [8, 16], strides = [1, 1]} : vector<8x48xf32> to vector<8x16xf32>
    %250 = vector.extract_strided_slice %240 {offsets = [0, 48], sizes = [8, 16], strides = [1, 1]} : vector<8x128xf32> to vector<8x16xf32>
    %251 = math.tanh %250 : vector<8x16xf32>
    %252 = arith.mulf %248, %159 : vector<8x16xf32>
    %253 = arith.mulf %247, %251 : vector<8x16xf32>
    %254 = arith.addf %252, %253 : vector<8x16xf32>
    %255 = math.tanh %254 : vector<8x16xf32>
    %256 = arith.mulf %249, %255 : vector<8x16xf32>
    %cst_64 = arith.constant dense<0.000000e+00> : vector<8x128xf32>
    %257 = tpu.matmul %256, %6, %cst_64 {dimension_numbers = #tpu.dot_dimension_numbers<[1], [0], [0], [1], [0, 0, 1, 1], [], []>} : vector<8x16xf32>, vector<16x128xf32>, vector<8x128xf32> -> vector<8x128xf32>
    %258 = vector.broadcast %8 : vector<1x128xf32> to vector<8x128xf32>
    %259 = arith.addf %257, %258 : vector<8x128xf32>
    %cst_65 = arith.constant dense<0.000000e+00> : vector<64x128xf32>
    %260 = tpu.matmul %186, %7, %cst_65 {dimension_numbers = #tpu.dot_dimension_numbers<[1], [0], [0], [1], [0, 0, 1, 1], [], []>} : vector<64x16xf32>, vector<16x128xf32>, vector<64x128xf32> -> vector<64x128xf32>
    %261 = vector.shape_cast %260 : vector<64x128xf32> to vector<8x8x128xf32>
    %262 = vector.shape_cast %259 : vector<8x128xf32> to vector<1x8x128xf32>
    %263 = vector.broadcast %262 : vector<1x8x128xf32> to vector<8x8x128xf32>
    %264 = arith.addf %261, %263 : vector<8x8x128xf32>
    %265 = vector.shape_cast %264 : vector<8x8x128xf32> to vector<64x128xf32>
    %266 = vector.extract_strided_slice %265 {offsets = [0, 0], sizes = [64, 48], strides = [1, 1]} : vector<64x128xf32> to vector<64x48xf32>
    %267 = arith.negf %266 : vector<64x48xf32>
    %268 = math.exp %267 : vector<64x48xf32>
    %cst_66 = arith.constant 1.000000e+00 : f32
    %269 = vector.broadcast %cst_66 : f32 to vector<64x48xf32>
    %270 = arith.addf %269, %268 : vector<64x48xf32>
    %271 = arith.divf %269, %270 : vector<64x48xf32>
    %272 = vector.extract_strided_slice %271 {offsets = [0, 0], sizes = [64, 16], strides = [1, 1]} : vector<64x48xf32> to vector<64x16xf32>
    %273 = vector.extract_strided_slice %271 {offsets = [0, 16], sizes = [64, 16], strides = [1, 1]} : vector<64x48xf32> to vector<64x16xf32>
    %274 = vector.extract_strided_slice %271 {offsets = [0, 32], sizes = [64, 16], strides = [1, 1]} : vector<64x48xf32> to vector<64x16xf32>
    %275 = vector.extract_strided_slice %265 {offsets = [0, 48], sizes = [64, 16], strides = [1, 1]} : vector<64x128xf32> to vector<64x16xf32>
    %276 = math.tanh %275 : vector<64x16xf32>
    %277 = arith.mulf %273, %184 : vector<64x16xf32>
    %278 = arith.mulf %272, %276 : vector<64x16xf32>
    %279 = arith.addf %277, %278 : vector<64x16xf32>
    %280 = math.tanh %279 : vector<64x16xf32>
    %281 = arith.mulf %274, %280 : vector<64x16xf32>
    %cst_67 = arith.constant dense<0.000000e+00> : vector<64x128xf32>
    %282 = tpu.matmul %281, %9, %cst_67 {dimension_numbers = #tpu.dot_dimension_numbers<[1], [0], [0], [1], [0, 0, 1, 1], [], []>} : vector<64x16xf32>, vector<16x128xf32>, vector<64x128xf32> -> vector<64x128xf32>
    %283 = vector.broadcast %11 : vector<1x128xf32> to vector<64x128xf32>
    %284 = arith.addf %282, %283 : vector<64x128xf32>
    %cst_68 = arith.constant dense<0.000000e+00> : vector<64x128xf32>
    %285 = tpu.matmul %207, %10, %cst_68 {dimension_numbers = #tpu.dot_dimension_numbers<[1], [0], [0], [1], [0, 0, 1, 1], [], []>} : vector<64x32xf32>, vector<32x128xf32>, vector<64x128xf32> -> vector<64x128xf32>
    %286 = arith.addf %284, %285 : vector<64x128xf32>
    %287 = vector.extract_strided_slice %286 {offsets = [0, 0], sizes = [64, 96], strides = [1, 1]} : vector<64x128xf32> to vector<64x96xf32>
    %288 = arith.negf %287 : vector<64x96xf32>
    %289 = math.exp %288 : vector<64x96xf32>
    %cst_69 = arith.constant 1.000000e+00 : f32
    %290 = vector.broadcast %cst_69 : f32 to vector<64x96xf32>
    %291 = arith.addf %290, %289 : vector<64x96xf32>
    %292 = arith.divf %290, %291 : vector<64x96xf32>
    %293 = vector.extract_strided_slice %292 {offsets = [0, 0], sizes = [64, 32], strides = [1, 1]} : vector<64x96xf32> to vector<64x32xf32>
    %294 = vector.extract_strided_slice %292 {offsets = [0, 32], sizes = [64, 32], strides = [1, 1]} : vector<64x96xf32> to vector<64x32xf32>
    %295 = vector.extract_strided_slice %292 {offsets = [0, 64], sizes = [64, 32], strides = [1, 1]} : vector<64x96xf32> to vector<64x32xf32>
    %296 = vector.extract_strided_slice %286 {offsets = [0, 96], sizes = [64, 32], strides = [1, 1]} : vector<64x128xf32> to vector<64x32xf32>
    %297 = math.tanh %296 : vector<64x32xf32>
    %298 = arith.mulf %294, %205 : vector<64x32xf32>
    %299 = arith.mulf %293, %297 : vector<64x32xf32>
    %300 = arith.addf %298, %299 : vector<64x32xf32>
    %301 = math.tanh %300 : vector<64x32xf32>
    %302 = arith.mulf %295, %301 : vector<64x32xf32>
    %cst_70 = arith.constant dense<0.000000e+00> : vector<1x64xf32>
    %303 = tpu.matmul %12, %302, %cst_70 {dimension_numbers = #tpu.dot_dimension_numbers<[1], [1], [0], [0], [0, 0, 1, 0], [], []>} : vector<1x32xf32>, vector<64x32xf32>, vector<1x64xf32> -> vector<1x64xf32>
    %304 = vector.broadcast %13 : vector<1x1xf32> to vector<1x64xf32>
    %305 = arith.addf %303, %304 : vector<1x64xf32>
    %c0_71 = arith.constant 0 : index
    %c128 = arith.constant 128 : index
    %306 = vector.load %arg3[%c0_71, %c128] : memref<1x256xf32, #tpu.memory_space<vmem>>, vector<1x64xf32>
    tpu.vector_store %arg3[%c0_71, %c128], %305 {strides = array<i32>} : memref<1x256xf32, #tpu.memory_space<vmem>>, vector<1x64xf32>,
    %c24_72 = arith.constant 24 : index
    %c0_73 = arith.constant 0 : index
    %307 = vector.load %arg0[%c24_72, %c0_73] : memref<32x1xf32, #tpu.memory_space<vmem>>, vector<8x1xf32>
    %308 = vector.broadcast %307 : vector<8x1xf32> to vector<8x128xf32>
    %309 = vector.broadcast %0 : vector<1x128xf32> to vector<8x128xf32>
    %310 = arith.mulf %308, %309 : vector<8x128xf32>
    %311 = vector.broadcast %1 : vector<1x128xf32> to vector<8x128xf32>
    %312 = arith.addf %310, %311 : vector<8x128xf32>
    %cst_74 = arith.constant dense<0.000000e+00> : vector<8x128xf32>
    %313 = tpu.matmul %235, %2, %cst_74 {dimension_numbers = #tpu.dot_dimension_numbers<[1], [0], [0], [1], [0, 0, 1, 1], [], []>} : vector<8x32xf32>, vector<32x128xf32>, vector<8x128xf32> -> vector<8x128xf32>
    %314 = arith.addf %312, %313 : vector<8x128xf32>
    %315 = vector.extract_strided_slice %314 {offsets = [0, 0], sizes = [8, 96], strides = [1, 1]} : vector<8x128xf32> to vector<8x96xf32>
    %316 = arith.negf %315 : vector<8x96xf32>
    %317 = math.exp %316 : vector<8x96xf32>
    %cst_75 = arith.constant 1.000000e+00 : f32
    %318 = vector.broadcast %cst_75 : f32 to vector<8x96xf32>
    %319 = arith.addf %318, %317 : vector<8x96xf32>
    %320 = arith.divf %318, %319 : vector<8x96xf32>
    %321 = vector.extract_strided_slice %320 {offsets = [0, 0], sizes = [8, 32], strides = [1, 1]} : vector<8x96xf32> to vector<8x32xf32>
    %322 = vector.extract_strided_slice %320 {offsets = [0, 32], sizes = [8, 32], strides = [1, 1]} : vector<8x96xf32> to vector<8x32xf32>
    %323 = vector.extract_strided_slice %320 {offsets = [0, 64], sizes = [8, 32], strides = [1, 1]} : vector<8x96xf32> to vector<8x32xf32>
    %324 = vector.extract_strided_slice %314 {offsets = [0, 96], sizes = [8, 32], strides = [1, 1]} : vector<8x128xf32> to vector<8x32xf32>
    %325 = math.tanh %324 : vector<8x32xf32>
    %326 = arith.mulf %322, %233 : vector<8x32xf32>
    %327 = arith.mulf %321, %325 : vector<8x32xf32>
    %328 = arith.addf %326, %327 : vector<8x32xf32>
    %329 = math.tanh %328 : vector<8x32xf32>
    %330 = arith.mulf %323, %329 : vector<8x32xf32>
    %cst_76 = arith.constant dense<0.000000e+00> : vector<8x128xf32>
    %331 = tpu.matmul %330, %3, %cst_76 {dimension_numbers = #tpu.dot_dimension_numbers<[1], [0], [0], [1], [0, 0, 1, 1], [], []>} : vector<8x32xf32>, vector<32x128xf32>, vector<8x128xf32> -> vector<8x128xf32>
    %332 = vector.broadcast %5 : vector<1x128xf32> to vector<8x128xf32>
    %333 = arith.addf %331, %332 : vector<8x128xf32>
    %cst_77 = arith.constant dense<0.000000e+00> : vector<8x128xf32>
    %334 = tpu.matmul %256, %4, %cst_77 {dimension_numbers = #tpu.dot_dimension_numbers<[1], [0], [0], [1], [0, 0, 1, 1], [], []>} : vector<8x16xf32>, vector<16x128xf32>, vector<8x128xf32> -> vector<8x128xf32>
    %335 = arith.addf %333, %334 : vector<8x128xf32>
    %336 = vector.extract_strided_slice %335 {offsets = [0, 0], sizes = [8, 48], strides = [1, 1]} : vector<8x128xf32> to vector<8x48xf32>
    %337 = arith.negf %336 : vector<8x48xf32>
    %338 = math.exp %337 : vector<8x48xf32>
    %cst_78 = arith.constant 1.000000e+00 : f32
    %339 = vector.broadcast %cst_78 : f32 to vector<8x48xf32>
    %340 = arith.addf %339, %338 : vector<8x48xf32>
    %341 = arith.divf %339, %340 : vector<8x48xf32>
    %342 = vector.extract_strided_slice %341 {offsets = [0, 0], sizes = [8, 16], strides = [1, 1]} : vector<8x48xf32> to vector<8x16xf32>
    %343 = vector.extract_strided_slice %341 {offsets = [0, 16], sizes = [8, 16], strides = [1, 1]} : vector<8x48xf32> to vector<8x16xf32>
    %344 = vector.extract_strided_slice %341 {offsets = [0, 32], sizes = [8, 16], strides = [1, 1]} : vector<8x48xf32> to vector<8x16xf32>
    %345 = vector.extract_strided_slice %335 {offsets = [0, 48], sizes = [8, 16], strides = [1, 1]} : vector<8x128xf32> to vector<8x16xf32>
    %346 = math.tanh %345 : vector<8x16xf32>
    %347 = arith.mulf %343, %254 : vector<8x16xf32>
    %348 = arith.mulf %342, %346 : vector<8x16xf32>
    %349 = arith.addf %347, %348 : vector<8x16xf32>
    %350 = math.tanh %349 : vector<8x16xf32>
    %351 = arith.mulf %344, %350 : vector<8x16xf32>
    %cst_79 = arith.constant dense<0.000000e+00> : vector<8x128xf32>
    %352 = tpu.matmul %351, %6, %cst_79 {dimension_numbers = #tpu.dot_dimension_numbers<[1], [0], [0], [1], [0, 0, 1, 1], [], []>} : vector<8x16xf32>, vector<16x128xf32>, vector<8x128xf32> -> vector<8x128xf32>
    %353 = vector.broadcast %8 : vector<1x128xf32> to vector<8x128xf32>
    %354 = arith.addf %352, %353 : vector<8x128xf32>
    %cst_80 = arith.constant dense<0.000000e+00> : vector<64x128xf32>
    %355 = tpu.matmul %281, %7, %cst_80 {dimension_numbers = #tpu.dot_dimension_numbers<[1], [0], [0], [1], [0, 0, 1, 1], [], []>} : vector<64x16xf32>, vector<16x128xf32>, vector<64x128xf32> -> vector<64x128xf32>
    %356 = vector.shape_cast %355 : vector<64x128xf32> to vector<8x8x128xf32>
    %357 = vector.shape_cast %354 : vector<8x128xf32> to vector<1x8x128xf32>
    %358 = vector.broadcast %357 : vector<1x8x128xf32> to vector<8x8x128xf32>
    %359 = arith.addf %356, %358 : vector<8x8x128xf32>
    %360 = vector.shape_cast %359 : vector<8x8x128xf32> to vector<64x128xf32>
    %361 = vector.extract_strided_slice %360 {offsets = [0, 0], sizes = [64, 48], strides = [1, 1]} : vector<64x128xf32> to vector<64x48xf32>
    %362 = arith.negf %361 : vector<64x48xf32>
    %363 = math.exp %362 : vector<64x48xf32>
    %cst_81 = arith.constant 1.000000e+00 : f32
    %364 = vector.broadcast %cst_81 : f32 to vector<64x48xf32>
    %365 = arith.addf %364, %363 : vector<64x48xf32>
    %366 = arith.divf %364, %365 : vector<64x48xf32>
    %367 = vector.extract_strided_slice %366 {offsets = [0, 0], sizes = [64, 16], strides = [1, 1]} : vector<64x48xf32> to vector<64x16xf32>
    %368 = vector.extract_strided_slice %366 {offsets = [0, 16], sizes = [64, 16], strides = [1, 1]} : vector<64x48xf32> to vector<64x16xf32>
    %369 = vector.extract_strided_slice %366 {offsets = [0, 32], sizes = [64, 16], strides = [1, 1]} : vector<64x48xf32> to vector<64x16xf32>
    %370 = vector.extract_strided_slice %360 {offsets = [0, 48], sizes = [64, 16], strides = [1, 1]} : vector<64x128xf32> to vector<64x16xf32>
    %371 = math.tanh %370 : vector<64x16xf32>
    %372 = arith.mulf %368, %279 : vector<64x16xf32>
    %373 = arith.mulf %367, %371 : vector<64x16xf32>
    %374 = arith.addf %372, %373 : vector<64x16xf32>
    %375 = math.tanh %374 : vector<64x16xf32>
    %376 = arith.mulf %369, %375 : vector<64x16xf32>
    %cst_82 = arith.constant dense<0.000000e+00> : vector<64x128xf32>
    %377 = tpu.matmul %376, %9, %cst_82 {dimension_numbers = #tpu.dot_dimension_numbers<[1], [0], [0], [1], [0, 0, 1, 1], [], []>} : vector<64x16xf32>, vector<16x128xf32>, vector<64x128xf32> -> vector<64x128xf32>
    %378 = vector.broadcast %11 : vector<1x128xf32> to vector<64x128xf32>
    %379 = arith.addf %377, %378 : vector<64x128xf32>
    %cst_83 = arith.constant dense<0.000000e+00> : vector<64x128xf32>
    %380 = tpu.matmul %302, %10, %cst_83 {dimension_numbers = #tpu.dot_dimension_numbers<[1], [0], [0], [1], [0, 0, 1, 1], [], []>} : vector<64x32xf32>, vector<32x128xf32>, vector<64x128xf32> -> vector<64x128xf32>
    %381 = arith.addf %379, %380 : vector<64x128xf32>
    %382 = vector.extract_strided_slice %381 {offsets = [0, 0], sizes = [64, 96], strides = [1, 1]} : vector<64x128xf32> to vector<64x96xf32>
    %383 = arith.negf %382 : vector<64x96xf32>
    %384 = math.exp %383 : vector<64x96xf32>
    %cst_84 = arith.constant 1.000000e+00 : f32
    %385 = vector.broadcast %cst_84 : f32 to vector<64x96xf32>
    %386 = arith.addf %385, %384 : vector<64x96xf32>
    %387 = arith.divf %385, %386 : vector<64x96xf32>
    %388 = vector.extract_strided_slice %387 {offsets = [0, 0], sizes = [64, 32], strides = [1, 1]} : vector<64x96xf32> to vector<64x32xf32>
    %389 = vector.extract_strided_slice %387 {offsets = [0, 32], sizes = [64, 32], strides = [1, 1]} : vector<64x96xf32> to vector<64x32xf32>
    %390 = vector.extract_strided_slice %387 {offsets = [0, 64], sizes = [64, 32], strides = [1, 1]} : vector<64x96xf32> to vector<64x32xf32>
    %391 = vector.extract_strided_slice %381 {offsets = [0, 96], sizes = [64, 32], strides = [1, 1]} : vector<64x128xf32> to vector<64x32xf32>
    %392 = math.tanh %391 : vector<64x32xf32>
    %393 = arith.mulf %389, %300 : vector<64x32xf32>
    %394 = arith.mulf %388, %392 : vector<64x32xf32>
    %395 = arith.addf %393, %394 : vector<64x32xf32>
    %396 = math.tanh %395 : vector<64x32xf32>
    %397 = arith.mulf %390, %396 : vector<64x32xf32>
    %cst_85 = arith.constant dense<0.000000e+00> : vector<1x64xf32>
    %398 = tpu.matmul %12, %397, %cst_85 {dimension_numbers = #tpu.dot_dimension_numbers<[1], [1], [0], [0], [0, 0, 1, 0], [], []>} : vector<1x32xf32>, vector<64x32xf32>, vector<1x64xf32> -> vector<1x64xf32>
    %399 = vector.broadcast %13 : vector<1x1xf32> to vector<1x64xf32>
    %400 = arith.addf %398, %399 : vector<1x64xf32>
    %c0_86 = arith.constant 0 : index
    %c192_87 = arith.constant 192 : index
    %401 = vector.load %arg3[%c0_86, %c192_87] : memref<1x256xf32, #tpu.memory_space<vmem>>, vector<1x64xf32>
    tpu.vector_store %arg3[%c0_86, %c192_87], %400 {strides = array<i32>} : memref<1x256xf32, #tpu.memory_space<vmem>>, vector<1x64xf32>,
    %c0_88 = arith.constant 0 : index
    %c0_89 = arith.constant 0 : index
    %402 = vector.load %arg4[%c0_88, %c0_89] : memref<288x32xf32, #tpu.memory_space<vmem>>, vector<8x32xf32>
    tpu.vector_store %arg4[%c0_88, %c0_89], %330 {strides = array<i32>} : memref<288x32xf32, #tpu.memory_space<vmem>>, vector<8x32xf32>,
    %c8_90 = arith.constant 8 : index
    %c0_91 = arith.constant 0 : index
    %403 = vector.load %arg4[%c8_90, %c0_91] : memref<288x32xf32, #tpu.memory_space<vmem>>, vector<8x32xf32>
    tpu.vector_store %arg4[%c8_90, %c0_91], %328 {strides = array<i32>} : memref<288x32xf32, #tpu.memory_space<vmem>>, vector<8x32xf32>,
    %c16_92 = arith.constant 16 : index
    %c0_93 = arith.constant 0 : index
    %404 = vector.load %arg4[%c16_92, %c0_93] : memref<288x32xf32, #tpu.memory_space<vmem>>, vector<8x16xf32>
    tpu.vector_store %arg4[%c16_92, %c0_93], %351 {strides = array<i32>} : memref<288x32xf32, #tpu.memory_space<vmem>>, vector<8x16xf32>,
    %c24_94 = arith.constant 24 : index
    %c0_95 = arith.constant 0 : index
    %405 = vector.load %arg4[%c24_94, %c0_95] : memref<288x32xf32, #tpu.memory_space<vmem>>, vector<8x16xf32>
    tpu.vector_store %arg4[%c24_94, %c0_95], %349 {strides = array<i32>} : memref<288x32xf32, #tpu.memory_space<vmem>>, vector<8x16xf32>,
    %c32_96 = arith.constant 32 : index
    %c0_97 = arith.constant 0 : index
    %406 = vector.load %arg4[%c32_96, %c0_97] : memref<288x32xf32, #tpu.memory_space<vmem>>, vector<64x16xf32>
    tpu.vector_store %arg4[%c32_96, %c0_97], %376 {strides = array<i32>} : memref<288x32xf32, #tpu.memory_space<vmem>>, vector<64x16xf32>,
    %c96_98 = arith.constant 96 : index
    %c0_99 = arith.constant 0 : index
    %407 = vector.load %arg4[%c96_98, %c0_99] : memref<288x32xf32, #tpu.memory_space<vmem>>, vector<64x16xf32>
    tpu.vector_store %arg4[%c96_98, %c0_99], %374 {strides = array<i32>} : memref<288x32xf32, #tpu.memory_space<vmem>>, vector<64x16xf32>,
    %c160_100 = arith.constant 160 : index
    %c0_101 = arith.constant 0 : index
    %408 = vector.load %arg4[%c160_100, %c0_101] : memref<288x32xf32, #tpu.memory_space<vmem>>, vector<64x32xf32>
    tpu.vector_store %arg4[%c160_100, %c0_101], %397 {strides = array<i32>} : memref<288x32xf32, #tpu.memory_space<vmem>>, vector<64x32xf32>,
    %c224_102 = arith.constant 224 : index
    %c0_103 = arith.constant 0 : index
    %409 = vector.load %arg4[%c224_102, %c0_103] : memref<288x32xf32, #tpu.memory_space<vmem>>, vector<64x32xf32>
    tpu.vector_store %arg4[%c224_102, %c0_103], %395 {strides = array<i32>} : memref<288x32xf32, #tpu.memory_space<vmem>>, vector<64x32xf32>,
    return
  }
}

</mosaic_0001>

<bundles_post_ra>
// kernel: forward.1
= control target key start
LH: loop header
LB: loop body
LE: loop exit
PB: predicated region body
PF: predicated region fallthrough
CT: control target
= control target key end

     0   :  { %v9016_v0 = vmov 0.0|0.0   ;;  %vm7026_vm0 = vmmov 0   ;;  %v9014_v4 = vmov 0.0   ;;  %v7028_v7 = vmov 0   ;;  %s7029_s27 = smov 32   ;;  %s7030_s16 = smov 64   ;;  %s9009_s1 = inlined_call_operand.vmem [shape: f32[216,128], index: 1, kind: input, shape index: {}]   ;;  %s9010_s0 = inlined_call_operand.vmem [shape: f32[32,1], index: 0, kind: input, shape index: {}]   ;;  %s9011_s2 = inlined_call_operand.vmem [shape: f32[288,32], index: 2, kind: input, shape index: {}, may-alias: {2,4}]   ;;  %s9012_s4 = inlined_call_operand.vmem [shape: f32[288,32], index: 4, kind: output, shape index: {1}, may-alias: {2,4}]   ;;  %s9013_s3 = inlined_call_operand.vmem [shape: f32[1,256], index: 3, kind: output, shape index: {0}]  }
   0x1   :  { %6149 = vmatprep.subr.bf16.mxu0 %v9016_v0  ;;  %v18_v1 = vld [vmem:[%s9009_s1 + $0x10] sm:$0xff]  ;;  %v19_v2 = vld [vmem:[%s9009_s1 + $0x18] sm:$0xff]  ;;  %v20_v3 = vld [vmem:[%s9009_s1 + $0x20] sm:$0xff]  ;;  %5729 = vmatprep.mubr.msk.f32.mxu0 %vm7026_vm0, %v9014_v4  ;;  %vm95_vm1 = vcmask 261120   ;;  %s7031_s19 = smov 16   ;;  %vm277_vm2 = vcmask 130048  }
   0x2   :  { %v7073_v5 = vpack.c.bf16 %v19_v2, %v18_v1  ;;  %v21_v6 = vld [vmem:[%s9009_s1 + $0x28] sm:$0xff]  ;;  %6436 = vset.pattern.permute.xlu0 %v7028_v7  ;;  %v79_v8 = vld [vmem:[%s9010_s0] sm:$0xff]  ;;  %6155 = vmatprep.subr.bf16.mxu1 %v9016_v0  ;;  %v22_v31 = vld [vmem:[%s9009_s1 + $0x30] sm:$0xff]  ;;  %s7032_s29 = smov 80   ;;  %s7033_s12 = smov 96  }
   0x3   :  { %82 = vperm.xlu0 %6436, %v79_v8   ;;  %v44_v9 = vld [vmem:[%s9011_s2 + $0x8] sm:$0xff]  ;;  %5740 = vmatprep.mubr.msk.f32.mxu1 %vm7026_vm0, %v9014_v4  ;;  %v7088_v10 = vpack.c.bf16 %v21_v6, %v20_v3  ;;  %v43_v11 = vld [vmem:[%s9011_s2] sm:$0xff]  ;;  %v23_v32 = vld [vmem:[%s9009_s1 + $0x38] sm:$0xff]  ;;  %s7034_s9 = smov 112  }
   0x4   :  { %6151 = vmatpush3.bf16.msra.mxu0 %v7073_v5  ;;  %178 = vrot.lane.b32.xlu1 %v44_v9, %s7029_s27  ;;  %v7103_v12 = vld [vmem:[%s9009_s1] ss:$0 sm:$0xff]  ;;  %v7109_v15 = vld [vmem:[%s9009_s1 + $0x8] ss:$0 sm:$0xff]  ;;  %v7126_v34 = vpack.c.bf16 %v23_v32, %v22_v31  ;;  %v46_v40 = vld [vmem:[%s9011_s2 + $0x18] sm:$0xff] }
   0x5   :  { %6152 = vmatprep.subr.bf16.mxu0 %v9016_v0  ;;  %6437 = vset.pattern.permute.xlu1 %v7028_v7  ;;  %v24_v33 = vld [vmem:[%s9009_s1 + $0x40] sm:$0xff]  ;;  %v25_v35 = vld [vmem:[%s9009_s1 + $0x48] sm:$0xff]  ;;  %v26_v41 = vld [vmem:[%s9009_s1 + $0x50] sm:$0xff] }
   0x6   :  { %6157 = vmatpush3.bf16.msra.mxu1 %v7126_v34  ;;  %v7132_v36 = vpack.c.bf16 %v25_v35, %v24_v33  ;;  %v27_v42 = vld [vmem:[%s9009_s1 + $0x58] sm:$0xff]  ;;  %v45_v45 = vld [vmem:[%s9011_s2 + $0x10] sm:$0xff]  ;;  %v5272_v46 = vld [vmem:[%s9009_s1 + $0x60] ss:$0 sm:$0xff] }
   0x7   :  { %6158 = vmatprep.subr.bf16.mxu1 %v9016_v0  ;;  %v7149_v43 = vpack.c.bf16 %v27_v42, %v26_v41  ;;  %v29_v61 = vld [vmem:[%s9009_s1 + $0x68] sm:$0xff]  ;;  %v30_v62 = vld [vmem:[%s9009_s1 + $0x70] sm:$0xff]  ;;  %v31_v2 = vld [vmem:[%s9009_s1 + $0x78] sm:$0xff] }
   0x8   :  { %6154 = vmatpush3.bf16.msra.mxu0 %v7088_v10  ;;  %v7176_v63 = vpack.c.bf16 %v30_v62, %v29_v61  ;;  %v32_v3 = vld [vmem:[%s9009_s1 + $0x80] sm:$0xff]  ;;  %v62_v61 = vld [vmem:[%s9011_s2 + $0x98] sm:$0xff]  ;;  %v61_v62 = vld [vmem:[%s9011_s2 + $0x90] sm:$0xff] }
   0x9   :  { %6164 = vmatprep.subr.bf16.mxu0 %v9016_v0  ;;  %v7186_v6 = vpack.c.bf16 %v32_v3, %v31_v2  ;;  %v47_v9 = vld [vmem:[%s9011_s2 + $0x20] sm:$0xff]  ;;  %vm7623_vm3 = vmpackc.low %vm95_vm1, %vm95_vm1 }
   0xa   :  { %6160 = vmatpush3.bf16.msra.mxu1 %v7132_v36 }
   0xb   :  { %5730 = vmatmul.mubr.msk.f32.vlgmr.msra.gmra.mrb[0].mxu0 %vm95_vm1, %v43_v11  ;;  %6161 = vmatprep.subr.bf16.mxu1 %v9016_v0 }
   0xc   :  { %5754 = vmatprep.mubr.msk.f32.mxu0 %vm7026_vm0, %v9014_v4  ;;  %6166 = vmatpush3.bf16.msra.mxu0 %v7176_v63 }
   0xd   :  { %6168 = vmatprep.subr.bf16.mxu0 %v7186_v6 }
  0x76   :  { %v179_v27 = vpop.permute.xlu1 %178 }
  0x82   :  { %v83_v13 = vpop.permute.xlu0 %82 }
  0x83   :  { %v89_v14 = vmul.f32 %v7103_v12, %v83_v13  ;;  %v48_v13 = vld [vmem:[%s9011_s2 + $0x28] sm:$0xff] }
  0x85   :  { %v94_v16 = vadd.f32 %v7109_v15, %v89_v14  ;;  %v49_v14 = vld [vmem:[%s9011_s2 + $0x30] sm:$0xff] }
  0xde   :  { %v165_v17 = vpop.f32.mrb[0].mxu0 }
  0xdf   :  { %v169_v18 = vadd.f32 %v165_v17, %v94_v16  ;;  %v5731_v19 = vpop.f32.mrb[1].mxu0  ;;  %v50_v16 = vld [vmem:[%s9011_s2 + $0x38] sm:$0xff]  ;;  %v51_v17 = vld [vmem:[%s9011_s2 + $0x40] sm:$0xff] }
  0xe0   :  { %v53_v19 = vld [vmem:[%s9011_s2 + $0x50] sm:$0xff] }
  0xe1   :  { %6438 = vtanh.f32 %v169_v18  ;;  %v5271_v21 = vmul.f32 -1.442695, %v169_v18  ;;  %v52_v18 = vld [vmem:[%s9011_s2 + $0x48] sm:$0xff] }
  0xe3   :  { %6440 = vpow2.f32 %v5271_v21  ;;  %v5276_v21 = vld [vmem:[%s9009_s1 + $0x88] ss:$0 sm:$0xff] }
  0xeb   :  { %v6439_v20 = vpop.eup %6438 }
  0xec   :  { %183 = vrot.lane.b32.xlu0 %v6439_v20, %s7029_s27  ;;  %v54_v20 = vld [vmem:[%s9011_s2 + $0x58] sm:$0xff] }
  0xed   :  { %v6441_v22 = vpop.eup %6440 }
  0xee   :  { %v173_v23 = vadd.f32 1.0, %v6441_v22 }
  0xf0   :  { %6442 = vrcp.f32 %v173_v23 }
  0xfa   :  { %v6443_v24 = vpop.eup %6442 }
  0xfb   :  { %v181_v28 = vmul.f32 %v6443_v24, %v179_v27 }
 0x15e   :  { %v184_v25 = vpop.permute.xlu0 %183 }
 0x15f   :  { %v186_v26 = vmul.f32 %v6443_v24, %v184_v25 }
 0x161   :  { %188 = vrot.lane.b32.xlu1 %v186_v26, %s7029_s27 }
 0x1d3   :  { %v189_v29 = vpop.permute.xlu1 %188 }
 0x1d4   :  { %v7114_v30 = vadd.f32 %v189_v29, %v181_v28 }
 0x1d6   :  { %6444 = vtanh.f32 %v7114_v30 }
 0x1e0   :  { %v6445_v37 = vpop.eup %6444 }
 0x1e1   :  { %194 = vrot.lane.b32.xlu0 %v6445_v37, %s7029_s27 }
 0x253   :  { %v195_v38 = vpop.permute.xlu0 %194 }
 0x254   :  { %v197_v39 = vmul.f32 %v6443_v24, %v195_v38 }
 0x256   :  { %203 = vrot.lane.b32.xlu1 %v197_v39, %s7030_s16 }
 0x25a   :  { %360 = vrot.lane.b32.xlu1 %v46_v40, %s7031_s19 }
 0x2c8   :  { %v7151_v44 = vpop.permute.xlu1 %203 }
 0x2c9   :  { %5741 = vmatmul.mubr.msk.f32.vlgmr.msra.gmra.mrb[0].mxu1 %vm95_vm1, %v7151_v44 }
 0x2ca   :  { %6163 = vmatpush3.bf16.msra.mxu1 %v7149_v43  ;;  %5747 = vmatprep.mubr.msk.f32.mxu1 %vm7026_vm0, %v9014_v4 }
 0x2cc   :  { %v361_v57 = vpop.permute.xlu1 %360 }
 0x2d1   :  { %5748 = vmatmul.mubr.msk.f32.vlgmr.msra.gmra.mrb[0].mxu1 %vm277_vm2, %v45_v45 }
 0x3a4   :  { %v347_v47 = vpop.f32.mrb[0].mxu1 }
 0x3a5   :  { %v6349_v48 = vadd.f32 %v5272_v46, %v347_v47  ;;  %v5749_v49 = vpop.f32.mrb[1].mxu1 }
 0x3a7   :  { %6446 = vtanh.f32 %v6349_v48  ;;  %v5275_v51 = vmul.f32 -1.442695, %v6349_v48 }
 0x3a9   :  { %6448 = vpow2.f32 %v5275_v51 }
 0x3b1   :  { %v6447_v50 = vpop.eup %6446 }
 0x3b2   :  { %365 = vrot.lane.b32.xlu0 %v6447_v50, %s7032_s29 }
 0x3b3   :  { %v6449_v52 = vpop.eup %6448 }
 0x3b4   :  { %v355_v53 = vadd.f32 1.0, %v6449_v52 }
 0x3b6   :  { %6450 = vrcp.f32 %v355_v53 }
 0x3c0   :  { %v6451_v54 = vpop.eup %6450 }
 0x3c1   :  { %v363_v58 = vmul.f32 %v6451_v54, %v361_v57  ;;  %v57_v57 = vld [vmem:[%s9011_s2 + $0x70] sm:$0xff] }
 0x424   :  { %v366_v55 = vpop.permute.xlu0 %365 }
 0x425   :  { %v368_v56 = vmul.f32 %v6451_v54, %v366_v55  ;;  %v55_v55 = vld [vmem:[%s9011_s2 + $0x60] sm:$0xff] }
 0x427   :  { %370 = vrot.lane.b32.xlu0 %v368_v56, %s7031_s19  ;;  %v58_v56 = vld [vmem:[%s9011_s2 + $0x78] sm:$0xff] }
 0x499   :  { %v371_v59 = vpop.permute.xlu0 %370 }
 0x49a   :  { %v7167_v60 = vadd.f32 %v371_v59, %v363_v58  ;;  %v60_v58 = vld [vmem:[%s9011_s2 + $0x88] sm:$0xff]  ;;  %v59_v59 = vld [vmem:[%s9011_s2 + $0x80] sm:$0xff] }
 0x49c   :  { %6452 = vtanh.f32 %v7167_v60 }
 0x4a6   :  { %v6453_v1 = vpop.eup %6452 }
 0x4a7   :  { %376 = vrot.lane.b32.xlu1 %v6453_v1, %s7031_s19 }
 0x519   :  { %v377_v7 = vpop.permute.xlu1 %376 }
 0x51a   :  { %v379_v8 = vmul.f32 %v6451_v54, %v377_v7  ;;  %v56_v54 = vld [vmem:[%s9011_s2 + $0x68] sm:$0xff] }
 0x51c   :  { %385 = vrot.lane.b32.xlu0 %v379_v8, %s7033_s12 }
 0x58e   :  { %v7193_v11 = vpop.permute.xlu0 %385 }
 0x58f   :  { %5755 = vmatmul.mubr.msk.f32.vlgmr.msra.gmra.mrb[2].mxu0 %vm277_vm2, %v7193_v11 }
 0x590   :  { %6170 = vmatpush3.bf16.msra.mxu0 %v7186_v6  ;;  %5761 = vmatprep.mubr.msk.f32.mxu0 %vm277_vm2, %v47_v9 }
 0x591   :  { %6183 = vmatprep.subr.bf16.mxu0 %v9016_v0 }
 0x593   :  { %5762 = vmatmul.mubr.msk.f32.vlgmr.msra.gmra.mrb[4].mxu0 %vm277_vm2, %v48_v13 }
 0x594   :  { %5764 = vmatprep.mubr.msk.f32.mxu0 %vm277_vm2, %v49_v14 }
 0x597   :  { %5765 = vmatmul.mubr.msk.f32.gmra.mrb[6].mxu0 %vm277_vm2, %v50_v16 }
 0x598   :  { %5767 = vmatprep.mubr.msk.f32.mxu0 %vm277_vm2, %v51_v17 }
 0x59b   :  { %5768 = vmatmul.mubr.msk.f32.gmra.mrb[8].mxu0 %vm277_vm2, %v52_v18 }
 0x59c   :  { %5770 = vmatprep.mubr.msk.f32.mxu0 %vm277_vm2, %v53_v19 }
 0x59f   :  { %5771 = vmatmul.mubr.msk.f32.gmra.mrb[10].mxu0 %vm277_vm2, %v54_v20 }
 0x5a0   :  { %5825 = vmatprep.mubr.msk.f32.mxu0 %vm7026_vm0, %v9014_v4 }
 0x662   :  { %v455_v22 = vpop.f32.mrb[2].mxu0 }
 0x663   :  { %v5756_v23 = vpop.f32.mrb[3].mxu0  ;;  %v456_v24 = vadd.f32 %v5276_v21, %v455_v22 }
 0x666   :  { %v5763_v25 = vpop.f32.mrb[4].mxu0 }
 0x667   :  { %v589_v26 = vadd.f32 %v5763_v25, %v456_v24  ;;  %v549_v27 = vpop.f32.mrb[5].mxu0 }
 0x668   :  { %v588_v28 = vadd.f32 %v549_v27, %v456_v24 }
 0x669   :  { %6454 = vtanh.f32 %v589_v26  ;;  %v5287_v1 = vmul.f32 -1.442695, %v589_v26 }
 0x66a   :  { %6456 = vtanh.f32 %v588_v28  ;;  %v5766_v29 = vpop.f32.mrb[6].mxu0  ;;  %v5286_v2 = vmul.f32 -1.442695, %v588_v28 }
 0x66b   :  { %v591_v31 = vadd.f32 %v5766_v29, %v456_v24  ;;  %v559_v32 = vpop.f32.mrb[7].mxu0 }
 0x66c   :  { %v590_v33 = vadd.f32 %v559_v32, %v456_v24 }
 0x66d   :  { %6458 = vtanh.f32 %v591_v31  ;;  %v5289_v3 = vmul.f32 -1.442695, %v591_v31 }
 0x66e   :  { %6460 = vtanh.f32 %v590_v33  ;;  %v5769_v35 = vpop.f32.mrb[8].mxu0  ;;  %v5288_v7 = vmul.f32 -1.442695, %v590_v33 }
 0x66f   :  { %v593_v37 = vadd.f32 %v5769_v35, %v456_v24  ;;  %v569_v38 = vpop.f32.mrb[9].mxu0 }
 0x670   :  { %v592_v39 = vadd.f32 %v569_v38, %v456_v24 }
 0x671   :  { %6462 = vtanh.f32 %v593_v37  ;;  %v5291_v8 = vmul.f32 -1.442695, %v593_v37 }
 0x672   :  { %6464 = vtanh.f32 %v592_v39  ;;  %v5772_v40 = vpop.f32.mrb[10].mxu0  ;;  %v5290_v9 = vmul.f32 -1.442695, %v592_v39 }
 0x673   :  { %v6455_v41 = vpop.eup %6454  ;;  %v595_v42 = vadd.f32 %v5772_v40, %v456_v24  ;;  %v579_v45 = vpop.f32.mrb[11].mxu0 }
 0x674   :  { %v6457_v46 = vpop.eup %6456  ;;  %v594_v47 = vadd.f32 %v579_v45, %v456_v24  ;;  %702 = vrot.lane.b32.xlu0 %v6455_v41, %s7032_s29 }
 0x675   :  { %6466 = vtanh.f32 %v595_v42  ;;  %700 = vrot.lane.b32.xlu1 %v6457_v46, %s7032_s29  ;;  %v5293_v13 = vmul.f32 -1.442695, %v595_v42 }
 0x676   :  { %6468 = vtanh.f32 %v594_v47  ;;  %v5292_v14 = vmul.f32 -1.442695, %v594_v47 }
 0x677   :  { %v6459_v48 = vpop.eup %6458  ;;  %6470 = vpow2.f32 %v5287_v1 }
 0x678   :  { %v6461_v49 = vpop.eup %6460  ;;  %706 = vrot.lane.b32.xlu0 %v6459_v48, %s7032_s29  ;;  %6472 = vpow2.f32 %v5286_v2 }
 0x679   :  { %704 = vrot.lane.b32.xlu1 %v6461_v49, %s7032_s29  ;;  %6474 = vpow2.f32 %v5289_v3 }
 0x67a   :  { %6476 = vpow2.f32 %v5288_v7 }
 0x67b   :  { %v6463_v50 = vpop.eup %6462  ;;  %6478 = vpow2.f32 %v5291_v8 }
 0x67c   :  { %v6465_v51 = vpop.eup %6464  ;;  %710 = vrot.lane.b32.xlu0 %v6463_v50, %s7032_s29  ;;  %6480 = vpow2.f32 %v5290_v9 }
 0x67d   :  { %708 = vrot.lane.b32.xlu1 %v6465_v51, %s7032_s29  ;;  %6482 = vpow2.f32 %v5293_v13 }
 0x67e   :  { %6484 = vpow2.f32 %v5292_v14 }
 0x67f   :  { %v6467_v52 = vpop.eup %6466 }
 0x680   :  { %v6469_v53 = vpop.eup %6468  ;;  %714 = vrot.lane.b32.xlu0 %v6467_v52, %s7032_s29 }
 0x681   :  { %712 = vrot.lane.b32.xlu1 %v6469_v53, %s7032_s29  ;;  %v6471_v16 = vpop.eup %6470 }
 0x682   :  { %v6473_v17 = vpop.eup %6472  ;;  %v621_v18 = vadd.f32 1.0, %v6471_v16 }
 0x683   :  { %v6475_v19 = vpop.eup %6474  ;;  %v620_v20 = vadd.f32 1.0, %v6473_v17 }
 0x684   :  { %662 = vrot.lane.b32.xlu0 %v56_v54, %s7031_s19  ;;  %v6477_v21 = vpop.eup %6476  ;;  %6486 = vrcp.f32 %v621_v18  ;;  %v623_v22 = vadd.f32 1.0, %v6475_v19 }
 0x685   :  { %660 = vrot.lane.b32.xlu1 %v55_v55, %s7031_s19  ;;  %v6479_v23 = vpop.eup %6478  ;;  %6488 = vrcp.f32 %v620_v20  ;;  %v622_v24 = vadd.f32 1.0, %v6477_v21 }
 0x686   :  { %v6481_v25 = vpop.eup %6480  ;;  %6490 = vrcp.f32 %v623_v22  ;;  %v625_v26 = vadd.f32 1.0, %v6479_v23 }
 0x687   :  { %v6483_v27 = vpop.eup %6482  ;;  %6492 = vrcp.f32 %v622_v24  ;;  %v624_v28 = vadd.f32 1.0, %v6481_v25 }
 0x688   :  { %666 = vrot.lane.b32.xlu0 %v58_v56, %s7031_s19  ;;  %v6485_v29 = vpop.eup %6484  ;;  %6494 = vrcp.f32 %v625_v26  ;;  %v627_v31 = vadd.f32 1.0, %v6483_v27 }
 0x689   :  { %664 = vrot.lane.b32.xlu1 %v57_v57, %s7031_s19  ;;  %6496 = vrcp.f32 %v624_v28  ;;  %v626_v32 = vadd.f32 1.0, %v6485_v29 }
 0x68a   :  { %6498 = vrcp.f32 %v627_v31 }
 0x68b   :  { %6500 = vrcp.f32 %v626_v32 }
 0x68c   :  { %670 = vrot.lane.b32.xlu0 %v60_v58, %s7031_s19 }
 0x68d   :  { %668 = vrot.lane.b32.xlu1 %v59_v59, %s7031_s19 }
 0x68e   :  { %v7273_v33 = vpop.eup %6486 }
 0x68f   :  { %v7275_v37 = vpop.eup %6488 }
 0x690   :  { %674 = vrot.lane.b32.xlu0 %v62_v61, %s7031_s19  ;;  %v7280_v41 = vpop.eup %6490 }
 0x691   :  { %672 = vrot.lane.b32.xlu1 %v61_v62, %s7031_s19  ;;  %v7283_v45 = vpop.eup %6492 }
 0x692   :  { %v7288_v49 = vpop.eup %6494 }
 0x693   :  { %v7291_v51 = vpop.eup %6496 }
 0x694   :  { %v7296_v55 = vpop.eup %6498 }
 0x695   :  { %v7299_v57 = vpop.eup %6500 }
 0x6e6   :  { %v703_v35 = vpop.permute.xlu0 %702 }
 0x6e7   :  { %v725_v38 = vmul.f32 %v7273_v33, %v703_v35  ;;  %v701_v39 = vpop.permute.xlu1 %700 }
 0x6e8   :  { %v724_v40 = vmul.f32 %v7275_v37, %v701_v39 }
 0x6e9   :  { %742 = vrot.lane.b32.xlu0 %v725_v38, %s7031_s19 }
 0x6ea   :  { %v707_v42 = vpop.permute.xlu0 %706  ;;  %740 = vrot.lane.b32.xlu1 %v724_v40, %s7031_s19 }
 0x6eb   :  { %v727_v46 = vmul.f32 %v7280_v41, %v707_v42  ;;  %v705_v47 = vpop.permute.xlu1 %704 }
 0x6ec   :  { %v726_v48 = vmul.f32 %v7283_v45, %v705_v47 }
 0x6ed   :  { %746 = vrot.lane.b32.xlu0 %v727_v46, %s7031_s19 }
 0x6ee   :  { %v711_v50 = vpop.permute.xlu0 %710  ;;  %744 = vrot.lane.b32.xlu1 %v726_v48, %s7031_s19 }
 0x6ef   :  { %v729_v52 = vmul.f32 %v7288_v49, %v711_v50  ;;  %v709_v53 = vpop.permute.xlu1 %708 }
 0x6f0   :  { %v728_v54 = vmul.f32 %v7291_v51, %v709_v53  ;;  %v35_v53 = vld [vmem:[%s9009_s1 + $0x98] sm:$0xff] }
 0x6f1   :  { %750 = vrot.lane.b32.xlu0 %v729_v52, %s7031_s19  ;;  %v34_v52 = vld [vmem:[%s9009_s1 + $0x90] sm:$0xff] }
 0x6f2   :  { %v715_v56 = vpop.permute.xlu0 %714  ;;  %748 = vrot.lane.b32.xlu1 %v728_v54, %s7031_s19 }
 0x6f3   :  { %v731_v58 = vmul.f32 %v7296_v55, %v715_v56  ;;  %v713_v59 = vpop.permute.xlu1 %712  ;;  %v7345_v56 = vpack.c.bf16 %v35_v53, %v34_v52  ;;  %v64_v52 = vld [vmem:[%s9011_s2 + $0xa8] sm:$0xff]  ;;  %v65_v53 = vld [vmem:[%s9011_s2 + $0xb0] sm:$0xff] }
 0x6f4   :  { %v730_v61 = vmul.f32 %v7299_v57, %v713_v59 }
 0x6f5   :  { %754 = vrot.lane.b32.xlu0 %v731_v58, %s7031_s19  ;;  %6172 = vmatprep.subr.bf16.mxu1 %v7345_v56 }
 0x6f6   :  { %752 = vrot.lane.b32.xlu1 %v730_v61, %s7031_s19  ;;  %v663_v62 = vpop.permute.xlu0 %662  ;;  %6174 = vmatpush3.bf16.msra.mxu1 %v7345_v56 }
 0x6f7   :  { %v661_v1 = vpop.permute.xlu1 %660  ;;  %v685_v14 = vmul.f32 %v7273_v33, %v663_v62 }
 0x6f8   :  { %v684_v16 = vmul.f32 %v7275_v37, %v661_v1 }
 0x6fa   :  { %v667_v2 = vpop.permute.xlu0 %666 }
 0x6fb   :  { %v665_v3 = vpop.permute.xlu1 %664  ;;  %v687_v21 = vmul.f32 %v7280_v41, %v667_v2  ;;  %v36_v2 = vld [vmem:[%s9009_s1 + $0xa0] sm:$0xff] }
 0x6fc   :  { %v686_v22 = vmul.f32 %v7283_v45, %v665_v3  ;;  %v37_v3 = vld [vmem:[%s9009_s1 + $0xa8] sm:$0xff] }
 0x6fe   :  { %v671_v7 = vpop.permute.xlu0 %670 }
 0x6ff   :  { %v669_v8 = vpop.permute.xlu1 %668  ;;  %v689_v27 = vmul.f32 %v7288_v49, %v671_v7  ;;  %v7361_v7 = vpack.c.bf16 %v37_v3, %v36_v2 }
 0x700   :  { %v688_v28 = vmul.f32 %v7291_v51, %v669_v8 }
 0x701   :  { %6176 = vmatprep.subr.bf16.mxu1 %v7361_v7 }
 0x702   :  { %v675_v9 = vpop.permute.xlu0 %674 }
 0x703   :  { %v673_v13 = vpop.permute.xlu1 %672  ;;  %v691_v38 = vmul.f32 %v7296_v55, %v675_v9 }
 0x704   :  { %v690_v39 = vmul.f32 %v7299_v57, %v673_v13 }
 0x75b   :  { %v743_v17 = vpop.permute.xlu0 %742 }
 0x75c   :  { %v7307_v18 = vadd.f32 %v743_v17, %v685_v14  ;;  %v741_v19 = vpop.permute.xlu1 %740 }
 0x75d   :  { %v7309_v20 = vadd.f32 %v741_v19, %v684_v16 }
 0x75e   :  { %6502 = vtanh.f32 %v7307_v18 }
 0x75f   :  { %6504 = vtanh.f32 %v7309_v20  ;;  %v747_v23 = vpop.permute.xlu0 %746 }
 0x760   :  { %v7315_v24 = vadd.f32 %v747_v23, %v687_v21  ;;  %v745_v25 = vpop.permute.xlu1 %744 }
 0x761   :  { %v7317_v26 = vadd.f32 %v745_v25, %v686_v22 }
 0x762   :  { %6506 = vtanh.f32 %v7315_v24 }
 0x763   :  { %6508 = vtanh.f32 %v7317_v26  ;;  %v751_v29 = vpop.permute.xlu0 %750 }
 0x764   :  { %v7323_v31 = vadd.f32 %v751_v29, %v689_v27  ;;  %v749_v32 = vpop.permute.xlu1 %748 }
 0x765   :  { %v7325_v35 = vadd.f32 %v749_v32, %v688_v28 }
 0x766   :  { %6510 = vtanh.f32 %v7323_v31 }
 0x767   :  { %6512 = vtanh.f32 %v7325_v35  ;;  %v755_v40 = vpop.permute.xlu0 %754 }
 0x768   :  { %v6503_v42 = vpop.eup %6502  ;;  %v7331_v46 = vadd.f32 %v755_v40, %v691_v38  ;;  %v753_v47 = vpop.permute.xlu1 %752 }
 0x769   :  { %v6505_v48 = vpop.eup %6504  ;;  %v7333_v50 = vadd.f32 %v753_v47, %v690_v39  ;;  %790 = vrot.lane.b32.xlu0 %v6503_v42, %s7031_s19  ;;  %v63_v47 = vld [vmem:[%s9011_s2 + $0xa0] sm:$0xff] }
 0x76a   :  { %6514 = vtanh.f32 %v7331_v46  ;;  %788 = vrot.lane.b32.xlu1 %v6505_v48, %s7031_s19 }
 0x76b   :  { %6516 = vtanh.f32 %v7333_v50 }
 0x76c   :  { %v6507_v54 = vpop.eup %6506 }
 0x76d   :  { %v6509_v58 = vpop.eup %6508  ;;  %794 = vrot.lane.b32.xlu0 %v6507_v54, %s7031_s19  ;;  %v66_v54 = vld [vmem:[%s9011_s2 + $0xb8] sm:$0xff] }
 0x76e   :  { %792 = vrot.lane.b32.xlu1 %v6509_v58, %s7031_s19  ;;  %v67_v58 = vld [vmem:[%s9011_s2 + $0xc0] sm:$0xff] }
 0x770   :  { %v6511_v59 = vpop.eup %6510 }
 0x771   :  { %v6513_v61 = vpop.eup %6512  ;;  %798 = vrot.lane.b32.xlu0 %v6511_v59, %s7031_s19  ;;  %v68_v59 = vld [vmem:[%s9011_s2 + $0xc8] sm:$0xff] }
 0x772   :  { %796 = vrot.lane.b32.xlu1 %v6513_v61, %s7031_s19  ;;  %v69_v61 = vld [vmem:[%s9011_s2 + $0xd0] sm:$0xff] }
 0x774   :  { %v6515_v62 = vpop.eup %6514 }
 0x775   :  { %v6517_v1 = vpop.eup %6516  ;;  %802 = vrot.lane.b32.xlu0 %v6515_v62, %s7031_s19  ;;  %v70_v62 = vld [vmem:[%s9011_s2 + $0xd8] sm:$0xff] }
 0x776   :  { %800 = vrot.lane.b32.xlu1 %v6517_v1, %s7031_s19  ;;  %v5294_v1 = vld [vmem:[%s9009_s1 + $0xc0] ss:$0 sm:$0xff] }
 0x7db   :  { %v791_v8 = vpop.permute.xlu0 %790 }
 0x7dc   :  { %v813_v9 = vmul.f32 %v7273_v33, %v791_v8  ;;  %v789_v13 = vpop.permute.xlu1 %788 }
 0x7dd   :  { %v812_v14 = vmul.f32 %v7275_v37, %v789_v13 }
 0x7de   :  { %834 = vrot.lane.b32.xlu0 %v813_v9, %s7033_s12 }
 0x7df   :  { %v795_v16 = vpop.permute.xlu0 %794  ;;  %832 = vrot.lane.b32.xlu1 %v812_v14, %s7033_s12 }
 0x7e0   :  { %v815_v17 = vmul.f32 %v7280_v41, %v795_v16  ;;  %v793_v19 = vpop.permute.xlu1 %792 }
 0x7e1   :  { %v814_v21 = vmul.f32 %v7283_v45, %v793_v19 }
 0x7e2   :  { %838 = vrot.lane.b32.xlu0 %v815_v17, %s7033_s12 }
 0x7e3   :  { %v799_v22 = vpop.permute.xlu0 %798  ;;  %836 = vrot.lane.b32.xlu1 %v814_v21, %s7033_s12 }
 0x7e4   :  { %v817_v33 = vmul.f32 %v7288_v49, %v799_v22  ;;  %v797_v23 = vpop.permute.xlu1 %796  ;;  %v1453_v49 = vld [vmem:[%s9010_s0 + $0x8] sm:$0xff] }
 0x7e5   :  { %v816_v37 = vmul.f32 %v7291_v51, %v797_v23  ;;  %v38_v51 = vld [vmem:[%s9009_s1 + $0xb0] sm:$0xff] }
 0x7e6   :  { %842 = vrot.lane.b32.xlu0 %v817_v33, %s7033_s12 }
 0x7e7   :  { %v803_v25 = vpop.permute.xlu0 %802  ;;  %840 = vrot.lane.b32.xlu1 %v816_v37, %s7033_s12 }
 0x7e8   :  { %v819_v41 = vmul.f32 %v7296_v55, %v803_v25  ;;  %v801_v27 = vpop.permute.xlu1 %800  ;;  %v39_v55 = vld [vmem:[%s9009_s1 + $0xb8] sm:$0xff] }
 0x7e9   :  { %v818_v45 = vmul.f32 %v7299_v57, %v801_v27  ;;  %v7393_v29 = vpack.c.bf16 %v39_v55, %v38_v51 }
 0x7ea   :  { %846 = vrot.lane.b32.xlu0 %v819_v41, %s7033_s12 }
 0x7eb   :  { %844 = vrot.lane.b32.xlu1 %v818_v45, %s7033_s12 }
 0x7ef   :  { %1456 = vperm.xlu1 %6437, %v1453_v49  }
 0x850   :  { %v7389_v28 = vpop.permute.xlu0 %834 }
 0x851   :  { %v7391_v57 = vpop.permute.xlu1 %832 }
 0x852   :  { %5777 = vmatprep.mubr.msk.f32.mxu1 %vm277_vm2, %v7391_v57 }
 0x853   :  { %5778 = vmatmul.mubr.msk.f32.vlgmr.msra.gmra.mrb[2].mxu1 %vm277_vm2, %v7389_v28 }
 0x854   :  { %v7399_v32 = vpop.permute.xlu0 %838  ;;  %6178 = vmatpush3.bf16.msra.mxu1 %v7361_v7 }
 0x855   :  { %v7402_v38 = vpop.permute.xlu1 %836  ;;  %6180 = vmatprep.subr.bf16.mxu1 %v7393_v29 }
 0x856   :  { %5780 = vmatprep.mubr.msk.f32.mxu1 %vm277_vm2, %v7402_v38 }
 0x857   :  { %5781 = vmatmul.mubr.msk.f32.gmra.mrb[4].mxu1 %vm277_vm2, %v7399_v32 }
 0x858   :  { %v7409_v39 = vpop.permute.xlu0 %842  ;;  %6182 = vmatpush3.bf16.msra.mxu1 %v7393_v29 }
 0x859   :  { %v7412_v40 = vpop.permute.xlu1 %840  ;;  %6199 = vmatprep.subr.bf16.mxu1 %v9016_v0 }
 0x85a   :  { %5783 = vmatprep.mubr.msk.f32.mxu1 %vm277_vm2, %v7412_v40 }
 0x85b   :  { %5784 = vmatmul.mubr.msk.f32.gmra.mrb[6].mxu1 %vm277_vm2, %v7409_v39 }
 0x85c   :  { %v7424_v48 = vpop.permute.xlu0 %846 }
 0x85d   :  { %v7419_v42 = vpop.permute.xlu1 %844 }
 0x85e   :  { %5786 = vmatprep.mubr.msk.f32.mxu1 %vm277_vm2, %v7419_v42 }
 0x85f   :  { %5787 = vmatmul.mubr.msk.f32.gmra.mrb[8].mxu1 %vm277_vm2, %v7424_v48 }
 0x860   :  { %5797 = vmatprep.mubr.msk.f32.mxu1 %vm95_vm1, %v63_v47 }
 0x863   :  { %5798 = vmatmul.mubr.msk.f32.vlgmr.msra.gmra.mrb[2].mxu1 %vm95_vm1, %v64_v52 }
 0x864   :  { %5800 = vmatprep.mubr.msk.f32.mxu1 %vm95_vm1, %v65_v53  ;;  %6201 = vmatpush3.bf16.msra.mxu1 %v7073_v5 }
 0x865   :  { %6202 = vmatprep.subr.bf16.mxu1 %v9016_v0 }
 0x867   :  { %5801 = vmatmul.mubr.msk.f32.gmra.mrb[4].mxu1 %vm95_vm1, %v66_v54 }
 0x868   :  { %5803 = vmatprep.mubr.msk.f32.mxu1 %vm95_vm1, %v67_v58  ;;  %6204 = vmatpush3.bf16.msra.mxu1 %v7088_v10 }
 0x869   :  { %6214 = vmatprep.subr.bf16.mxu1 %v9016_v0 }
 0x86b   :  { %5804 = vmatmul.mubr.msk.f32.gmra.mrb[6].mxu1 %vm95_vm1, %v68_v59 }
 0x86c   :  { %5806 = vmatprep.mubr.msk.f32.mxu1 %vm95_vm1, %v69_v61 }
 0x86e   :  { %v1457_v22 = vpop.permute.xlu1 %1456 }
 0x86f   :  { %5807 = vmatmul.mubr.msk.f32.gmra.mrb[8].mxu1 %vm95_vm1, %v70_v62  ;;  %v1459_v37 = vmul.f32 %v7103_v12, %v1457_v22 }
 0x870   :  { %5836 = vmatprep.mubr.msk.f32.mxu1 %vm7026_vm0, %v9014_v4 }
 0x871   :  { %v1460_v51 = vadd.f32 %v7109_v15, %v1459_v37  ;;  %v71_v15 = vld [vmem:[%s9011_s2 + $0xe0] sm:$0xff] }
 0x873   :  { %5837 = vmatmul.mubr.msk.f32.vlgmr.msra.gmra.mrb[10].mxu1 %vm95_vm1, %v7151_v44 }
 0x874   :  { %6216 = vmatpush3.bf16.msra.mxu1 %v7176_v63  ;;  %5861 = vmatprep.mubr.msk.f32.mxu1 %vm7026_vm0, %v9014_v4 }
 0x875   :  { %6218 = vmatprep.subr.bf16.mxu1 %v7186_v6 }
 0x936   :  { %v5799_v2 = vpop.f32.mrb[2].mxu1 }
 0x937   :  { %v6350_v3 = vadd.f32 %v5799_v2, %v5294_v1  ;;  %v1059_v8 = vpop.f32.mrb[3].mxu1 }
 0x938   :  { %v6351_v9 = vadd.f32 %v5294_v1, %v1059_v8 }
 0x939   :  { %6518 = vtanh.f32 %v6350_v3  ;;  %v5312_v2 = vmul.f32 -1.442695, %v6350_v3 }
 0x93a   :  { %6520 = vtanh.f32 %v6351_v9  ;;  %v5802_v13 = vpop.f32.mrb[4].mxu1  ;;  %v5311_v8 = vmul.f32 -1.442695, %v6351_v9 }
 0x93b   :  { %v6352_v14 = vadd.f32 %v5802_v13, %v5294_v1  ;;  %v1069_v44 = vpop.f32.mrb[5].mxu1 }
 0x93c   :  { %v6353_v16 = vadd.f32 %v5294_v1, %v1069_v44 }
 0x93d   :  { %6522 = vtanh.f32 %v6352_v14  ;;  %v5314_v13 = vmul.f32 -1.442695, %v6352_v14 }
 0x93e   :  { %6524 = vtanh.f32 %v6353_v16  ;;  %v5805_v17 = vpop.f32.mrb[6].mxu1  ;;  %v5313_v44 = vmul.f32 -1.442695, %v6353_v16 }
 0x93f   :  { %v6354_v19 = vadd.f32 %v5805_v17, %v5294_v1  ;;  %v1079_v21 = vpop.f32.mrb[7].mxu1 }
 0x940   :  { %v6355_v33 = vadd.f32 %v5294_v1, %v1079_v21 }
 0x941   :  { %6526 = vtanh.f32 %v6354_v19  ;;  %v5316_v22 = vmul.f32 -1.442695, %v6354_v19 }
 0x942   :  { %6528 = vtanh.f32 %v6355_v33  ;;  %v5808_v23 = vpop.f32.mrb[8].mxu1 }
 0x943   :  { %v6519_v25 = vpop.eup %6518  ;;  %v6356_v41 = vadd.f32 %v5808_v23, %v5294_v1  ;;  %v1089_v27 = vpop.f32.mrb[9].mxu1  ;;  %v5315_v23 = vmul.f32 -1.442695, %v6355_v33 }
 0x944   :  { %v6521_v45 = vpop.eup %6520  ;;  %v6357_v49 = vadd.f32 %v5294_v1, %v1089_v27  ;;  %1212 = vrot.lane.b32.xlu1 %v6519_v25, %s7029_s27  ;;  %v72_v1 = vld [vmem:[%s9011_s2 + $0xe8] sm:$0xff] }
 0x945   :  { %6530 = vtanh.f32 %v6356_v41  ;;  %1210 = vrot.lane.b32.xlu0 %v6521_v45, %s7029_s27  ;;  %v5318_v3 = vmul.f32 -1.442695, %v6356_v41 }
 0x946   :  { %6532 = vtanh.f32 %v6357_v49  ;;  %v1527_v55 = vpop.f32.mrb[10].mxu1  ;;  %v5317_v9 = vmul.f32 -1.442695, %v6357_v49 }
 0x947   :  { %v6523_v47 = vpop.eup %6522  ;;  %v5838_v52 = vpop.f32.mrb[11].mxu1  ;;  %v1531_v12 = vadd.f32 %v1527_v55, %v1460_v51 }
 0x948   :  { %v6525_v53 = vpop.eup %6524  ;;  %1216 = vrot.lane.b32.xlu1 %v6523_v47, %s7029_s27 }
 0x949   :  { %1214 = vrot.lane.b32.xlu0 %v6525_v53, %s7029_s27  ;;  %6534 = vtanh.f32 %v1531_v12  ;;  %v5329_v16 = vmul.f32 -1.442695, %v1531_v12  ;;  %v74_v12 = vld [vmem:[%s9011_s2 + $0xf8] sm:$0xff] }
 0x94a   :  { %6536 = vpow2.f32 %v5312_v2 }
 0x94b   :  { %v6527_v54 = vpop.eup %6526  ;;  %6538 = vpow2.f32 %v5311_v8 }
 0x94c   :  { %v6529_v58 = vpop.eup %6528  ;;  %1220 = vrot.lane.b32.xlu1 %v6527_v54, %s7029_s27  ;;  %6540 = vpow2.f32 %v5314_v13 }
 0x94d   :  { %1218 = vrot.lane.b32.xlu0 %v6529_v58, %s7029_s27  ;;  %6542 = vpow2.f32 %v5313_v44 }
 0x94e   :  { %6544 = vpow2.f32 %v5316_v22 }
 0x94f   :  { %v6531_v59 = vpop.eup %6530  ;;  %6546 = vpow2.f32 %v5315_v23  ;;  %v76_v23 = vld [vmem:[%s9011_s2 + $0x108] sm:$0xff] }
 0x950   :  { %v6533_v61 = vpop.eup %6532  ;;  %1224 = vrot.lane.b32.xlu1 %v6531_v59, %s7029_s27  ;;  %v73_v59 = vld [vmem:[%s9011_s2 + $0xf0] sm:$0xff] }
 0x951   :  { %1222 = vrot.lane.b32.xlu0 %v6533_v61, %s7029_s27 }
 0x953   :  { %v6535_v62 = vpop.eup %6534 }
 0x954   :  { %1170 = vrot.lane.b32.xlu1 %v71_v15, %s7029_s27  ;;  %v6537_v17 = vpop.eup %6536 }
 0x955   :  { %1541 = vrot.lane.b32.xlu0 %v6535_v62, %s7029_s27  ;;  %v6539_v21 = vpop.eup %6538  ;;  %v1131_v37 = vadd.f32 1.0, %v6537_v17 }
 0x956   :  { %v1130_v25 = vadd.f32 1.0, %v6539_v21  ;;  %v6541_v27 = vpop.eup %6540 }
 0x957   :  { %6548 = vrcp.f32 %v1131_v37  ;;  %v6543_v45 = vpop.eup %6542  ;;  %v1133_v51 = vadd.f32 1.0, %v6541_v27  ;;  %v75_v37 = vld [vmem:[%s9011_s2 + $0x100] sm:$0xff] }
 0x958   :  { %6550 = vrcp.f32 %v1130_v25  ;;  %v1132_v55 = vadd.f32 1.0, %v6543_v45  ;;  %v6545_v14 = vpop.eup %6544 }
 0x959   :  { %1172 = vrot.lane.b32.xlu0 %v72_v1, %s7029_s27  ;;  %6552 = vpow2.f32 %v5318_v3  ;;  %v6547_v47 = vpop.eup %6546  ;;  %v1135_v58 = vadd.f32 1.0, %v6545_v14  ;;  %v78_v14 = vld [vmem:[%s9011_s2 + $0x118] sm:$0xff] }
 0x95a   :  { %6554 = vpow2.f32 %v5317_v9  ;;  %v1134_v49 = vadd.f32 1.0, %v6547_v47  ;;  %v77_v47 = vld [vmem:[%s9011_s2 + $0x110] sm:$0xff] }
 0x95b   :  { %6556 = vrcp.f32 %v1133_v51 }
 0x95c   :  { %6558 = vrcp.f32 %v1132_v55 }
 0x95d   :  { %6560 = vpow2.f32 %v5329_v16 }
 0x95e   :  { %6562 = vrcp.f32 %v1135_v58 }
 0x95f   :  { %6564 = vrcp.f32 %v1134_v49 }
 0x961   :  { %v7493_v19 = vpop.eup %6548 }
 0x962   :  { %v7495_v52 = vpop.eup %6550 }
 0x963   :  { %v6553_v61 = vpop.eup %6552 }
 0x964   :  { %v6555_v62 = vpop.eup %6554  ;;  %v1137_v44 = vadd.f32 1.0, %v6553_v61 }
 0x965   :  { %v7508_v2 = vpop.eup %6556  ;;  %v1136_v21 = vadd.f32 1.0, %v6555_v62 }
 0x966   :  { %v7511_v8 = vpop.eup %6558  ;;  %6566 = vrcp.f32 %v1137_v44 }
 0x967   :  { %v6561_v22 = vpop.eup %6560  ;;  %6568 = vrcp.f32 %v1136_v21 }
 0x968   :  { %v1535_v27 = vadd.f32 1.0, %v6561_v22  ;;  %v7524_v3 = vpop.eup %6562 }
 0x969   :  { %v7527_v9 = vpop.eup %6564 }
 0x96a   :  { %6570 = vrcp.f32 %v1535_v27 }
 0x9b6   :  { %v1213_v33 = vpop.permute.xlu1 %1212 }
 0x9b7   :  { %v1235_v53 = vmul.f32 %v7493_v19, %v1213_v33  ;;  %v1211_v54 = vpop.permute.xlu0 %1210 }
 0x9b8   :  { %v1234_v41 = vmul.f32 %v7495_v52, %v1211_v54 }
 0x9b9   :  { %1252 = vrot.lane.b32.xlu0 %v1235_v53, %s7029_s27  ;;  %v7540_v53 = vpop.eup %6566 }
 0x9ba   :  { %1250 = vrot.lane.b32.xlu1 %v1234_v41, %s7029_s27  ;;  %v1217_v15 = vpop.permute.xlu1 %1216  ;;  %v7543_v54 = vpop.eup %6568 }
 0x9bb   :  { %v1215_v1 = vpop.permute.xlu0 %1214  ;;  %v1237_v13 = vmul.f32 %v7508_v2, %v1217_v15 }
 0x9bc   :  { %v1236_v17 = vmul.f32 %v7511_v8, %v1215_v1 }
 0x9bd   :  { %1176 = vrot.lane.b32.xlu0 %v74_v12, %s7029_s27  ;;  %v7549_v12 = vpop.eup %6570 }
 0x9be   :  { %1174 = vrot.lane.b32.xlu1 %v73_v59, %s7029_s27  ;;  %v1221_v25 = vpop.permute.xlu1 %1220 }
 0x9bf   :  { %v1219_v45 = vpop.permute.xlu0 %1218  ;;  %v1239_v51 = vmul.f32 %v7524_v3, %v1221_v25 }
 0x9c0   :  { %v1238_v55 = vmul.f32 %v7527_v9, %v1219_v45 }
 0x9c1   :  { %1256 = vrot.lane.b32.xlu0 %v1237_v13, %s7029_s27 }
 0x9c2   :  { %1254 = vrot.lane.b32.xlu1 %v1236_v17, %s7029_s27  ;;  %v1225_v33 = vpop.permute.xlu1 %1224 }
 0x9c3   :  { %v1223_v16 = vpop.permute.xlu0 %1222  ;;  %v1241_v58 = vmul.f32 %v7540_v53, %v1225_v33 }
 0x9c4   :  { %v1240_v41 = vmul.f32 %v7543_v54, %v1223_v16 }
 0x9c5   :  { %1180 = vrot.lane.b32.xlu0 %v76_v23, %s7029_s27 }
 0x9c6   :  { %1178 = vrot.lane.b32.xlu1 %v75_v37, %s7029_s27  ;;  %v1171_v15 = vpop.permute.xlu1 %1170 }
 0x9c7   :  { %v1542_v49 = vpop.permute.xlu0 %1541  ;;  %v1194_v1 = vmul.f32 %v7495_v52, %v1171_v15 }
 0x9c8   :  { %v1544_v59 = vmul.f32 %v7549_v12, %v1542_v49 }
 0x9c9   :  { %1260 = vrot.lane.b32.xlu0 %v1239_v51, %s7029_s27 }
 0x9ca   :  { %1258 = vrot.lane.b32.xlu1 %v1238_v55, %s7029_s27 }
 0x9cb   :  { %v1173_v61 = vpop.permute.xlu0 %1172 }
 0x9cc   :  { %v1195_v62 = vmul.f32 %v7493_v19, %v1173_v61 }
 0x9cd   :  { %1184 = vrot.lane.b32.xlu0 %v78_v14, %s7029_s27 }
 0x9ce   :  { %1182 = vrot.lane.b32.xlu1 %v77_v47, %s7029_s27 }
 0x9d1   :  { %1264 = vrot.lane.b32.xlu0 %v1241_v58, %s7029_s27 }
 0x9d2   :  { %1262 = vrot.lane.b32.xlu1 %v1240_v41, %s7029_s27 }
 0x9d6   :  { %1546 = vrot.lane.b32.xlu1 %v1544_v59, %s7029_s27 }
 0xa2b   :  { %v1253_v13 = vpop.permute.xlu0 %1252 }
 0xa2c   :  { %v7555_v44 = vadd.f32 %v1253_v13, %v1195_v62  ;;  %v1251_v17 = vpop.permute.xlu1 %1250 }
 0xa2d   :  { %v7557_v21 = vadd.f32 %v1251_v17, %v1194_v1 }
 0xa2e   :  { %6572 = vtanh.f32 %v7555_v44 }
 0xa2f   :  { %6574 = vtanh.f32 %v7557_v21  ;;  %v1177_v22 = vpop.permute.xlu0 %1176 }
 0xa30   :  { %v1175_v23 = vpop.permute.xlu1 %1174  ;;  %v1197_v37 = vmul.f32 %v7508_v2, %v1177_v22 }
 0xa31   :  { %v1196_v25 = vmul.f32 %v7511_v8, %v1175_v23 }
 0xa33   :  { %v1257_v27 = vpop.permute.xlu0 %1256 }
 0xa34   :  { %v7563_v45 = vadd.f32 %v1257_v27, %v1197_v37  ;;  %v1255_v51 = vpop.permute.xlu1 %1254 }
 0xa35   :  { %v7565_v55 = vadd.f32 %v1255_v51, %v1196_v25 }
 0xa36   :  { %6576 = vtanh.f32 %v7563_v45 }
 0xa37   :  { %6578 = vtanh.f32 %v7565_v55  ;;  %v1181_v14 = vpop.permute.xlu0 %1180 }
 0xa38   :  { %v6573_v16 = vpop.eup %6572  ;;  %v1179_v47 = vpop.permute.xlu1 %1178  ;;  %v1199_v58 = vmul.f32 %v7524_v3, %v1181_v14  ;;  %v1539_v14 = vmul.f32 %v7549_v12, %v7114_v30 }
 0xa39   :  { %v6575_v33 = vpop.eup %6574  ;;  %1300 = vrot.lane.b32.xlu1 %v6573_v16, %s7029_s27  ;;  %v1198_v41 = vmul.f32 %v7527_v9, %v1179_v47 }
 0xa3a   :  { %1298 = vrot.lane.b32.xlu0 %v6575_v33, %s7029_s27 }
 0xa3b   :  { %v1261_v49 = vpop.permute.xlu0 %1260 }
 0xa3c   :  { %v7573_v59 = vadd.f32 %v1261_v49, %v1199_v58  ;;  %v1259_v61 = vpop.permute.xlu1 %1258 }
 0xa3d   :  { %v7575_v15 = vadd.f32 %v1259_v61, %v1198_v41 }
 0xa3e   :  { %6580 = vtanh.f32 %v7573_v59 }
 0xa3f   :  { %6582 = vtanh.f32 %v7575_v15  ;;  %v1185_v62 = vpop.permute.xlu0 %1184 }
 0xa40   :  { %v6577_v1 = vpop.eup %6576  ;;  %v1183_v13 = vpop.permute.xlu1 %1182  ;;  %v1201_v22 = vmul.f32 %v7540_v53, %v1185_v62 }
 0xa41   :  { %v6579_v17 = vpop.eup %6578  ;;  %1304 = vrot.lane.b32.xlu1 %v6577_v1, %s7029_s27  ;;  %v1200_v23 = vmul.f32 %v7543_v54, %v1183_v13 }
 0xa42   :  { %1302 = vrot.lane.b32.xlu0 %v6579_v17, %s7029_s27 }
 0xa43   :  { %v1265_v37 = vpop.permute.xlu0 %1264 }
 0xa44   :  { %v7583_v25 = vadd.f32 %v1265_v37, %v1201_v22  ;;  %v1263_v27 = vpop.permute.xlu1 %1262 }
 0xa45   :  { %v7585_v51 = vadd.f32 %v1263_v27, %v1200_v23 }
 0xa46   :  { %6584 = vtanh.f32 %v7583_v25 }
 0xa47   :  { %6586 = vtanh.f32 %v7585_v51 }
 0xa48   :  { %v6581_v16 = vpop.eup %6580  ;;  %v1547_v47 = vpop.permute.xlu1 %1546 }
 0xa49   :  { %v6583_v33 = vpop.eup %6582  ;;  %v7591_v58 = vadd.f32 %v1547_v47, %v1539_v14  ;;  %1308 = vrot.lane.b32.xlu1 %v6581_v16, %s7029_s27 }
 0xa4a   :  { %1306 = vrot.lane.b32.xlu0 %v6583_v33, %s7029_s27 }
 0xa4b   :  { %6588 = vtanh.f32 %v7591_v58 }
 0xa50   :  { %v6585_v41 = vpop.eup %6584 }
 0xa51   :  { %v6587_v49 = vpop.eup %6586  ;;  %1312 = vrot.lane.b32.xlu1 %v6585_v41, %s7029_s27 }
 0xa52   :  { %1310 = vrot.lane.b32.xlu0 %v6587_v49, %s7029_s27 }
 0xa55   :  { %v6589_v61 = vpop.eup %6588 }
 0xa56   :  { %1552 = vrot.lane.b32.xlu0 %v6589_v61, %s7029_s27 }
 0xaab   :  { %v1301_v30 = vpop.permute.xlu1 %1300 }
 0xaac   :  { %v1323_v62 = vmul.f32 %v7493_v19, %v1301_v30  ;;  %v1299_v1 = vpop.permute.xlu0 %1298 }
 0xaad   :  { %v1322_v13 = vmul.f32 %v7495_v52, %v1299_v1 }
 0xaae   :  { %1345 = vrot.lane.b32.xlu0 %v1323_v62, %s7030_s16 }
 0xaaf   :  { %1343 = vrot.lane.b32.xlu1 %v1322_v13, %s7030_s16 }
 0xab3   :  { %v1305_v17 = vpop.permute.xlu1 %1304 }
 0xab4   :  { %v1325_v22 = vmul.f32 %v7508_v2, %v1305_v17  ;;  %v1303_v23 = vpop.permute.xlu0 %1302 }
 0xab5   :  { %v1324_v37 = vmul.f32 %v7511_v8, %v1303_v23  ;;  %v7662_v23 = vld [vmem:[%s9009_s1 + $0xc8] sm:$0x1] }
 0xab6   :  { %1349 = vrot.lane.b32.xlu0 %v1325_v22, %s7030_s16 }
 0xab7   :  { %1347 = vrot.lane.b32.xlu1 %v1324_v37, %s7030_s16 }
 0xabb   :  { %v1309_v27 = vpop.permute.xlu1 %1308 }
 0xabc   :  { %v1327_v19 = vmul.f32 %v7524_v3, %v1309_v27  ;;  %v1307_v14 = vpop.permute.xlu0 %1306 }
 0xabd   :  { %v1326_v52 = vmul.f32 %v7527_v9, %v1307_v14 }
 0xabe   :  { %1353 = vrot.lane.b32.xlu0 %v1327_v19, %s7030_s16 }
 0xabf   :  { %1351 = vrot.lane.b32.xlu1 %v1326_v52, %s7030_s16  ;;  %v7689_v52 = vld [vmem:[%s9009_s1 + $0x60] ss:$0 sm:$0xff] }
 0xac3   :  { %v1313_v16 = vpop.permute.xlu1 %1312 }
 0xac4   :  { %v1329_v2 = vmul.f32 %v7540_v53, %v1313_v16  ;;  %v1311_v47 = vpop.permute.xlu0 %1310 }
 0xac5   :  { %v1328_v8 = vmul.f32 %v7543_v54, %v1311_v47 }
 0xac6   :  { %1357 = vrot.lane.b32.xlu0 %v1329_v2, %s7030_s16 }
 0xac7   :  { %1355 = vrot.lane.b32.xlu1 %v1328_v8, %s7030_s16 }
 0xac8   :  { %v1553_v33 = vpop.permute.xlu0 %1552 }
 0xac9   :  { %v1555_v3 = vmul.f32 %v7549_v12, %v1553_v33 }
 0xacb   :  { %1557 = vrot.lane.b32.xlu1 %v1555_v3, %s7030_s16 }
 0xb20   :  { %v7617_v9 = vpop.permute.xlu0 %1345 }
 0xb21   :  { %v7619_v41 = vpop.permute.xlu1 %1343 }
 0xb22   :  { %v6184_v54 = vpack.c.bf16 %v7617_v9, %v7619_v41 }
 0xb24   :  { %6186 = vmatpush3.bf16.xpose.msk.msra.mxu0 %vm7623_vm3, %v6184_v54 }
 0xb25   :  { %6187 = vmatprep.subr.bf16.mxu0 %v9016_v0 }
 0xb28   :  { %v7632_v12 = vpop.permute.xlu0 %1349 }
 0xb29   :  { %v7634_v49 = vpop.permute.xlu1 %1347 }
 0xb2a   :  { %v6188_v61 = vpack.c.bf16 %v7632_v12, %v7634_v49 }
 0xb2c   :  { %6190 = vmatpush3.bf16.xpose.msk.msra.mxu0 %vm7623_vm3, %v6188_v61 }
 0xb2d   :  { %6191 = vmatprep.subr.bf16.mxu0 %v9016_v0 }
 0xb30   :  { %v7641_v30 = vpop.permute.xlu0 %1353 }
 0xb31   :  { %v7643_v62 = vpop.permute.xlu1 %1351 }
 0xb32   :  { %v6192_v1 = vpack.c.bf16 %v7641_v30, %v7643_v62 }
 0xb34   :  { %6194 = vmatpush3.bf16.xpose.msk.msra.mxu0 %vm7623_vm3, %v6192_v1 }
 0xb35   :  { %6195 = vmatprep.subr.bf16.mxu0 %v9016_v0 }
 0xb38   :  { %v7650_v13 = vpop.permute.xlu0 %1357 }
 0xb39   :  { %v7652_v17 = vpop.permute.xlu1 %1355 }
 0xb3a   :  { %v6196_v22 = vpack.c.bf16 %v7650_v13, %v7652_v17 }
 0xb3c   :  { %6198 = vmatpush3.bf16.xpose.msk.msra.mxu0 %vm7623_vm3, %v6196_v22 }
 0xb3d   :  { %6205 = vmatprep.subr.bf16.mxu0 %v9016_v0  ;;  %v7672_v37 = vpop.permute.xlu1 %1557 }
 0xb43   :  { %5826 = vmatmul.mubr.msk.f32.vlgmr.msra.gmra.mrb[12].mxu0 %vm95_vm1, %v7662_v23 }
 0xb44   :  { %6207 = vmatpush3.bf16.msra.mxu0 %v7126_v34  ;;  %5847 = vmatprep.mubr.msk.f32.mxu0 %vm7026_vm0, %v9014_v4 }
 0xb45   :  { %6208 = vmatprep.subr.bf16.mxu0 %v9016_v0 }
 0xb48   :  { %6210 = vmatpush3.bf16.msra.mxu0 %v7132_v36 }
 0xb49   :  { %6211 = vmatprep.subr.bf16.mxu0 %v9016_v0 }
 0xb4b   :  { %5848 = vmatmul.mubr.msk.f32.vlgmr.msra.gmra.mrb[14].mxu0 %vm95_vm1, %v7672_v37 }
 0xb4c   :  { %6213 = vmatpush3.bf16.msra.mxu0 %v7149_v43  ;;  %5854 = vmatprep.mubr.msk.f32.mxu0 %vm7026_vm0, %v9014_v4 }
 0xb4d   :  { %6222 = vmatprep.subr.bf16.mxu0 %v7345_v56 }
 0xb53   :  { %5855 = vmatmul.mubr.msk.f32.vlgmr.msra.gmra.mrb[14].mxu0 %vm277_vm2, %v7193_v11 }
 0xb54   :  { %6224 = vmatpush3.bf16.msra.mxu0 %v7345_v56 }
 0xb55   :  { %6226 = vmatprep.subr.bf16.mxu0 %v7361_v7 }
 0xc16   :  { %v7684_v27 = vpop.f32.mrb[12].mxu0 }
 0xc17   :  { %9022 = vst [vmem:[#allocation2_spill] sm:$0xff] %v7684_v27  ;;  %v5827_v19 = vpop.f32.mrb[13].mxu0 }
 0xc26   :  { %v1697_v14 = vpop.f32.mrb[14].mxu0 }
 0xc27   :  { %v6358_v16 = vadd.f32 %v7689_v52, %v1697_v14  ;;  %v5856_v2 = vpop.f32.mrb[15].mxu0 }
 0xc29   :  { %6590 = vtanh.f32 %v6358_v16  ;;  %v5332_v11 = vmul.f32 -1.442695, %v6358_v16 }
 0xc2b   :  { %6592 = vpow2.f32 %v5332_v11 }
 0xc33   :  { %v6591_v47 = vpop.eup %6590 }
 0xc34   :  { %1711 = vrot.lane.b32.xlu0 %v6591_v47, %s7032_s29 }
 0xc35   :  { %v6593_v8 = vpop.eup %6592 }
 0xc36   :  { %v1705_v33 = vadd.f32 1.0, %v6593_v8 }
 0xc38   :  { %6594 = vrcp.f32 %v1705_v33 }
 0xc42   :  { %v6595_v3 = vpop.eup %6594 }
 0xc43   :  { %v1709_v1 = vmul.f32 %v6595_v3, %v7167_v60 }
 0xca6   :  { %v1712_v54 = vpop.permute.xlu0 %1711 }
 0xca7   :  { %v1714_v61 = vmul.f32 %v6595_v3, %v1712_v54 }
 0xca9   :  { %1716 = vrot.lane.b32.xlu1 %v1714_v61, %s7031_s19 }
 0xd1b   :  { %v1717_v22 = vpop.permute.xlu1 %1716 }
 0xd1c   :  { %v7695_v19 = vadd.f32 %v1717_v22, %v1709_v1 }
 0xd1e   :  { %6596 = vtanh.f32 %v7695_v19 }
 0xd28   :  { %v6597_v14 = vpop.eup %6596 }
 0xd29   :  { %1722 = vrot.lane.b32.xlu0 %v6597_v14, %s7031_s19 }
 0xd9b   :  { %v1723_v16 = vpop.permute.xlu0 %1722 }
 0xd9c   :  { %v1725_v2 = vmul.f32 %v6595_v3, %v1723_v16 }
 0xd9e   :  { %1727 = vrot.lane.b32.xlu1 %v1725_v2, %s7033_s12 }
 0xe10   :  { %v7700_v47 = vpop.permute.xlu1 %1727 }
 0xe11   :  { %5862 = vmatmul.mubr.msk.f32.vlgmr.msra.gmra.mrb[12].mxu1 %vm277_vm2, %v7700_v47 }
 0xe12   :  { %6220 = vmatpush3.bf16.msra.mxu1 %v7186_v6  ;;  %5868 = vmatprep.mubr.msk.f32.mxu1 %vm277_vm2, %v7391_v57  ;;  %v7727_v57 = vld [vmem:[%s9009_s1 + $0x88] ss:$0 sm:$0xff] }
 0xe13   :  { %6233 = vmatprep.subr.bf16.mxu1 %v9016_v0 }
 0xe15   :  { %5869 = vmatmul.mubr.msk.f32.vlgmr.msra.gmra.mrb[14].mxu1 %vm277_vm2, %v7389_v28 }
 0xe16   :  { %5871 = vmatprep.mubr.msk.f32.mxu1 %vm277_vm2, %v7402_v38 }
 0xe19   :  { %5872 = vmatmul.mubr.msk.f32.gmra.mrb[16].mxu1 %vm277_vm2, %v7399_v32 }
 0xe1a   :  { %5874 = vmatprep.mubr.msk.f32.mxu1 %vm277_vm2, %v7412_v40 }
 0xe1d   :  { %5875 = vmatmul.mubr.msk.f32.gmra.mrb[18].mxu1 %vm277_vm2, %v7409_v39 }
 0xe1e   :  { %5877 = vmatprep.mubr.msk.f32.mxu1 %vm277_vm2, %v7419_v42 }
 0xe21   :  { %5878 = vmatmul.mubr.msk.f32.gmra.mrb[20].mxu1 %vm277_vm2, %v7424_v48 }
 0xe22   :  { %5932 = vmatprep.mubr.msk.f32.mxu1 %vm7026_vm0, %v9014_v4 }
 0xee4   :  { %v1797_v60 = vpop.f32.mrb[12].mxu1 }
 0xee5   :  { %v5863_v28 = vpop.f32.mrb[13].mxu1  ;;  %v1798_v32 = vadd.f32 %v7727_v57, %v1797_v60 }
 0xee8   :  { %v5870_v38 = vpop.f32.mrb[14].mxu1 }
 0xee9   :  { %v1907_v39 = vadd.f32 %v5870_v38, %v1798_v32  ;;  %v1867_v40 = vpop.f32.mrb[15].mxu1 }
 0xeea   :  { %v1906_v11 = vadd.f32 %v1867_v40, %v1798_v32 }
 0xeeb   :  { %6598 = vtanh.f32 %v1907_v39 }
 0xeec   :  { %6600 = vtanh.f32 %v1906_v11  ;;  %v5873_v42 = vpop.f32.mrb[16].mxu1 }
 0xeed   :  { %v1909_v48 = vadd.f32 %v5873_v42, %v1798_v32  ;;  %v1877_v8 = vpop.f32.mrb[17].mxu1 }
 0xeee   :  { %v1908_v33 = vadd.f32 %v1877_v8, %v1798_v32 }
 0xeef   :  { %6602 = vtanh.f32 %v1909_v48 }
 0xef0   :  { %6604 = vtanh.f32 %v1908_v33  ;;  %v5876_v3 = vpop.f32.mrb[18].mxu1 }
 0xef1   :  { %v1911_v54 = vadd.f32 %v5876_v3, %v1798_v32  ;;  %v1887_v61 = vpop.f32.mrb[19].mxu1 }
 0xef2   :  { %v1910_v1 = vadd.f32 %v1887_v61, %v1798_v32  ;;  %v5343_v61 = vmul.f32 -1.442695, %v1907_v39 }
 0xef3   :  { %6606 = vtanh.f32 %v1911_v54 }
 0xef4   :  { %6608 = vtanh.f32 %v1910_v1  ;;  %v5879_v22 = vpop.f32.mrb[20].mxu1 }
 0xef5   :  { %v6599_v14 = vpop.eup %6598  ;;  %v1913_v16 = vadd.f32 %v5879_v22, %v1798_v32  ;;  %v1897_v2 = vpop.f32.mrb[21].mxu1  ;;  %v5342_v22 = vmul.f32 -1.442695, %v1906_v11 }
 0xef6   :  { %v6601_v60 = vpop.eup %6600  ;;  %v1912_v28 = vadd.f32 %v1897_v2, %v1798_v32  ;;  %1988 = vrot.lane.b32.xlu1 %v6599_v14, %s7032_s29  ;;  %v5345_v14 = vmul.f32 -1.442695, %v1909_v48  ;;  %v5344_v2 = vmul.f32 -1.442695, %v1908_v33 }
 0xef7   :  { %6610 = vtanh.f32 %v1913_v16  ;;  %1986 = vrot.lane.b32.xlu0 %v6601_v60, %s7032_s29  ;;  %v5347_v60 = vmul.f32 -1.442695, %v1911_v54 }
 0xef8   :  { %6612 = vtanh.f32 %v1912_v28 }
 0xef9   :  { %v6603_v38 = vpop.eup %6602  ;;  %6614 = vpow2.f32 %v5343_v61 }
 0xefa   :  { %v6605_v40 = vpop.eup %6604  ;;  %1992 = vrot.lane.b32.xlu1 %v6603_v38, %s7032_s29  ;;  %6616 = vpow2.f32 %v5342_v22  ;;  %v5346_v38 = vmul.f32 -1.442695, %v1910_v1 }
 0xefb   :  { %1990 = vrot.lane.b32.xlu0 %v6605_v40, %s7032_s29  ;;  %6618 = vpow2.f32 %v5345_v14  ;;  %v5349_v40 = vmul.f32 -1.442695, %v1913_v16 }
 0xefc   :  { %6620 = vpow2.f32 %v5344_v2 }
 0xefd   :  { %v6607_v42 = vpop.eup %6606  ;;  %6622 = vpow2.f32 %v5347_v60 }
 0xefe   :  { %v6609_v8 = vpop.eup %6608  ;;  %1996 = vrot.lane.b32.xlu1 %v6607_v42, %s7032_s29  ;;  %6624 = vpow2.f32 %v5346_v38  ;;  %v5348_v42 = vmul.f32 -1.442695, %v1912_v28 }
 0xeff   :  { %1994 = vrot.lane.b32.xlu0 %v6609_v8, %s7032_s29  ;;  %6626 = vpow2.f32 %v5349_v40 }
 0xf00   :  { %6628 = vpow2.f32 %v5348_v42 }
 0xf01   :  { %v6611_v3 = vpop.eup %6610 }
 0xf02   :  { %v6613_v32 = vpop.eup %6612  ;;  %2000 = vrot.lane.b32.xlu1 %v6611_v3, %s7032_s29 }
 0xf03   :  { %1998 = vrot.lane.b32.xlu0 %v6613_v32, %s7032_s29  ;;  %v6615_v8 = vpop.eup %6614 }
 0xf04   :  { %v6617_v4 = vpop.eup %6616  ;;  %v1939_v3 = vadd.f32 1.0, %v6615_v8 }
 0xf05   :  { %v6619_v32 = vpop.eup %6618  ;;  %v1938_v39 = vadd.f32 1.0, %v6617_v4 }
 0xf06   :  { %v6621_v11 = vpop.eup %6620  ;;  %6630 = vrcp.f32 %v1939_v3  ;;  %v1941_v48 = vadd.f32 1.0, %v6619_v32 }
 0xf07   :  { %v6623_v61 = vpop.eup %6622  ;;  %6632 = vrcp.f32 %v1938_v39  ;;  %v1940_v33 = vadd.f32 1.0, %v6621_v11 }
 0xf08   :  { %v6625_v54 = vpop.eup %6624  ;;  %6634 = vrcp.f32 %v1941_v48  ;;  %v1943_v1 = vadd.f32 1.0, %v6623_v61 }
 0xf09   :  { %v6627_v22 = vpop.eup %6626  ;;  %6636 = vrcp.f32 %v1940_v33  ;;  %v1942_v16 = vadd.f32 1.0, %v6625_v54 }
 0xf0a   :  { %v6629_v28 = vpop.eup %6628  ;;  %6638 = vrcp.f32 %v1943_v1  ;;  %v1945_v14 = vadd.f32 1.0, %v6627_v22 }
 0xf0b   :  { %6640 = vrcp.f32 %v1942_v16  ;;  %v1944_v2 = vadd.f32 1.0, %v6629_v28 }
 0xf0c   :  { %6642 = vrcp.f32 %v1945_v14 }
 0xf0d   :  { %6644 = vrcp.f32 %v1944_v2 }
 0xf10   :  { %v7738_v60 = vpop.eup %6630 }
 0xf11   :  { %v7740_v38 = vpop.eup %6632 }
 0xf12   :  { %v7745_v3 = vpop.eup %6634 }
 0xf13   :  { %v7748_v39 = vpop.eup %6636 }
 0xf14   :  { %v7753_v33 = vpop.eup %6638 }
 0xf15   :  { %v7756_v1 = vpop.eup %6640 }
 0xf16   :  { %v7761_v14 = vpop.eup %6642 }
 0xf68   :  { %v1989_v4 = vpop.permute.xlu1 %1988 }
 0xf69   :  { %v2011_v40 = vmul.f32 %v7738_v60, %v1989_v4  ;;  %v1987_v42 = vpop.permute.xlu0 %1986  ;;  %v7764_v4 = vpop.eup %6644 }
 0xf6a   :  { %v2010_v8 = vmul.f32 %v7740_v38, %v1987_v42 }
 0xf6b   :  { %2028 = vrot.lane.b32.xlu1 %v2011_v40, %s7031_s19 }
 0xf6c   :  { %v1993_v32 = vpop.permute.xlu1 %1992  ;;  %2026 = vrot.lane.b32.xlu0 %v2010_v8, %s7031_s19 }
 0xf6d   :  { %v2013_v11 = vmul.f32 %v7745_v3, %v1993_v32  ;;  %v1991_v48 = vpop.permute.xlu0 %1990  ;;  %v1971_v32 = vmul.f32 %v7738_v60, %v7307_v18  ;;  %v1972_v18 = vmul.f32 %v7748_v39, %v7317_v26 }
 0xf6e   :  { %v2012_v61 = vmul.f32 %v7748_v39, %v1991_v48  ;;  %v1970_v48 = vmul.f32 %v7740_v38, %v7309_v20 }
 0xf6f   :  { %2032 = vrot.lane.b32.xlu1 %v2013_v11, %s7031_s19 }
 0xf70   :  { %v1997_v54 = vpop.permute.xlu1 %1996  ;;  %2030 = vrot.lane.b32.xlu0 %v2012_v61, %s7031_s19 }
 0xf71   :  { %v2015_v22 = vmul.f32 %v7753_v33, %v1997_v54  ;;  %v1995_v16 = vpop.permute.xlu0 %1994 }
 0xf72   :  { %v2014_v28 = vmul.f32 %v7756_v1, %v1995_v16  ;;  %v1973_v16 = vmul.f32 %v7745_v3, %v7315_v24  ;;  %v1974_v24 = vmul.f32 %v7756_v1, %v7325_v35 }
 0xf73   :  { %2036 = vrot.lane.b32.xlu1 %v2015_v22, %s7031_s19 }
 0xf74   :  { %v2001_v2 = vpop.permute.xlu1 %2000  ;;  %2034 = vrot.lane.b32.xlu0 %v2014_v28, %s7031_s19 }
 0xf75   :  { %v2017_v40 = vmul.f32 %v7761_v14, %v2001_v2  ;;  %v1999_v42 = vpop.permute.xlu0 %1998 }
 0xf76   :  { %v2016_v8 = vmul.f32 %v7764_v4, %v1999_v42  ;;  %v1975_v42 = vmul.f32 %v7753_v33, %v7323_v31  ;;  %v1976_v31 = vmul.f32 %v7764_v4, %v7333_v50 }
 0xf77   :  { %2040 = vrot.lane.b32.xlu1 %v2017_v40, %s7031_s19 }
 0xf78   :  { %2038 = vrot.lane.b32.xlu0 %v2016_v8, %s7031_s19 }
 0xfdd   :  { %v2029_v11 = vpop.permute.xlu1 %2028 }
 0xfde   :  { %v7774_v61 = vadd.f32 %v2029_v11, %v1971_v32  ;;  %v2027_v54 = vpop.permute.xlu0 %2026 }
 0xfdf   :  { %v7776_v22 = vadd.f32 %v2027_v54, %v1970_v48  ;;  %v1977_v48 = vmul.f32 %v7761_v14, %v7331_v46 }
 0xfe0   :  { %6646 = vtanh.f32 %v7774_v61 }
 0xfe1   :  { %6648 = vtanh.f32 %v7776_v22  ;;  %v2033_v28 = vpop.permute.xlu1 %2032 }
 0xfe2   :  { %v7784_v2 = vadd.f32 %v2033_v28, %v1973_v16  ;;  %v2031_v40 = vpop.permute.xlu0 %2030 }
 0xfe3   :  { %v7786_v20 = vadd.f32 %v2031_v40, %v1972_v18 }
 0xfe4   :  { %6650 = vtanh.f32 %v7784_v2 }
 0xfe5   :  { %6652 = vtanh.f32 %v7786_v20  ;;  %v2037_v8 = vpop.permute.xlu1 %2036 }
 0xfe6   :  { %v7794_v32 = vadd.f32 %v2037_v8, %v1975_v42  ;;  %v2035_v11 = vpop.permute.xlu0 %2034 }
 0xfe7   :  { %v7796_v26 = vadd.f32 %v2035_v11, %v1974_v24 }
 0xfe8   :  { %6654 = vtanh.f32 %v7794_v32 }
 0xfe9   :  { %6656 = vtanh.f32 %v7796_v26  ;;  %v2041_v54 = vpop.permute.xlu1 %2040 }
 0xfea   :  { %v6647_v16 = vpop.eup %6646  ;;  %v7804_v28 = vadd.f32 %v2041_v54, %v1977_v48  ;;  %v2039_v35 = vpop.permute.xlu0 %2038 }
 0xfeb   :  { %v6649_v18 = vpop.eup %6648  ;;  %v7806_v40 = vadd.f32 %v2039_v35, %v1976_v31  ;;  %2076 = vrot.lane.b32.xlu1 %v6647_v16, %s7031_s19 }
 0xfec   :  { %6658 = vtanh.f32 %v7804_v28  ;;  %2074 = vrot.lane.b32.xlu0 %v6649_v18, %s7031_s19 }
 0xfed   :  { %6660 = vtanh.f32 %v7806_v40 }
 0xfee   :  { %v6651_v46 = vpop.eup %6650 }
 0xfef   :  { %v6653_v42 = vpop.eup %6652  ;;  %2080 = vrot.lane.b32.xlu1 %v6651_v46, %s7031_s19 }
 0xff0   :  { %2078 = vrot.lane.b32.xlu0 %v6653_v42, %s7031_s19 }
 0xff2   :  { %v6655_v50 = vpop.eup %6654 }
 0xff3   :  { %v6657_v8 = vpop.eup %6656  ;;  %2084 = vrot.lane.b32.xlu1 %v6655_v50, %s7031_s19 }
 0xff4   :  { %2082 = vrot.lane.b32.xlu0 %v6657_v8, %s7031_s19 }
 0xff6   :  { %v6659_v24 = vpop.eup %6658 }
 0xff7   :  { %v6661_v11 = vpop.eup %6660  ;;  %2088 = vrot.lane.b32.xlu1 %v6659_v24, %s7031_s19 }
 0xff8   :  { %2086 = vrot.lane.b32.xlu0 %v6661_v11, %s7031_s19 }
0x105d   :  { %v2077_v48 = vpop.permute.xlu1 %2076 }
0x105e   :  { %v2099_v54 = vmul.f32 %v7738_v60, %v2077_v48  ;;  %v2075_v31 = vpop.permute.xlu0 %2074 }
0x105f   :  { %v2098_v16 = vmul.f32 %v7740_v38, %v2075_v31 }
0x1060   :  { %2116 = vrot.lane.b32.xlu1 %v2099_v54, %s7033_s12 }
0x1061   :  { %v2081_v35 = vpop.permute.xlu1 %2080  ;;  %2114 = vrot.lane.b32.xlu0 %v2098_v16, %s7033_s12 }
0x1062   :  { %v2101_v18 = vmul.f32 %v7745_v3, %v2081_v35  ;;  %v2079_v46 = vpop.permute.xlu0 %2078 }
0x1063   :  { %v2100_v42 = vmul.f32 %v7748_v39, %v2079_v46 }
0x1064   :  { %2120 = vrot.lane.b32.xlu1 %v2101_v18, %s7033_s12 }
0x1065   :  { %v2085_v50 = vpop.permute.xlu1 %2084  ;;  %2118 = vrot.lane.b32.xlu0 %v2100_v42, %s7033_s12 }
0x1066   :  { %v2103_v60 = vmul.f32 %v7753_v33, %v2085_v50  ;;  %v2083_v8 = vpop.permute.xlu0 %2082  ;;  %v2688_v33 = vld [vmem:[%s9010_s0 + $0x10] sm:$0xff] }
0x1067   :  { %v2102_v38 = vmul.f32 %v7756_v1, %v2083_v8 }
0x1068   :  { %2124 = vrot.lane.b32.xlu1 %v2103_v60, %s7033_s12 }
0x1069   :  { %v2089_v24 = vpop.permute.xlu1 %2088  ;;  %2122 = vrot.lane.b32.xlu0 %v2102_v38, %s7033_s12 }
0x106a   :  { %v2105_v3 = vmul.f32 %v7761_v14, %v2089_v24  ;;  %v2087_v11 = vpop.permute.xlu0 %2086 }
0x106b   :  { %v2104_v39 = vmul.f32 %v7764_v4, %v2087_v11 }
0x106c   :  { %2128 = vrot.lane.b32.xlu1 %v2105_v3, %s7033_s12 }
0x106d   :  { %2126 = vrot.lane.b32.xlu0 %v2104_v39, %s7033_s12 }
0x1071   :  { %2691 = vperm.xlu0 %6436, %v2688_v33   ;;  %v7916_v33 = vld [vmem:[%s9009_s1] ss:$0 sm:$0xff] }
0x1072   :  { %9024 = vst [vmem:[#allocation3_spill] sm:$0xff] %v7916_v33 }
0x10d2   :  { %v7837_v1 = vpop.permute.xlu1 %2116 }
0x10d3   :  { %v7839_v48 = vpop.permute.xlu0 %2114 }
0x10d4   :  { %5884 = vmatprep.mubr.msk.f32.mxu0 %vm277_vm2, %v7839_v48 }
0x10d5   :  { %5885 = vmatmul.mubr.msk.f32.vlgmr.msra.gmra.mrb[16].mxu0 %vm277_vm2, %v7837_v1 }
0x10d6   :  { %v7845_v14 = vpop.permute.xlu1 %2120  ;;  %6228 = vmatpush3.bf16.msra.mxu0 %v7361_v7 }
0x10d7   :  { %v7848_v4 = vpop.permute.xlu0 %2118  ;;  %6230 = vmatprep.subr.bf16.mxu0 %v7393_v29 }
0x10d8   :  { %5887 = vmatprep.mubr.msk.f32.mxu0 %vm277_vm2, %v7848_v4 }
0x10d9   :  { %5888 = vmatmul.mubr.msk.f32.gmra.mrb[18].mxu0 %vm277_vm2, %v7845_v14 }
0x10da   :  { %v7855_v54 = vpop.permute.xlu1 %2124  ;;  %6232 = vmatpush3.bf16.msra.mxu0 %v7393_v29 }
0x10db   :  { %v7858_v31 = vpop.permute.xlu0 %2122  ;;  %6249 = vmatprep.subr.bf16.mxu0 %v9016_v0 }
0x10dc   :  { %5890 = vmatprep.mubr.msk.f32.mxu0 %vm277_vm2, %v7858_v31 }
0x10dd   :  { %5891 = vmatmul.mubr.msk.f32.gmra.mrb[20].mxu0 %vm277_vm2, %v7855_v54 }
0x10de   :  { %v7867_v35 = vpop.permute.xlu1 %2128 }
0x10df   :  { %v7865_v16 = vpop.permute.xlu0 %2126 }
0x10e0   :  { %5893 = vmatprep.mubr.msk.f32.mxu0 %vm277_vm2, %v7865_v16 }
0x10e1   :  { %5894 = vmatmul.mubr.msk.f32.gmra.mrb[22].mxu0 %vm277_vm2, %v7867_v35 }
0x10e2   :  { %5904 = vmatprep.mubr.msk.f32.mxu0 %vm95_vm1, %v7619_v41 }
0x10e5   :  { %5905 = vmatmul.mubr.msk.f32.vlgmr.msra.gmra.mrb[16].mxu0 %vm95_vm1, %v7617_v9  ;;  %v9023_v9 = vmov 0.0  }
0x10e6   :  { %5907 = vmatprep.mubr.msk.f32.mxu0 %vm95_vm1, %v7634_v49  ;;  %6251 = vmatpush3.bf16.msra.mxu0 %v7073_v5 }
0x10e7   :  { %6252 = vmatprep.subr.bf16.mxu0 %v9016_v0 }
0x10e9   :  { %5908 = vmatmul.mubr.msk.f32.gmra.mrb[18].mxu0 %vm95_vm1, %v7632_v12  ;;  %v7904_v12 = vld [vmem:[%s9009_s1 + $0xc0] ss:$0 sm:$0xff] }
0x10ea   :  { %5910 = vmatprep.mubr.msk.f32.mxu0 %vm95_vm1, %v7643_v62  ;;  %6254 = vmatpush3.bf16.msra.mxu0 %v7088_v10 }
0x10eb   :  { %6264 = vmatprep.subr.bf16.mxu0 %v9016_v0 }
0x10ed   :  { %5911 = vmatmul.mubr.msk.f32.gmra.mrb[20].mxu0 %vm95_vm1, %v7641_v30 }
0x10ee   :  { %5913 = vmatprep.mubr.msk.f32.mxu0 %vm95_vm1, %v7652_v17 }
0x10f0   :  { %v2692_v8 = vpop.permute.xlu0 %2691 }
0x10f1   :  { %5914 = vmatmul.mubr.msk.f32.gmra.mrb[22].mxu0 %vm95_vm1, %v7650_v13 }
0x10f2   :  { %5943 = vmatprep.mubr.msk.f32.mxu0 %vm7026_vm0, %v9023_v9 }
0x10f5   :  { %5944 = vmatmul.mubr.msk.f32.vlgmr.msra.gmra.mrb[24].mxu0 %vm95_vm1, %v7672_v37 }
0x10f6   :  { %6266 = vmatpush3.bf16.msra.mxu0 %v7176_v63  ;;  %5968 = vmatprep.mubr.msk.f32.mxu0 %vm7026_vm0, %v9023_v9 }
0x10f7   :  { %6268 = vmatprep.subr.bf16.mxu0 %v7186_v6 }
0x11b8   :  { %v5906_v41 = vpop.f32.mrb[16].mxu0 }
0x11b9   :  { %v6359_v49 = vadd.f32 %v7904_v12, %v5906_v41  ;;  %v2317_v30 = vpop.f32.mrb[17].mxu0  ;;  %v2694_v41 = vmul.f32 %v7916_v33, %v2692_v8 }
0x11ba   :  { %v6360_v62 = vadd.f32 %v7904_v12, %v2317_v30 }
0x11bb   :  { %6662 = vtanh.f32 %v6359_v49 }
0x11bc   :  { %6664 = vtanh.f32 %v6360_v62  ;;  %v5909_v13 = vpop.f32.mrb[18].mxu0 }
0x11bd   :  { %v6361_v17 = vadd.f32 %v7904_v12, %v5909_v13  ;;  %v2327_v37 = vpop.f32.mrb[19].mxu0 }
0x11be   :  { %v6362_v18 = vadd.f32 %v7904_v12, %v2327_v37 }
0x11bf   :  { %6666 = vtanh.f32 %v6361_v17 }
0x11c0   :  { %6668 = vtanh.f32 %v6362_v18  ;;  %v5912_v46 = vpop.f32.mrb[20].mxu0 }
0x11c1   :  { %v6363_v42 = vadd.f32 %v7904_v12, %v5912_v46  ;;  %v2337_v50 = vpop.f32.mrb[21].mxu0 }
0x11c2   :  { %v6364_v60 = vadd.f32 %v7904_v12, %v2337_v50 }
0x11c3   :  { %6670 = vtanh.f32 %v6363_v42 }
0x11c4   :  { %6672 = vtanh.f32 %v6364_v60  ;;  %v5915_v38 = vpop.f32.mrb[22].mxu0 }
0x11c5   :  { %v6663_v24 = vpop.eup %6662  ;;  %v6365_v3 = vadd.f32 %v7904_v12, %v5915_v38  ;;  %v2347_v11 = vpop.f32.mrb[23].mxu0  ;;  %v7925_v38 = vld [vmem:[%s9009_s1 + $0x8] ss:$0 sm:$0xff] }
0x11c6   :  { %v6665_v39 = vpop.eup %6664  ;;  %v6366_v30 = vadd.f32 %v7904_v12, %v2347_v11  ;;  %2438 = vrot.lane.b32.xlu0 %v6663_v24, %s7029_s27  ;;  %9025 = vst [vmem:[#allocation4_spill] sm:$0xff] %v7925_v38  ;;  %v2695_v0 = vadd.f32 %v7925_v38, %v2694_v41  ;;  %v5367_v41 = vmul.f32 -1.442695, %v6359_v49 }
0x11c7   :  { %6674 = vtanh.f32 %v6365_v3  ;;  %2436 = vrot.lane.b32.xlu1 %v6665_v39, %s7029_s27 }
0x11c8   :  { %6676 = vtanh.f32 %v6366_v30  ;;  %v2762_v13 = vpop.f32.mrb[24].mxu0  ;;  %v5372_v38 = vmul.f32 -1.442695, %v6366_v30 }
0x11c9   :  { %v6667_v37 = vpop.eup %6666  ;;  %v5945_v46 = vpop.f32.mrb[25].mxu0  ;;  %v2766_v8 = vadd.f32 %v2762_v13, %v2695_v0  ;;  %v5369_v0 = vmul.f32 -1.442695, %v6361_v17  ;;  %v5368_v13 = vmul.f32 -1.442695, %v6362_v18 }
0x11ca   :  { %v6669_v50 = vpop.eup %6668  ;;  %2442 = vrot.lane.b32.xlu0 %v6667_v37, %s7029_s27  ;;  %v5366_v37 = vmul.f32 -1.442695, %v6360_v62 }
0x11cb   :  { %2440 = vrot.lane.b32.xlu1 %v6669_v50, %s7029_s27  ;;  %6678 = vtanh.f32 %v2766_v8  ;;  %v5371_v50 = vmul.f32 -1.442695, %v6363_v42 }
0x11cc   :  { %6680 = vpow2.f32 %v5367_v41  ;;  %v5384_v41 = vmul.f32 -1.442695, %v2766_v8 }
0x11cd   :  { %v6671_v24 = vpop.eup %6670  ;;  %6682 = vpow2.f32 %v5366_v37 }
0x11ce   :  { %v6673_v11 = vpop.eup %6672  ;;  %2446 = vrot.lane.b32.xlu0 %v6671_v24, %s7029_s27  ;;  %6684 = vpow2.f32 %v5369_v0  ;;  %v5370_v24 = vmul.f32 -1.442695, %v6364_v60 }
0x11cf   :  { %2444 = vrot.lane.b32.xlu1 %v6673_v11, %s7029_s27  ;;  %6686 = vpow2.f32 %v5368_v13  ;;  %v5373_v11 = vmul.f32 -1.442695, %v6365_v3 }
0x11d0   :  { %6688 = vpow2.f32 %v5371_v50 }
0x11d1   :  { %v6675_v39 = vpop.eup %6674  ;;  %6690 = vpow2.f32 %v5370_v24 }
0x11d2   :  { %v6677_v46 = vpop.eup %6676  ;;  %2450 = vrot.lane.b32.xlu0 %v6675_v39, %s7029_s27  ;;  %6692 = vpow2.f32 %v5373_v11 }
0x11d3   :  { %2448 = vrot.lane.b32.xlu1 %v6677_v46, %s7029_s27  ;;  %6694 = vpow2.f32 %v5372_v38 }
0x11d5   :  { %v6679_v27 = vpop.eup %6678 }
0x11d6   :  { %v6681_v39 = vpop.eup %6680 }
0x11d7   :  { %2776 = vrot.lane.b32.xlu1 %v6679_v27, %s7029_s27  ;;  %v6683_v33 = vpop.eup %6682  ;;  %v2389_v46 = vadd.f32 1.0, %v6681_v39 }
0x11d8   :  { %v6685_v27 = vpop.eup %6684  ;;  %v2388_v49 = vadd.f32 1.0, %v6683_v33 }
0x11d9   :  { %v6687_v62 = vpop.eup %6686  ;;  %6696 = vrcp.f32 %v2389_v46  ;;  %v2391_v17 = vadd.f32 1.0, %v6685_v27 }
0x11da   :  { %v6689_v18 = vpop.eup %6688  ;;  %6698 = vrcp.f32 %v2388_v49  ;;  %v2390_v42 = vadd.f32 1.0, %v6687_v62 }
0x11db   :  { %v6691_v37 = vpop.eup %6690  ;;  %6700 = vpow2.f32 %v5384_v41  ;;  %v2393_v60 = vadd.f32 1.0, %v6689_v18 }
0x11dc   :  { %6702 = vrcp.f32 %v2391_v17  ;;  %v6693_v3 = vpop.eup %6692  ;;  %v2392_v30 = vadd.f32 1.0, %v6691_v37 }
0x11dd   :  { %6704 = vrcp.f32 %v2390_v42  ;;  %v6695_v0 = vpop.eup %6694  ;;  %v2395_v13 = vadd.f32 1.0, %v6693_v3 }
0x11de   :  { %6706 = vrcp.f32 %v2393_v60  ;;  %v2394_v38 = vadd.f32 1.0, %v6695_v0 }
0x11df   :  { %6708 = vrcp.f32 %v2392_v30 }
0x11e0   :  { %6710 = vrcp.f32 %v2395_v13 }
0x11e1   :  { %6712 = vrcp.f32 %v2394_v38 }
0x11e3   :  { %v7935_v33 = vpop.eup %6696 }
0x11e4   :  { %v7937_v50 = vpop.eup %6698 }
0x11e5   :  { %v6701_v46 = vpop.eup %6700 }
0x11e6   :  { %v7942_v27 = vpop.eup %6702  ;;  %v2770_v42 = vadd.f32 1.0, %v6701_v46 }
0x11e7   :  { %v7945_v62 = vpop.eup %6704 }
0x11e8   :  { %v7950_v37 = vpop.eup %6706  ;;  %6714 = vrcp.f32 %v2770_v42 }
0x11e9   :  { %v7953_v3 = vpop.eup %6708 }
0x11ea   :  { %v7958_v38 = vpop.eup %6710 }
0x1238   :  { %v2439_v8 = vpop.permute.xlu0 %2438 }
0x1239   :  { %v2461_v24 = vmul.f32 %v7935_v33, %v2439_v8  ;;  %v2437_v11 = vpop.permute.xlu1 %2436 }
0x123a   :  { %v2460_v39 = vmul.f32 %v7937_v50, %v2437_v11 }
0x123b   :  { %2478 = vrot.lane.b32.xlu1 %v2461_v24, %s7029_s27  ;;  %v7961_v24 = vpop.eup %6712 }
0x123c   :  { %v2443_v49 = vpop.permute.xlu0 %2442  ;;  %2476 = vrot.lane.b32.xlu0 %v2460_v39, %s7029_s27 }
0x123d   :  { %v2463_v41 = vmul.f32 %v7942_v27, %v2443_v49  ;;  %v2441_v17 = vpop.permute.xlu1 %2440  ;;  %v7967_v49 = vpop.eup %6714 }
0x123e   :  { %v2462_v18 = vmul.f32 %v7945_v62, %v2441_v17 }
0x123f   :  { %2482 = vrot.lane.b32.xlu1 %v2463_v41, %s7029_s27 }
0x1240   :  { %v2447_v60 = vpop.permute.xlu0 %2446  ;;  %2480 = vrot.lane.b32.xlu0 %v2462_v18, %s7029_s27  ;;  %v2421_v18 = vmul.f32 %v7935_v33, %v7555_v44  ;;  %v2422_v44 = vmul.f32 %v7945_v62, %v7565_v55 }
0x1241   :  { %v2465_v30 = vmul.f32 %v7950_v37, %v2447_v60  ;;  %v2445_v0 = vpop.permute.xlu1 %2444  ;;  %v2420_v60 = vmul.f32 %v7937_v50, %v7557_v21 }
0x1242   :  { %v2464_v13 = vmul.f32 %v7953_v3, %v2445_v0 }
0x1243   :  { %2486 = vrot.lane.b32.xlu1 %v2465_v30, %s7029_s27 }
0x1244   :  { %2484 = vrot.lane.b32.xlu0 %v2464_v13, %s7029_s27  ;;  %v2451_v8 = vpop.permute.xlu0 %2450 }
0x1245   :  { %v2467_v11 = vmul.f32 %v7958_v38, %v2451_v8  ;;  %v2449_v39 = vpop.permute.xlu1 %2448  ;;  %v2423_v8 = vmul.f32 %v7942_v27, %v7563_v45  ;;  %v2424_v45 = vmul.f32 %v7953_v3, %v7575_v15 }
0x1246   :  { %v2466_v46 = vmul.f32 %v7961_v24, %v2449_v39 }
0x1247   :  { %2490 = vrot.lane.b32.xlu1 %v2467_v11, %s7029_s27 }
0x1248   :  { %2488 = vrot.lane.b32.xlu0 %v2466_v46, %s7029_s27 }
0x1249   :  { %v2777_v41 = vpop.permute.xlu1 %2776 }
0x124a   :  { %v2779_v17 = vmul.f32 %v7967_v49, %v2777_v41  ;;  %v2425_v41 = vmul.f32 %v7950_v37, %v7573_v59  ;;  %v2426_v59 = vmul.f32 %v7961_v24, %v7585_v51  ;;  %v2774_v51 = vmul.f32 %v7967_v49, %v7591_v58 }
0x124c   :  { %2781 = vrot.lane.b32.xlu0 %v2779_v17, %s7029_s27 }
0x12ad   :  { %v2479_v42 = vpop.permute.xlu1 %2478 }
0x12ae   :  { %v7975_v30 = vadd.f32 %v2479_v42, %v2421_v18  ;;  %v2477_v0 = vpop.permute.xlu0 %2476 }
0x12af   :  { %v7977_v13 = vadd.f32 %v2477_v0, %v2420_v60  ;;  %v2427_v60 = vmul.f32 %v7958_v38, %v7583_v25 }
0x12b0   :  { %6716 = vtanh.f32 %v7975_v30 }
0x12b1   :  { %6718 = vtanh.f32 %v7977_v13  ;;  %v2483_v11 = vpop.permute.xlu1 %2482 }
0x12b2   :  { %v7985_v39 = vadd.f32 %v2483_v11, %v2423_v8  ;;  %v2481_v46 = vpop.permute.xlu0 %2480 }
0x12b3   :  { %v7987_v21 = vadd.f32 %v2481_v46, %v2422_v44 }
0x12b4   :  { %6720 = vtanh.f32 %v7985_v39 }
0x12b5   :  { %6722 = vtanh.f32 %v7987_v21  ;;  %v2487_v17 = vpop.permute.xlu1 %2486 }
0x12b6   :  { %v7995_v18 = vadd.f32 %v2487_v17, %v2425_v41  ;;  %v2485_v42 = vpop.permute.xlu0 %2484 }
0x12b7   :  { %v7997_v55 = vadd.f32 %v2485_v42, %v2424_v45 }
0x12b8   :  { %6724 = vtanh.f32 %v7995_v18 }
0x12b9   :  { %6726 = vtanh.f32 %v7997_v55  ;;  %v2491_v0 = vpop.permute.xlu1 %2490 }
0x12ba   :  { %v6717_v8 = vpop.eup %6716  ;;  %v8005_v11 = vadd.f32 %v2491_v0, %v2427_v60  ;;  %v2489_v15 = vpop.permute.xlu0 %2488 }
0x12bb   :  { %v6719_v44 = vpop.eup %6718  ;;  %v8007_v46 = vadd.f32 %v2489_v15, %v2426_v59  ;;  %2526 = vrot.lane.b32.xlu0 %v6717_v8, %s7029_s27 }
0x12bc   :  { %6728 = vtanh.f32 %v8005_v11  ;;  %2524 = vrot.lane.b32.xlu1 %v6719_v44, %s7029_s27 }
0x12bd   :  { %6730 = vtanh.f32 %v8007_v46 }
0x12be   :  { %v6721_v25 = vpop.eup %6720  ;;  %v2782_v45 = vpop.permute.xlu0 %2781 }
0x12bf   :  { %v6723_v41 = vpop.eup %6722  ;;  %2530 = vrot.lane.b32.xlu0 %v6721_v25, %s7029_s27  ;;  %v8017_v60 = vadd.f32 %v2782_v45, %v2774_v51 }
0x12c0   :  { %2528 = vrot.lane.b32.xlu1 %v6723_v41, %s7029_s27 }
0x12c1   :  { %6732 = vtanh.f32 %v8017_v60 }
0x12c2   :  { %v6725_v17 = vpop.eup %6724 }
0x12c3   :  { %v6727_v42 = vpop.eup %6726  ;;  %2534 = vrot.lane.b32.xlu0 %v6725_v17, %s7029_s27 }
0x12c4   :  { %2532 = vrot.lane.b32.xlu1 %v6727_v42, %s7029_s27 }
0x12c6   :  { %v6729_v0 = vpop.eup %6728 }
0x12c7   :  { %v6731_v59 = vpop.eup %6730  ;;  %2538 = vrot.lane.b32.xlu0 %v6729_v0, %s7029_s27 }
0x12c8   :  { %2536 = vrot.lane.b32.xlu1 %v6731_v59, %s7029_s27 }
0x12cb   :  { %v6733_v8 = vpop.eup %6732 }
0x12cc   :  { %2787 = vrot.lane.b32.xlu1 %v6733_v8, %s7029_s27 }
0x132d   :  { %v2527_v58 = vpop.permute.xlu0 %2526 }
0x132e   :  { %v2549_v15 = vmul.f32 %v7935_v33, %v2527_v58  ;;  %v2525_v44 = vpop.permute.xlu1 %2524 }
0x132f   :  { %v2548_v25 = vmul.f32 %v7937_v50, %v2525_v44 }
0x1330   :  { %2566 = vrot.lane.b32.xlu1 %v2549_v15, %s7030_s16 }
0x1331   :  { %2564 = vrot.lane.b32.xlu0 %v2548_v25, %s7030_s16  ;;  %v2531_v41 = vpop.permute.xlu0 %2530 }
0x1332   :  { %v2551_v51 = vmul.f32 %v7942_v27, %v2531_v41  ;;  %v2529_v17 = vpop.permute.xlu1 %2528 }
0x1333   :  { %v2550_v45 = vmul.f32 %v7945_v62, %v2529_v17 }
0x1334   :  { %2570 = vrot.lane.b32.xlu1 %v2551_v51, %s7030_s16 }
0x1335   :  { %2568 = vrot.lane.b32.xlu0 %v2550_v45, %s7030_s16  ;;  %v2535_v42 = vpop.permute.xlu0 %2534 }
0x1336   :  { %v2553_v33 = vmul.f32 %v7950_v37, %v2535_v42  ;;  %v2533_v0 = vpop.permute.xlu1 %2532 }
0x1337   :  { %v2552_v50 = vmul.f32 %v7953_v3, %v2533_v0 }
0x1338   :  { %2574 = vrot.lane.b32.xlu1 %v2553_v33, %s7030_s16 }
0x1339   :  { %2572 = vrot.lane.b32.xlu0 %v2552_v50, %s7030_s16  ;;  %v2539_v59 = vpop.permute.xlu0 %2538 }
0x133a   :  { %v2555_v27 = vmul.f32 %v7958_v38, %v2539_v59  ;;  %v2537_v8 = vpop.permute.xlu1 %2536  ;;  %v9026_v38 = vmov 0.0|0.0  }
0x133b   :  { %v2554_v62 = vmul.f32 %v7961_v24, %v2537_v8 }
0x133c   :  { %2578 = vrot.lane.b32.xlu1 %v2555_v27, %s7030_s16 }
0x133d   :  { %2576 = vrot.lane.b32.xlu0 %v2554_v62, %s7030_s16 }
0x133e   :  { %v2788_v58 = vpop.permute.xlu1 %2787 }
0x133f   :  { %v2790_v37 = vmul.f32 %v7967_v49, %v2788_v58 }
0x1341   :  { %2792 = vrot.lane.b32.xlu0 %v2790_v37, %s7030_s16 }
0x13a2   :  { %v8043_v3 = vpop.permute.xlu1 %2566 }
0x13a3   :  { %v8045_v15 = vpop.permute.xlu0 %2564 }
0x13a4   :  { %v6234_v44 = vpack.c.bf16 %v8043_v3, %v8045_v15 }
0x13a6   :  { %6236 = vmatpush3.bf16.xpose.msk.msra.mxu1 %vm7623_vm3, %v6234_v44  ;;  %v8052_v24 = vpop.permute.xlu1 %2570 }
0x13a7   :  { %6237 = vmatprep.subr.bf16.mxu1 %v9026_v38  ;;  %v8054_v25 = vpop.permute.xlu0 %2568 }
0x13a8   :  { %v6238_v49 = vpack.c.bf16 %v8052_v24, %v8054_v25 }
0x13aa   :  { %v8061_v41 = vpop.permute.xlu1 %2574 }
0x13ab   :  { %v8063_v51 = vpop.permute.xlu0 %2572 }
0x13ac   :  { %v6242_v17 = vpack.c.bf16 %v8061_v41, %v8063_v51 }
0x13ae   :  { %6240 = vmatpush3.bf16.xpose.msk.msra.mxu1 %vm7623_vm3, %v6238_v49  ;;  %v8070_v45 = vpop.permute.xlu1 %2578 }
0x13af   :  { %6241 = vmatprep.subr.bf16.mxu1 %v9026_v38  ;;  %v8072_v42 = vpop.permute.xlu0 %2576 }
0x13b0   :  { %v6246_v33 = vpack.c.bf16 %v8070_v45, %v8072_v42 }
0x13b3   :  { %v8087_v0 = vpop.permute.xlu0 %2792 }
0x13b6   :  { %6244 = vmatpush3.bf16.xpose.msk.msra.mxu1 %vm7623_vm3, %v6242_v17 }
0x13b7   :  { %6245 = vmatprep.subr.bf16.mxu1 %v9026_v38 }
0x13be   :  { %6248 = vmatpush3.bf16.xpose.msk.msra.mxu1 %vm7623_vm3, %v6246_v33 }
0x13bf   :  { %6255 = vmatprep.subr.bf16.mxu1 %v9026_v38 }
0x13c5   :  { %5933 = vmatmul.mubr.msk.f32.vlgmr.msra.gmra.mrb[22].mxu1 %vm95_vm1, %v7662_v23 }
0x13c6   :  { %6257 = vmatpush3.bf16.msra.mxu1 %v7126_v34  ;;  %5954 = vmatprep.mubr.msk.f32.mxu1 %vm7026_vm0, %v9023_v9 }
0x13c7   :  { %6258 = vmatprep.subr.bf16.mxu1 %v9026_v38 }
0x13ca   :  { %6260 = vmatpush3.bf16.msra.mxu1 %v7132_v36 }
0x13cb   :  { %6261 = vmatprep.subr.bf16.mxu1 %v9026_v38 }
0x13cd   :  { %5955 = vmatmul.mubr.msk.f32.vlgmr.msra.gmra.mrb[24].mxu1 %vm95_vm1, %v8087_v0 }
0x13ce   :  { %6263 = vmatpush3.bf16.msra.mxu1 %v7149_v43  ;;  %5961 = vmatprep.mubr.msk.f32.mxu1 %vm7026_vm0, %v9023_v9 }
0x13cf   :  { %6272 = vmatprep.subr.bf16.mxu1 %v7345_v56 }
0x13d5   :  { %5962 = vmatmul.mubr.msk.f32.vlgmr.msra.gmra.mrb[24].mxu1 %vm277_vm2, %v7700_v47 }
0x13d6   :  { %6274 = vmatpush3.bf16.msra.mxu1 %v7345_v56 }
0x13d7   :  { %6276 = vmatprep.subr.bf16.mxu1 %v7361_v7 }
0x1498   :  { %v8099_v23 = vpop.f32.mrb[22].mxu1 }
0x1499   :  { %9027 = vst [vmem:[#allocation5_spill] sm:$0xff] %v8099_v23  ;;  %v5934_v50 = vpop.f32.mrb[23].mxu1 }
0x14a8   :  { %v2932_v59 = vpop.f32.mrb[24].mxu1 }
0x14a9   :  { %v6367_v27 = vadd.f32 %v7689_v52, %v2932_v59  ;;  %v5963_v8 = vpop.f32.mrb[25].mxu1 }
0x14ab   :  { %6734 = vtanh.f32 %v6367_v27  ;;  %v5387_v58 = vmul.f32 -1.442695, %v6367_v27 }
0x14ad   :  { %6736 = vpow2.f32 %v5387_v58 }
0x14b5   :  { %v6735_v62 = vpop.eup %6734 }
0x14b6   :  { %2946 = vrot.lane.b32.xlu1 %v6735_v62, %s7032_s29 }
0x14b7   :  { %v6737_v37 = vpop.eup %6736 }
0x14b8   :  { %v2940_v44 = vadd.f32 1.0, %v6737_v37 }
0x14ba   :  { %6738 = vrcp.f32 %v2940_v44 }
0x14c4   :  { %v6739_v47 = vpop.eup %6738 }
0x14c5   :  { %v2944_v33 = vmul.f32 %v6739_v47, %v7695_v19 }
0x1528   :  { %v2947_v49 = vpop.permute.xlu1 %2946 }
0x1529   :  { %v2949_v17 = vmul.f32 %v6739_v47, %v2947_v49 }
0x152b   :  { %2951 = vrot.lane.b32.xlu0 %v2949_v17, %s7031_s19 }
0x159d   :  { %v2952_v50 = vpop.permute.xlu0 %2951 }
0x159e   :  { %v8105_v23 = vadd.f32 %v2952_v50, %v2944_v33 }
0x15a0   :  { %6740 = vtanh.f32 %v8105_v23 }
0x15aa   :  { %v6741_v52 = vpop.eup %6740 }
0x15ab   :  { %2957 = vrot.lane.b32.xlu1 %v6741_v52, %s7031_s19 }
0x161d   :  { %v2958_v59 = vpop.permute.xlu1 %2957 }
0x161e   :  { %v2960_v27 = vmul.f32 %v6739_v47, %v2958_v59 }
0x1620   :  { %2962 = vrot.lane.b32.xlu0 %v2960_v27, %s7033_s12 }
0x1692   :  { %v8110_v8 = vpop.permute.xlu0 %2962 }
0x1693   :  { %5969 = vmatmul.mubr.msk.f32.vlgmr.msra.gmra.mrb[26].mxu0 %vm277_vm2, %v8110_v8 }
0x1694   :  { %6270 = vmatpush3.bf16.msra.mxu0 %v7186_v6  ;;  %5975 = vmatprep.mubr.msk.f32.mxu0 %vm277_vm2, %v7839_v48 }
0x1695   :  { %6283 = vmatprep.subr.bf16.mxu0 %v9026_v38 }
0x1697   :  { %5976 = vmatmul.mubr.msk.f32.vlgmr.msra.gmra.mrb[28].mxu0 %vm277_vm2, %v7837_v1 }
0x1698   :  { %5978 = vmatprep.mubr.msk.f32.mxu0 %vm277_vm2, %v7848_v4 }
0x169b   :  { %5979 = vmatmul.mubr.msk.f32.gmra.mrb[30].mxu0 %vm277_vm2, %v7845_v14 }
0x169c   :  { %5981 = vmatprep.mubr.msk.f32.mxu0 %vm277_vm2, %v7858_v31 }
0x169f   :  { %5982 = vmatmul.mubr.msk.f32.gmra.mrb[32].mxu0 %vm277_vm2, %v7855_v54 }
0x16a0   :  { %5984 = vmatprep.mubr.msk.f32.mxu0 %vm277_vm2, %v7865_v16 }
0x16a3   :  { %5985 = vmatmul.mubr.msk.f32.gmra.mrb[34].mxu0 %vm277_vm2, %v7867_v35 }
0x16a4   :  { %6039 = vmatprep.mubr.msk.f32.mxu0 %vm7026_vm0, %v9023_v9 }
0x1766   :  { %v3032_v19 = vpop.f32.mrb[26].mxu0 }
0x1767   :  { %v5970_v1 = vpop.f32.mrb[27].mxu0  ;;  %v3033_v48 = vadd.f32 %v7727_v57, %v3032_v19 }
0x176a   :  { %v5977_v14 = vpop.f32.mrb[28].mxu0 }
0x176b   :  { %v3142_v4 = vadd.f32 %v5977_v14, %v3033_v48  ;;  %v3102_v62 = vpop.f32.mrb[29].mxu0 }
0x176c   :  { %v3141_v31 = vadd.f32 %v3102_v62, %v3033_v48 }
0x176d   :  { %6742 = vtanh.f32 %v3142_v4 }
0x176e   :  { %6744 = vtanh.f32 %v3141_v31  ;;  %v5980_v54 = vpop.f32.mrb[30].mxu0 }
0x176f   :  { %v3144_v58 = vadd.f32 %v5980_v54, %v3033_v48  ;;  %v3112_v37 = vpop.f32.mrb[31].mxu0  ;;  %v5398_v54 = vmul.f32 -1.442695, %v3142_v4 }
0x1770   :  { %v3143_v16 = vadd.f32 %v3112_v37, %v3033_v48  ;;  %v5397_v37 = vmul.f32 -1.442695, %v3141_v31 }
0x1771   :  { %6746 = vtanh.f32 %v3144_v58 }
0x1772   :  { %6748 = vtanh.f32 %v3143_v16  ;;  %v5983_v35 = vpop.f32.mrb[32].mxu0 }
0x1773   :  { %v3146_v44 = vadd.f32 %v5983_v35, %v3033_v48  ;;  %v3122_v47 = vpop.f32.mrb[33].mxu0  ;;  %v5400_v35 = vmul.f32 -1.442695, %v3144_v58 }
0x1774   :  { %v3145_v49 = vadd.f32 %v3122_v47, %v3033_v48  ;;  %v5399_v47 = vmul.f32 -1.442695, %v3143_v16 }
0x1775   :  { %6750 = vtanh.f32 %v3146_v44 }
0x1776   :  { %6752 = vtanh.f32 %v3145_v49  ;;  %v5986_v17 = vpop.f32.mrb[34].mxu0 }
0x1777   :  { %v6743_v57 = vpop.eup %6742  ;;  %v3148_v33 = vadd.f32 %v5986_v17, %v3033_v48  ;;  %v3132_v50 = vpop.f32.mrb[35].mxu0  ;;  %v5402_v17 = vmul.f32 -1.442695, %v3146_v44 }
0x1778   :  { %v6745_v52 = vpop.eup %6744  ;;  %v3147_v59 = vadd.f32 %v3132_v50, %v3033_v48  ;;  %3223 = vrot.lane.b32.xlu0 %v6743_v57, %s7032_s29  ;;  %v5401_v57 = vmul.f32 -1.442695, %v3145_v49 }
0x1779   :  { %6754 = vtanh.f32 %v3148_v33  ;;  %3221 = vrot.lane.b32.xlu1 %v6745_v52, %s7032_s29  ;;  %v5404_v50 = vmul.f32 -1.442695, %v3148_v33 }
0x177a   :  { %6756 = vtanh.f32 %v3147_v59  ;;  %v5403_v52 = vmul.f32 -1.442695, %v3147_v59 }
0x177b   :  { %v6747_v27 = vpop.eup %6746  ;;  %6758 = vpow2.f32 %v5398_v54 }
0x177c   :  { %v6749_v19 = vpop.eup %6748  ;;  %3227 = vrot.lane.b32.xlu0 %v6747_v27, %s7032_s29  ;;  %6760 = vpow2.f32 %v5397_v37 }
0x177d   :  { %3225 = vrot.lane.b32.xlu1 %v6749_v19, %s7032_s29  ;;  %6762 = vpow2.f32 %v5400_v35 }
0x177e   :  { %6764 = vpow2.f32 %v5399_v47 }
0x177f   :  { %v6751_v1 = vpop.eup %6750  ;;  %6766 = vpow2.f32 %v5402_v17 }
0x1780   :  { %v6753_v14 = vpop.eup %6752  ;;  %3231 = vrot.lane.b32.xlu0 %v6751_v1, %s7032_s29  ;;  %6768 = vpow2.f32 %v5401_v57 }
0x1781   :  { %3229 = vrot.lane.b32.xlu1 %v6753_v14, %s7032_s29  ;;  %6770 = vpow2.f32 %v5404_v50 }
0x1782   :  { %6772 = vpow2.f32 %v5403_v52 }
0x1783   :  { %v6755_v62 = vpop.eup %6754 }
0x1784   :  { %v6757_v48 = vpop.eup %6756  ;;  %3235 = vrot.lane.b32.xlu0 %v6755_v62, %s7032_s29 }
0x1785   :  { %3233 = vrot.lane.b32.xlu1 %v6757_v48, %s7032_s29  ;;  %v6759_v27 = vpop.eup %6758 }
0x1786   :  { %v6761_v19 = vpop.eup %6760  ;;  %v3174_v1 = vadd.f32 1.0, %v6759_v27 }
0x1787   :  { %v6763_v14 = vpop.eup %6762  ;;  %v3173_v4 = vadd.f32 1.0, %v6761_v19 }
0x1788   :  { %v6765_v31 = vpop.eup %6764  ;;  %6774 = vrcp.f32 %v3174_v1  ;;  %v3176_v58 = vadd.f32 1.0, %v6763_v14 }
0x1789   :  { %v6767_v62 = vpop.eup %6766  ;;  %6776 = vrcp.f32 %v3173_v4  ;;  %v3175_v16 = vadd.f32 1.0, %v6765_v31 }
0x178a   :  { %v6769_v44 = vpop.eup %6768  ;;  %6778 = vrcp.f32 %v3176_v58  ;;  %v3178_v49 = vadd.f32 1.0, %v6767_v62 }
0x178b   :  { %v6771_v48 = vpop.eup %6770  ;;  %6780 = vrcp.f32 %v3175_v16  ;;  %v3177_v33 = vadd.f32 1.0, %v6769_v44 }
0x178c   :  { %v6773_v59 = vpop.eup %6772  ;;  %6782 = vrcp.f32 %v3178_v49  ;;  %v3180_v54 = vadd.f32 1.0, %v6771_v48 }
0x178d   :  { %6784 = vrcp.f32 %v3177_v33  ;;  %v3179_v37 = vadd.f32 1.0, %v6773_v59 }
0x178e   :  { %6786 = vrcp.f32 %v3180_v54 }
0x178f   :  { %6788 = vrcp.f32 %v3179_v37 }
0x1792   :  { %v8143_v35 = vpop.eup %6774 }
0x1793   :  { %v8145_v17 = vpop.eup %6776 }
0x1794   :  { %v8150_v27 = vpop.eup %6778 }
0x1795   :  { %v8153_v1 = vpop.eup %6780 }
0x1796   :  { %v8158_v58 = vpop.eup %6782 }
0x1797   :  { %v8161_v16 = vpop.eup %6784 }
0x1798   :  { %v8166_v33 = vpop.eup %6786 }
0x1799   :  { %v8169_v54 = vpop.eup %6788 }
0x17ea   :  { %v3224_v47 = vpop.permute.xlu0 %3223 }
0x17eb   :  { %v3246_v57 = vmul.f32 %v8143_v35, %v3224_v47  ;;  %v3222_v50 = vpop.permute.xlu1 %3221 }
0x17ec   :  { %v3245_v52 = vmul.f32 %v8145_v17, %v3222_v50  ;;  %v3206_v50 = vmul.f32 %v8143_v35, %v7774_v61  ;;  %v3207_v61 = vmul.f32 %v8153_v1, %v7786_v20 }
0x17ed   :  { %3263 = vrot.lane.b32.xlu0 %v3246_v57, %s7031_s19 }
0x17ee   :  { %v3228_v19 = vpop.permute.xlu0 %3227  ;;  %3261 = vrot.lane.b32.xlu1 %v3245_v52, %s7031_s19 }
0x17ef   :  { %v3248_v14 = vmul.f32 %v8150_v27, %v3228_v19  ;;  %v3226_v4 = vpop.permute.xlu1 %3225  ;;  %v3205_v19 = vmul.f32 %v8145_v17, %v7776_v22 }
0x17f0   :  { %v3247_v31 = vmul.f32 %v8153_v1, %v3226_v4 }
0x17f1   :  { %3267 = vrot.lane.b32.xlu0 %v3248_v14, %s7031_s19 }
0x17f2   :  { %v3232_v62 = vpop.permute.xlu0 %3231  ;;  %3265 = vrot.lane.b32.xlu1 %v3247_v31, %s7031_s19 }
0x17f3   :  { %v3250_v44 = vmul.f32 %v8158_v58, %v3232_v62  ;;  %v3230_v49 = vpop.permute.xlu1 %3229  ;;  %v3208_v62 = vmul.f32 %v8150_v27, %v7784_v2  ;;  %v3209_v2 = vmul.f32 %v8161_v16, %v7796_v26 }
0x17f4   :  { %v3249_v48 = vmul.f32 %v8161_v16, %v3230_v49 }
0x17f5   :  { %3271 = vrot.lane.b32.xlu0 %v3250_v44, %s7031_s19 }
0x17f6   :  { %v3236_v59 = vpop.permute.xlu0 %3235  ;;  %3269 = vrot.lane.b32.xlu1 %v3249_v48, %s7031_s19 }
0x17f7   :  { %v3252_v37 = vmul.f32 %v8166_v33, %v3236_v59  ;;  %v3234_v47 = vpop.permute.xlu1 %3233  ;;  %v3210_v59 = vmul.f32 %v8158_v58, %v7794_v32  ;;  %v3211_v32 = vmul.f32 %v8169_v54, %v7806_v40 }
0x17f8   :  { %v3251_v57 = vmul.f32 %v8169_v54, %v3234_v47 }
0x17f9   :  { %3275 = vrot.lane.b32.xlu0 %v3252_v37, %s7031_s19 }
0x17fa   :  { %3273 = vrot.lane.b32.xlu1 %v3251_v57, %s7031_s19 }
0x185f   :  { %v3264_v52 = vpop.permute.xlu0 %3263 }
0x1860   :  { %v8179_v14 = vadd.f32 %v3264_v52, %v3206_v50  ;;  %v3262_v4 = vpop.permute.xlu1 %3261  ;;  %v3212_v50 = vmul.f32 %v8166_v33, %v7804_v28 }
0x1861   :  { %v8181_v31 = vadd.f32 %v3262_v4, %v3205_v19 }
0x1862   :  { %6790 = vtanh.f32 %v8179_v14 }
0x1863   :  { %6792 = vtanh.f32 %v8181_v31  ;;  %v3268_v44 = vpop.permute.xlu0 %3267 }
0x1864   :  { %v8189_v49 = vadd.f32 %v3268_v44, %v3208_v62  ;;  %v3266_v48 = vpop.permute.xlu1 %3265 }
0x1865   :  { %v8191_v22 = vadd.f32 %v3266_v48, %v3207_v61 }
0x1866   :  { %6794 = vtanh.f32 %v8189_v49 }
0x1867   :  { %6796 = vtanh.f32 %v8191_v22  ;;  %v3272_v37 = vpop.permute.xlu0 %3271 }
0x1868   :  { %v8199_v47 = vadd.f32 %v3272_v37, %v3210_v59  ;;  %v3270_v57 = vpop.permute.xlu1 %3269 }
0x1869   :  { %v8201_v20 = vadd.f32 %v3270_v57, %v3209_v2 }
0x186a   :  { %6798 = vtanh.f32 %v8199_v47 }
0x186b   :  { %6800 = vtanh.f32 %v8201_v20  ;;  %v3276_v52 = vpop.permute.xlu0 %3275 }
0x186c   :  { %v6791_v19 = vpop.eup %6790  ;;  %v8209_v4 = vadd.f32 %v3276_v52, %v3212_v50  ;;  %v3274_v26 = vpop.permute.xlu1 %3273 }
0x186d   :  { %v6793_v62 = vpop.eup %6792  ;;  %v8211_v44 = vadd.f32 %v3274_v26, %v3211_v32  ;;  %3311 = vrot.lane.b32.xlu0 %v6791_v19, %s7031_s19 }
0x186e   :  { %6802 = vtanh.f32 %v8209_v4  ;;  %3309 = vrot.lane.b32.xlu1 %v6793_v62, %s7031_s19 }
0x186f   :  { %6804 = vtanh.f32 %v8211_v44 }
0x1870   :  { %v6795_v28 = vpop.eup %6794 }
0x1871   :  { %v6797_v61 = vpop.eup %6796  ;;  %3315 = vrot.lane.b32.xlu0 %v6795_v28, %s7031_s19 }
0x1872   :  { %3313 = vrot.lane.b32.xlu1 %v6797_v61, %s7031_s19 }
0x1874   :  { %v6799_v40 = vpop.eup %6798 }
0x1875   :  { %v6801_v48 = vpop.eup %6800  ;;  %3319 = vrot.lane.b32.xlu0 %v6799_v40, %s7031_s19 }
0x1876   :  { %3317 = vrot.lane.b32.xlu1 %v6801_v48, %s7031_s19 }
0x1878   :  { %v6803_v59 = vpop.eup %6802 }
0x1879   :  { %v6805_v37 = vpop.eup %6804  ;;  %3323 = vrot.lane.b32.xlu0 %v6803_v59, %s7031_s19 }
0x187a   :  { %3321 = vrot.lane.b32.xlu1 %v6805_v37, %s7031_s19 }
0x18df   :  { %v3312_v2 = vpop.permute.xlu0 %3311 }
0x18e0   :  { %v3334_v57 = vmul.f32 %v8143_v35, %v3312_v2  ;;  %v3310_v50 = vpop.permute.xlu1 %3309 }
0x18e1   :  { %v3333_v52 = vmul.f32 %v8145_v17, %v3310_v50 }
0x18e2   :  { %3351 = vrot.lane.b32.xlu0 %v3334_v57, %s7033_s12 }
0x18e3   :  { %v3316_v32 = vpop.permute.xlu0 %3315  ;;  %3349 = vrot.lane.b32.xlu1 %v3333_v52, %s7033_s12 }
0x18e4   :  { %v3336_v19 = vmul.f32 %v8150_v27, %v3316_v32  ;;  %v3314_v26 = vpop.permute.xlu1 %3313 }
0x18e5   :  { %v3335_v62 = vmul.f32 %v8153_v1, %v3314_v26 }
0x18e6   :  { %3355 = vrot.lane.b32.xlu0 %v3336_v19, %s7033_s12 }
0x18e7   :  { %v3320_v28 = vpop.permute.xlu0 %3319  ;;  %3353 = vrot.lane.b32.xlu1 %v3335_v62, %s7033_s12 }
0x18e8   :  { %v3338_v35 = vmul.f32 %v8158_v58, %v3320_v28  ;;  %v3318_v61 = vpop.permute.xlu1 %3317  ;;  %v3902_v58 = vld [vmem:[%s9010_s0 + $0x18] sm:$0xff] }
0x18e9   :  { %v3337_v17 = vmul.f32 %v8161_v16, %v3318_v61 }
0x18ea   :  { %3359 = vrot.lane.b32.xlu0 %v3338_v35, %s7033_s12  ;;  %v9028_v35 = vld [vmem:[#allocation3_spill] sm:$0xff] }
0x18eb   :  { %v3324_v40 = vpop.permute.xlu0 %3323  ;;  %3357 = vrot.lane.b32.xlu1 %v3337_v17, %s7033_s12 }
0x18ec   :  { %v3340_v27 = vmul.f32 %v8166_v33, %v3324_v40  ;;  %v3322_v48 = vpop.permute.xlu1 %3321 }
0x18ed   :  { %v3339_v1 = vmul.f32 %v8169_v54, %v3322_v48 }
0x18ee   :  { %3363 = vrot.lane.b32.xlu0 %v3340_v27, %s7033_s12 }
0x18ef   :  { %3361 = vrot.lane.b32.xlu1 %v3339_v1, %s7033_s12 }
0x18f3   :  { %3905 = vperm.xlu1 %6437, %v3902_v58   ;;  %v9029_v58 = vld [vmem:[#allocation4_spill] sm:$0xff] }
0x1954   :  { %v8242_v16 = vpop.permute.xlu0 %3351 }
0x1955   :  { %v8244_v59 = vpop.permute.xlu1 %3349 }
0x1956   :  { %5991 = vmatprep.mubr.msk.f32.mxu1 %vm277_vm2, %v8244_v59 }
0x1957   :  { %5992 = vmatmul.mubr.msk.f32.vlgmr.msra.gmra.mrb[26].mxu1 %vm277_vm2, %v8242_v16 }
0x1958   :  { %v8250_v33 = vpop.permute.xlu0 %3355  ;;  %6278 = vmatpush3.bf16.msra.mxu1 %v7361_v7 }
0x1959   :  { %v8253_v54 = vpop.permute.xlu1 %3353  ;;  %6280 = vmatprep.subr.bf16.mxu1 %v7393_v29 }
0x195a   :  { %5994 = vmatprep.mubr.msk.f32.mxu1 %vm277_vm2, %v8253_v54 }
0x195b   :  { %5995 = vmatmul.mubr.msk.f32.gmra.mrb[28].mxu1 %vm277_vm2, %v8250_v33 }
0x195c   :  { %v8260_v37 = vpop.permute.xlu0 %3359  ;;  %6282 = vmatpush3.bf16.msra.mxu1 %v7393_v29 }
0x195d   :  { %v8263_v2 = vpop.permute.xlu1 %3357  ;;  %6299 = vmatprep.subr.bf16.mxu1 %v9026_v38 }
0x195e   :  { %5997 = vmatprep.mubr.msk.f32.mxu1 %vm277_vm2, %v8263_v2 }
0x195f   :  { %5998 = vmatmul.mubr.msk.f32.gmra.mrb[30].mxu1 %vm277_vm2, %v8260_v37 }
0x1960   :  { %v8272_v50 = vpop.permute.xlu0 %3363 }
0x1961   :  { %v8270_v57 = vpop.permute.xlu1 %3361 }
0x1962   :  { %6000 = vmatprep.mubr.msk.f32.mxu1 %vm277_vm2, %v8270_v57 }
0x1963   :  { %6001 = vmatmul.mubr.msk.f32.gmra.mrb[32].mxu1 %vm277_vm2, %v8272_v50 }
0x1964   :  { %6011 = vmatprep.mubr.msk.f32.mxu1 %vm95_vm1, %v8045_v15  ;;  %v8310_v15 = vld [vmem:[%s9009_s1 + $0xc0] ss:$0 sm:$0xff] }
0x1967   :  { %6012 = vmatmul.mubr.msk.f32.vlgmr.msra.gmra.mrb[26].mxu1 %vm95_vm1, %v8043_v3 }
0x1968   :  { %6014 = vmatprep.mubr.msk.f32.mxu1 %vm95_vm1, %v8054_v25  ;;  %6301 = vmatpush3.bf16.msra.mxu1 %v7073_v5 }
0x1969   :  { %6302 = vmatprep.subr.bf16.mxu1 %v9026_v38 }
0x196b   :  { %6015 = vmatmul.mubr.msk.f32.gmra.mrb[28].mxu1 %vm95_vm1, %v8052_v24 }
0x196c   :  { %6017 = vmatprep.mubr.msk.f32.mxu1 %vm95_vm1, %v8063_v51  ;;  %6304 = vmatpush3.bf16.msra.mxu1 %v7088_v10 }
0x196d   :  { %6314 = vmatprep.subr.bf16.mxu1 %v9026_v38 }
0x196f   :  { %6018 = vmatmul.mubr.msk.f32.gmra.mrb[30].mxu1 %vm95_vm1, %v8061_v41 }
0x1970   :  { %6020 = vmatprep.mubr.msk.f32.mxu1 %vm95_vm1, %v8072_v42 }
0x1972   :  { %v3906_v52 = vpop.permute.xlu1 %3905 }
0x1973   :  { %6021 = vmatmul.mubr.msk.f32.gmra.mrb[32].mxu1 %vm95_vm1, %v8070_v45  ;;  %v3908_v61 = vmul.f32 %v9028_v35, %v3906_v52 }
0x1974   :  { %6050 = vmatprep.mubr.msk.f32.mxu1 %vm7026_vm0, %v9023_v9 }
0x1977   :  { %6051 = vmatmul.mubr.msk.f32.vlgmr.msra.gmra.mrb[34].mxu1 %vm95_vm1, %v8087_v0 }
0x1978   :  { %6316 = vmatpush3.bf16.msra.mxu1 %v7176_v63  ;;  %6075 = vmatprep.mubr.msk.f32.mxu1 %vm7026_vm0, %v9023_v9 }
0x1979   :  { %6318 = vmatprep.subr.bf16.mxu1 %v7186_v6 }
0x1a3a   :  { %v6013_v5 = vpop.f32.mrb[26].mxu1 }
0x1a3b   :  { %v6368_v10 = vadd.f32 %v7904_v12, %v6013_v5  ;;  %v3552_v3 = vpop.f32.mrb[27].mxu1  ;;  %v3909_v5 = vadd.f32 %v9029_v58, %v3908_v61 }
0x1a3c   :  { %v6369_v24 = vadd.f32 %v8310_v15, %v3552_v3 }
0x1a3d   :  { %6806 = vtanh.f32 %v6368_v10 }
0x1a3e   :  { %6808 = vtanh.f32 %v6369_v24  ;;  %v6016_v25 = vpop.f32.mrb[28].mxu1 }
0x1a3f   :  { %v6370_v63 = vadd.f32 %v8310_v15, %v6016_v25  ;;  %v3562_v41 = vpop.f32.mrb[29].mxu1 }
0x1a40   :  { %v6371_v51 = vadd.f32 %v8310_v15, %v3562_v41 }
0x1a41   :  { %6810 = vtanh.f32 %v6370_v63 }
0x1a42   :  { %6812 = vtanh.f32 %v6371_v51  ;;  %v6019_v45 = vpop.f32.mrb[30].mxu1 }
0x1a43   :  { %v6372_v12 = vadd.f32 %v8310_v15, %v6019_v45  ;;  %v3572_v42 = vpop.f32.mrb[31].mxu1 }
0x1a44   :  { %v6373_v0 = vadd.f32 %v8310_v15, %v3572_v42 }
0x1a45   :  { %6814 = vtanh.f32 %v6372_v12  ;;  %v5426_v35 = vmul.f32 -1.442695, %v6372_v12 }
0x1a46   :  { %6816 = vtanh.f32 %v6373_v0  ;;  %v6022_v32 = vpop.f32.mrb[32].mxu1  ;;  %v5425_v61 = vmul.f32 -1.442695, %v6373_v0 }
0x1a47   :  { %v6807_v19 = vpop.eup %6806  ;;  %v6374_v26 = vadd.f32 %v8310_v15, %v6022_v32  ;;  %v3582_v62 = vpop.f32.mrb[33].mxu1  ;;  %v5422_v32 = vmul.f32 -1.442695, %v6368_v10 }
0x1a48   :  { %v6809_v28 = vpop.eup %6808  ;;  %v6375_v17 = vadd.f32 %v8310_v15, %v3582_v62  ;;  %3673 = vrot.lane.b32.xlu1 %v6807_v19, %s7029_s27  ;;  %v5421_v19 = vmul.f32 -1.442695, %v6369_v24  ;;  %v5424_v62 = vmul.f32 -1.442695, %v6370_v63 }
0x1a49   :  { %6818 = vtanh.f32 %v6374_v26  ;;  %3671 = vrot.lane.b32.xlu0 %v6809_v28, %s7029_s27  ;;  %v5423_v28 = vmul.f32 -1.442695, %v6371_v51 }
0x1a4a   :  { %6820 = vtanh.f32 %v6375_v17  ;;  %v3976_v40 = vpop.f32.mrb[34].mxu1 }
0x1a4b   :  { %v6811_v27 = vpop.eup %6810  ;;  %v6052_v48 = vpop.f32.mrb[35].mxu1  ;;  %v3980_v3 = vadd.f32 %v3976_v40, %v3909_v5  ;;  %v5428_v40 = vmul.f32 -1.442695, %v6374_v26 }
0x1a4c   :  { %v6813_v1 = vpop.eup %6812  ;;  %3677 = vrot.lane.b32.xlu1 %v6811_v27, %s7029_s27  ;;  %v5427_v27 = vmul.f32 -1.442695, %v6375_v17 }
0x1a4d   :  { %3675 = vrot.lane.b32.xlu0 %v6813_v1, %s7029_s27  ;;  %6822 = vtanh.f32 %v3980_v3 }
0x1a4e   :  { %6824 = vpow2.f32 %v5422_v32 }
0x1a4f   :  { %v6815_v25 = vpop.eup %6814  ;;  %6826 = vpow2.f32 %v5421_v19 }
0x1a50   :  { %v6817_v41 = vpop.eup %6816  ;;  %3681 = vrot.lane.b32.xlu1 %v6815_v25, %s7029_s27  ;;  %6828 = vpow2.f32 %v5424_v62  ;;  %v5439_v25 = vmul.f32 -1.442695, %v3980_v3 }
0x1a51   :  { %3679 = vrot.lane.b32.xlu0 %v6817_v41, %s7029_s27  ;;  %6830 = vpow2.f32 %v5423_v28 }
0x1a52   :  { %6832 = vpow2.f32 %v5426_v35 }
0x1a53   :  { %v6819_v45 = vpop.eup %6818  ;;  %6834 = vpow2.f32 %v5425_v61 }
0x1a54   :  { %v6821_v42 = vpop.eup %6820  ;;  %3685 = vrot.lane.b32.xlu1 %v6819_v45, %s7029_s27  ;;  %6836 = vpow2.f32 %v5428_v40 }
0x1a55   :  { %3683 = vrot.lane.b32.xlu0 %v6821_v42, %s7029_s27  ;;  %6838 = vpow2.f32 %v5427_v27 }
0x1a57   :  { %v6823_v52 = vpop.eup %6822 }
0x1a58   :  { %v6825_v48 = vpop.eup %6824 }
0x1a59   :  { %3990 = vrot.lane.b32.xlu0 %v6823_v52, %s7029_s27  ;;  %v6827_v1 = vpop.eup %6826  ;;  %v3624_v58 = vadd.f32 1.0, %v6825_v48 }
0x1a5a   :  { %v6829_v5 = vpop.eup %6828  ;;  %v3623_v10 = vadd.f32 1.0, %v6827_v1 }
0x1a5b   :  { %v6831_v24 = vpop.eup %6830  ;;  %6840 = vrcp.f32 %v3624_v58  ;;  %v3626_v63 = vadd.f32 1.0, %v6829_v5 }
0x1a5c   :  { %v6833_v51 = vpop.eup %6832  ;;  %6842 = vrcp.f32 %v3623_v10  ;;  %v3625_v12 = vadd.f32 1.0, %v6831_v24 }
0x1a5d   :  { %v6835_v41 = vpop.eup %6834  ;;  %6844 = vpow2.f32 %v5439_v25  ;;  %v3628_v0 = vadd.f32 1.0, %v6833_v51 }
0x1a5e   :  { %6846 = vrcp.f32 %v3626_v63  ;;  %v6837_v26 = vpop.eup %6836  ;;  %v3627_v17 = vadd.f32 1.0, %v6835_v41 }
0x1a5f   :  { %6848 = vrcp.f32 %v3625_v12  ;;  %v6839_v45 = vpop.eup %6838  ;;  %v3630_v42 = vadd.f32 1.0, %v6837_v26 }
0x1a60   :  { %6850 = vrcp.f32 %v3628_v0  ;;  %v3629_v52 = vadd.f32 1.0, %v6839_v45 }
0x1a61   :  { %6852 = vrcp.f32 %v3627_v17 }
0x1a62   :  { %6854 = vrcp.f32 %v3630_v42 }
0x1a63   :  { %6856 = vrcp.f32 %v3629_v52 }
0x1a65   :  { %v8330_v32 = vpop.eup %6840 }
0x1a66   :  { %v8332_v19 = vpop.eup %6842 }
0x1a67   :  { %v6845_v61 = vpop.eup %6844 }
0x1a68   :  { %v8337_v40 = vpop.eup %6846  ;;  %v3984_v10 = vadd.f32 1.0, %v6845_v61 }
0x1a69   :  { %v8340_v48 = vpop.eup %6848 }
0x1a6a   :  { %v8345_v24 = vpop.eup %6850  ;;  %6858 = vrcp.f32 %v3984_v10  ;;  %v3658_v10 = vmul.f32 %v8337_v40, %v7985_v39 }
0x1a6b   :  { %v8348_v63 = vpop.eup %6852 }
0x1a6c   :  { %v8353_v0 = vpop.eup %6854  ;;  %v3659_v39 = vmul.f32 %v8348_v63, %v7997_v55 }
0x1a6d   :  { %v8356_v17 = vpop.eup %6856 }
0x1aba   :  { %v3674_v3 = vpop.permute.xlu1 %3673 }
0x1abb   :  { %v3696_v62 = vmul.f32 %v8330_v32, %v3674_v3  ;;  %v3672_v28 = vpop.permute.xlu0 %3671  ;;  %v8362_v3 = vpop.eup %6858 }
0x1abc   :  { %v3695_v35 = vmul.f32 %v8332_v19, %v3672_v28 }
0x1abd   :  { %3713 = vrot.lane.b32.xlu0 %v3696_v62, %s7029_s27 }
0x1abe   :  { %v3678_v27 = vpop.permute.xlu1 %3677  ;;  %3711 = vrot.lane.b32.xlu1 %v3695_v35, %s7029_s27  ;;  %v3656_v35 = vmul.f32 %v8330_v32, %v7975_v30  ;;  %v3657_v30 = vmul.f32 %v8340_v48, %v7987_v21 }
0x1abf   :  { %v3698_v1 = vmul.f32 %v8337_v40, %v3678_v27  ;;  %v3676_v58 = vpop.permute.xlu0 %3675  ;;  %v3655_v27 = vmul.f32 %v8332_v19, %v7977_v13 }
0x1ac0   :  { %v3697_v5 = vmul.f32 %v8340_v48, %v3676_v58 }
0x1ac1   :  { %3717 = vrot.lane.b32.xlu0 %v3698_v1, %s7029_s27 }
0x1ac2   :  { %v3682_v25 = vpop.permute.xlu1 %3681  ;;  %3715 = vrot.lane.b32.xlu1 %v3697_v5, %s7029_s27 }
0x1ac3   :  { %v3700_v51 = vmul.f32 %v8345_v24, %v3682_v25  ;;  %v3680_v12 = vpop.permute.xlu0 %3679 }
0x1ac4   :  { %v3699_v41 = vmul.f32 %v8348_v63, %v3680_v12 }
0x1ac5   :  { %3721 = vrot.lane.b32.xlu0 %v3700_v51, %s7029_s27 }
0x1ac6   :  { %3719 = vrot.lane.b32.xlu1 %v3699_v41, %s7029_s27  ;;  %v3686_v26 = vpop.permute.xlu1 %3685  ;;  %v3660_v41 = vmul.f32 %v8345_v24, %v7995_v18  ;;  %v3661_v18 = vmul.f32 %v8356_v17, %v8007_v46  ;;  %v3988_v46 = vmul.f32 %v8362_v3, %v8017_v60 }
0x1ac7   :  { %v3702_v45 = vmul.f32 %v8353_v0, %v3686_v26  ;;  %v3684_v42 = vpop.permute.xlu0 %3683 }
0x1ac8   :  { %v3701_v52 = vmul.f32 %v8356_v17, %v3684_v42 }
0x1ac9   :  { %3725 = vrot.lane.b32.xlu0 %v3702_v45, %s7029_s27 }
0x1aca   :  { %3723 = vrot.lane.b32.xlu1 %v3701_v52, %s7029_s27  ;;  %v3662_v52 = vmul.f32 %v8353_v0, %v8005_v11 }
0x1acb   :  { %v3991_v62 = vpop.permute.xlu0 %3990 }
0x1acc   :  { %v3993_v28 = vmul.f32 %v8362_v3, %v3991_v62 }
0x1ace   :  { %3995 = vrot.lane.b32.xlu1 %v3993_v28, %s7029_s27 }
0x1b2f   :  { %v3714_v61 = vpop.permute.xlu0 %3713 }
0x1b30   :  { %v8370_v1 = vadd.f32 %v3714_v61, %v3656_v35  ;;  %v3712_v58 = vpop.permute.xlu1 %3711 }
0x1b31   :  { %v8372_v5 = vadd.f32 %v3712_v58, %v3655_v27 }
0x1b32   :  { %6860 = vtanh.f32 %v8370_v1 }
0x1b33   :  { %6862 = vtanh.f32 %v8372_v5  ;;  %v3718_v25 = vpop.permute.xlu0 %3717 }
0x1b34   :  { %v8380_v51 = vadd.f32 %v3718_v25, %v3658_v10  ;;  %v3716_v12 = vpop.permute.xlu1 %3715 }
0x1b35   :  { %v8382_v13 = vadd.f32 %v3716_v12, %v3657_v30 }
0x1b36   :  { %6864 = vtanh.f32 %v8380_v51 }
0x1b37   :  { %6866 = vtanh.f32 %v8382_v13  ;;  %v3722_v26 = vpop.permute.xlu0 %3721 }
0x1b38   :  { %v8390_v45 = vadd.f32 %v3722_v26, %v3660_v41  ;;  %v3720_v42 = vpop.permute.xlu1 %3719 }
0x1b39   :  { %v8392_v21 = vadd.f32 %v3720_v42, %v3659_v39 }
0x1b3a   :  { %6868 = vtanh.f32 %v8390_v45 }
0x1b3b   :  { %6870 = vtanh.f32 %v8392_v21  ;;  %v3726_v62 = vpop.permute.xlu0 %3725 }
0x1b3c   :  { %v6861_v28 = vpop.eup %6860  ;;  %v8400_v35 = vadd.f32 %v3726_v62, %v3662_v52  ;;  %v3724_v55 = vpop.permute.xlu1 %3723 }
0x1b3d   :  { %v6863_v61 = vpop.eup %6862  ;;  %v8402_v27 = vadd.f32 %v3724_v55, %v3661_v18  ;;  %3761 = vrot.lane.b32.xlu1 %v6861_v28, %s7029_s27 }
0x1b3e   :  { %6872 = vtanh.f32 %v8400_v35  ;;  %3759 = vrot.lane.b32.xlu0 %v6863_v61, %s7029_s27 }
0x1b3f   :  { %6874 = vtanh.f32 %v8402_v27 }
0x1b40   :  { %v6865_v11 = vpop.eup %6864  ;;  %v3996_v25 = vpop.permute.xlu1 %3995 }
0x1b41   :  { %v6867_v58 = vpop.eup %6866  ;;  %3765 = vrot.lane.b32.xlu1 %v6865_v11, %s7029_s27  ;;  %v8412_v12 = vadd.f32 %v3996_v25, %v3988_v46 }
0x1b42   :  { %3763 = vrot.lane.b32.xlu0 %v6867_v58, %s7029_s27 }
0x1b43   :  { %6876 = vtanh.f32 %v8412_v12 }
0x1b44   :  { %v6869_v10 = vpop.eup %6868 }
0x1b45   :  { %v6871_v30 = vpop.eup %6870  ;;  %3769 = vrot.lane.b32.xlu1 %v6869_v10, %s7029_s27 }
0x1b46   :  { %3767 = vrot.lane.b32.xlu0 %v6871_v30, %s7029_s27 }
0x1b48   :  { %v6873_v41 = vpop.eup %6872 }
0x1b49   :  { %v6875_v26 = vpop.eup %6874  ;;  %3773 = vrot.lane.b32.xlu1 %v6873_v41, %s7029_s27 }
0x1b4a   :  { %3771 = vrot.lane.b32.xlu0 %v6875_v26, %s7029_s27 }
0x1b4d   :  { %v6877_v39 = vpop.eup %6876 }
0x1b4e   :  { %4001 = vrot.lane.b32.xlu0 %v6877_v39, %s7029_s27 }
0x1baf   :  { %v3762_v60 = vpop.permute.xlu1 %3761 }
0x1bb0   :  { %v3784_v42 = vmul.f32 %v8330_v32, %v3762_v60  ;;  %v3760_v52 = vpop.permute.xlu0 %3759 }
0x1bb1   :  { %v3783_v62 = vmul.f32 %v8332_v19, %v3760_v52 }
0x1bb2   :  { %3801 = vrot.lane.b32.xlu0 %v3784_v42, %s7030_s16 }
0x1bb3   :  { %3799 = vrot.lane.b32.xlu1 %v3783_v62, %s7030_s16  ;;  %v3766_v18 = vpop.permute.xlu1 %3765 }
0x1bb4   :  { %v3786_v28 = vmul.f32 %v8337_v40, %v3766_v18  ;;  %v3764_v55 = vpop.permute.xlu0 %3763 }
0x1bb5   :  { %v3785_v61 = vmul.f32 %v8340_v48, %v3764_v55 }
0x1bb6   :  { %3805 = vrot.lane.b32.xlu0 %v3786_v28, %s7030_s16  ;;  %v7020_v28 = vld [vmem:[%s9009_s1 + $0xc8] sm:$0x1] }
0x1bb7   :  { %3803 = vrot.lane.b32.xlu1 %v3785_v61, %s7030_s16  ;;  %v3770_v11 = vpop.permute.xlu1 %3769 }
0x1bb8   :  { %v3788_v32 = vmul.f32 %v8345_v24, %v3770_v11  ;;  %v3768_v58 = vpop.permute.xlu0 %3767 }
0x1bb9   :  { %v3787_v19 = vmul.f32 %v8348_v63, %v3768_v58 }
0x1bba   :  { %3809 = vrot.lane.b32.xlu0 %v3788_v32, %s7030_s16 }
0x1bbb   :  { %3807 = vrot.lane.b32.xlu1 %v3787_v19, %s7030_s16  ;;  %v3774_v46 = vpop.permute.xlu1 %3773 }
0x1bbc   :  { %v3790_v40 = vmul.f32 %v8353_v0, %v3774_v46  ;;  %v3772_v10 = vpop.permute.xlu0 %3771 }
0x1bbd   :  { %v3789_v48 = vmul.f32 %v8356_v17, %v3772_v10 }
0x1bbe   :  { %3813 = vrot.lane.b32.xlu0 %v3790_v40, %s7030_s16 }
0x1bbf   :  { %3811 = vrot.lane.b32.xlu1 %v3789_v48, %s7030_s16 }
0x1bc0   :  { %v4002_v25 = vpop.permute.xlu0 %4001 }
0x1bc1   :  { %v4004_v24 = vmul.f32 %v8362_v3, %v4002_v25 }
0x1bc3   :  { %4006 = vrot.lane.b32.xlu1 %v4004_v24, %s7030_s16 }
0x1c24   :  { %v8438_v63 = vpop.permute.xlu0 %3801 }
0x1c25   :  { %v8440_v30 = vpop.permute.xlu1 %3799 }
0x1c26   :  { %v6284_v41 = vpack.c.bf16 %v8438_v63, %v8440_v30 }
0x1c28   :  { %6286 = vmatpush3.bf16.xpose.msk.msra.mxu0 %vm7623_vm3, %v6284_v41  ;;  %v8449_v17 = vpop.permute.xlu0 %3805 }
0x1c29   :  { %v8446_v0 = vpop.permute.xlu1 %3803  ;;  %6287 = vmatprep.subr.bf16.mxu0 %v9026_v38 }
0x1c2a   :  { %v6288_v3 = vpack.c.bf16 %v8449_v17, %v8446_v0 }
0x1c2c   :  { %v8458_v39 = vpop.permute.xlu0 %3809 }
0x1c2d   :  { %v8451_v26 = vpop.permute.xlu1 %3807 }
0x1c2e   :  { %v6292_v42 = vpack.c.bf16 %v8458_v39, %v8451_v26 }
0x1c30   :  { %6290 = vmatpush3.bf16.xpose.msk.msra.mxu0 %vm7623_vm3, %v6288_v3  ;;  %v8471_v62 = vpop.permute.xlu0 %3813 }
0x1c31   :  { %6291 = vmatprep.subr.bf16.mxu0 %v9026_v38  ;;  %v8460_v60 = vpop.permute.xlu1 %3811 }
0x1c32   :  { %v6296_v18 = vpack.c.bf16 %v8471_v62, %v8460_v60 }
0x1c35   :  { %v4007_v52 = vpop.permute.xlu1 %4006 }
0x1c36   :  { %5135 = vst.msk [vmem:[%s9012_s4] sm:$0xff] %vm95_vm1, %v4007_v52 }
0x1c38   :  { %6294 = vmatpush3.bf16.xpose.msk.msra.mxu0 %vm7623_vm3, %v6292_v42 }
0x1c39   :  { %6295 = vmatprep.subr.bf16.mxu0 %v9026_v38 }
0x1c40   :  { %6298 = vmatpush3.bf16.xpose.msk.msra.mxu0 %vm7623_vm3, %v6296_v18 }
0x1c41   :  { %6305 = vmatprep.subr.bf16.mxu0 %v9026_v38 }
0x1c47   :  { %6040 = vmatmul.mubr.msk.f32.vlgmr.msra.gmra.mrb[36].mxu0 %vm95_vm1, %v7020_v28 }
0x1c48   :  { %6307 = vmatpush3.bf16.msra.mxu0 %v7126_v34  ;;  %6061 = vmatprep.mubr.msk.f32.mxu0 %vm7026_vm0, %v9023_v9 }
0x1c49   :  { %6308 = vmatprep.subr.bf16.mxu0 %v9026_v38 }
0x1c4c   :  { %6310 = vmatpush3.bf16.msra.mxu0 %v7132_v36 }
0x1c4d   :  { %6311 = vmatprep.subr.bf16.mxu0 %v9026_v38 }
0x1c4f   :  { %6062 = vmatmul.mubr.msk.f32.vlgmr.msra.gmra.mrb[38].mxu0 %vm95_vm1, %v4007_v52 }
0x1c50   :  { %6313 = vmatpush3.bf16.msra.mxu0 %v7149_v43  ;;  %6068 = vmatprep.mubr.msk.f32.mxu0 %vm7026_vm0, %v9023_v9  ;;  %v7021_v43 = vld [vmem:[%s9009_s1 + $0x60] ss:$0 sm:$0xff] }
0x1c51   :  { %6322 = vmatprep.subr.bf16.mxu0 %v7345_v56 }
0x1c57   :  { %6069 = vmatmul.mubr.msk.f32.vlgmr.msra.gmra.mrb[38].mxu0 %vm277_vm2, %v8110_v8 }
0x1c58   :  { %6324 = vmatpush3.bf16.msra.mxu0 %v7345_v56 }
0x1c59   :  { %6326 = vmatprep.subr.bf16.mxu0 %v7361_v7 }
0x1d1a   :  { %v8497_v34 = vpop.f32.mrb[36].mxu0 }
0x1d1b   :  { %v6041_v36 = vpop.f32.mrb[37].mxu0 }
0x1d2a   :  { %v4146_v55 = vpop.f32.mrb[38].mxu0 }
0x1d2b   :  { %v6376_v61 = vadd.f32 %v7021_v43, %v4146_v55  ;;  %v6070_v11 = vpop.f32.mrb[39].mxu0 }
0x1d2d   :  { %6878 = vtanh.f32 %v6376_v61  ;;  %v5442_v58 = vmul.f32 -1.442695, %v6376_v61 }
0x1d2f   :  { %6880 = vpow2.f32 %v5442_v58 }
0x1d37   :  { %v6879_v32 = vpop.eup %6878 }
0x1d38   :  { %4160 = vrot.lane.b32.xlu0 %v6879_v32, %s7032_s29 }
0x1d39   :  { %v6881_v8 = vpop.eup %6880 }
0x1d3a   :  { %v4154_v56 = vadd.f32 1.0, %v6881_v8 }
0x1d3c   :  { %6882 = vrcp.f32 %v4154_v56 }
0x1d46   :  { %v6883_v19 = vpop.eup %6882 }
0x1d47   :  { %v4158_v10 = vmul.f32 %v6883_v19, %v8105_v23 }
0x1daa   :  { %v4161_v46 = vpop.permute.xlu0 %4160 }
0x1dab   :  { %v4163_v40 = vmul.f32 %v6883_v19, %v4161_v46 }
0x1dad   :  { %4165 = vrot.lane.b32.xlu1 %v4163_v40, %s7031_s19 }
0x1e1f   :  { %v4166_v48 = vpop.permute.xlu1 %4165 }
0x1e20   :  { %v8505_v25 = vadd.f32 %v4166_v48, %v4158_v10 }
0x1e22   :  { %6884 = vtanh.f32 %v8505_v25 }
0x1e2c   :  { %v6885_v24 = vpop.eup %6884 }
0x1e2d   :  { %4171 = vrot.lane.b32.xlu0 %v6885_v24, %s7031_s19 }
0x1e9f   :  { %v4172_v41 = vpop.permute.xlu0 %4171 }
0x1ea0   :  { %v4174_v3 = vmul.f32 %v6883_v19, %v4172_v41 }
0x1ea2   :  { %4176 = vrot.lane.b32.xlu1 %v4174_v3, %s7033_s12 }
0x1f14   :  { %v4177_v42 = vpop.permute.xlu1 %4176 }
0x1f15   :  { %5142 = vst.msk [vmem:[%s9012_s4 + $0x10] sm:$0xff] %vm277_vm2, %v4177_v42  ;;  %6076 = vmatmul.mubr.msk.f32.vlgmr.msra.gmra.mrb[36].mxu1 %vm277_vm2, %v4177_v42 }
0x1f16   :  { %6320 = vmatpush3.bf16.msra.mxu1 %v7186_v6  ;;  %6082 = vmatprep.mubr.msk.f32.mxu1 %vm277_vm2, %v8244_v59 }
0x1f17   :  { %6333 = vmatprep.subr.bf16.mxu1 %v9026_v38 }
0x1f19   :  { %6083 = vmatmul.mubr.msk.f32.vlgmr.msra.gmra.mrb[38].mxu1 %vm277_vm2, %v8242_v16  ;;  %v7022_v16 = vld [vmem:[%s9009_s1 + $0x88] ss:$0 sm:$0xff] }
0x1f1a   :  { %6085 = vmatprep.mubr.msk.f32.mxu1 %vm277_vm2, %v8253_v54 }
0x1f1d   :  { %6086 = vmatmul.mubr.msk.f32.gmra.mrb[40].mxu1 %vm277_vm2, %v8250_v33 }
0x1f1e   :  { %6088 = vmatprep.mubr.msk.f32.mxu1 %vm277_vm2, %v8263_v2 }
0x1f21   :  { %6089 = vmatmul.mubr.msk.f32.gmra.mrb[42].mxu1 %vm277_vm2, %v8260_v37 }
0x1f22   :  { %6091 = vmatprep.mubr.msk.f32.mxu1 %vm277_vm2, %v8270_v57 }
0x1f25   :  { %6092 = vmatmul.mubr.msk.f32.gmra.mrb[44].mxu1 %vm277_vm2, %v8272_v50 }
0x1f26   :  { %6146 = vmatprep.mubr.msk.f32.mxu1 %vm7026_vm0, %v9023_v9 }
0x1fe8   :  { %v4246_v6 = vpop.f32.mrb[36].mxu1 }
0x1fe9   :  { %v6077_v23 = vpop.f32.mrb[37].mxu1  ;;  %v4247_v59 = vadd.f32 %v7022_v16, %v4246_v6 }
0x1fec   :  { %v6084_v33 = vpop.f32.mrb[38].mxu1 }
0x1fed   :  { %v4356_v54 = vadd.f32 %v6084_v33, %v4247_v59  ;;  %v4316_v2 = vpop.f32.mrb[39].mxu1 }
0x1fee   :  { %v4355_v37 = vadd.f32 %v4316_v2, %v4247_v59 }
0x1fef   :  { %6886 = vtanh.f32 %v4356_v54  ;;  %v5453_v24 = vmul.f32 -1.442695, %v4356_v54 }
0x1ff0   :  { %6888 = vtanh.f32 %v4355_v37  ;;  %v6087_v57 = vpop.f32.mrb[40].mxu1  ;;  %v5452_v41 = vmul.f32 -1.442695, %v4355_v37 }
0x1ff1   :  { %v4358_v52 = vadd.f32 %v6087_v57, %v4247_v59  ;;  %v4326_v18 = vpop.f32.mrb[41].mxu1 }
0x1ff2   :  { %v4357_v50 = vadd.f32 %v4326_v18, %v4247_v59 }
0x1ff3   :  { %6890 = vtanh.f32 %v4358_v52  ;;  %v5455_v3 = vmul.f32 -1.442695, %v4358_v52 }
0x1ff4   :  { %6892 = vtanh.f32 %v4357_v50  ;;  %v6090_v9 = vpop.f32.mrb[42].mxu1  ;;  %v5454_v42 = vmul.f32 -1.442695, %v4357_v50 }
0x1ff5   :  { %v4360_v28 = vadd.f32 %v6090_v9, %v4247_v59  ;;  %v4336_v36 = vpop.f32.mrb[43].mxu1 }
0x1ff6   :  { %v4359_v55 = vadd.f32 %v4336_v36, %v4247_v59 }
0x1ff7   :  { %6894 = vtanh.f32 %v4360_v28  ;;  %v5457_v6 = vmul.f32 -1.442695, %v4360_v28 }
0x1ff8   :  { %6896 = vtanh.f32 %v4359_v55  ;;  %v6093_v43 = vpop.f32.mrb[44].mxu1  ;;  %v5456_v23 = vmul.f32 -1.442695, %v4359_v55 }
0x1ff9   :  { %v6887_v61 = vpop.eup %6886  ;;  %v4362_v11 = vadd.f32 %v6093_v43, %v4247_v59  ;;  %v4346_v32 = vpop.f32.mrb[45].mxu1 }
0x1ffa   :  { %v6889_v58 = vpop.eup %6888  ;;  %v4361_v8 = vadd.f32 %v4346_v32, %v4247_v59  ;;  %4437 = vrot.lane.b32.xlu1 %v6887_v61, %s7032_s29 }
0x1ffb   :  { %6898 = vtanh.f32 %v4362_v11  ;;  %4435 = vrot.lane.b32.xlu0 %v6889_v58, %s7032_s29  ;;  %v5459_v16 = vmul.f32 -1.442695, %v4362_v11 }
0x1ffc   :  { %6900 = vtanh.f32 %v4361_v8  ;;  %v5458_v59 = vmul.f32 -1.442695, %v4361_v8 }
0x1ffd   :  { %v6891_v56 = vpop.eup %6890  ;;  %6902 = vpow2.f32 %v5453_v24 }
0x1ffe   :  { %v6893_v19 = vpop.eup %6892  ;;  %4441 = vrot.lane.b32.xlu1 %v6891_v56, %s7032_s29  ;;  %6904 = vpow2.f32 %v5452_v41 }
0x1fff   :  { %4439 = vrot.lane.b32.xlu0 %v6893_v19, %s7032_s29  ;;  %6906 = vpow2.f32 %v5455_v3 }
0x2000   :  { %6908 = vpow2.f32 %v5454_v42 }
0x2001   :  { %v6895_v46 = vpop.eup %6894  ;;  %6910 = vpow2.f32 %v5457_v6 }
0x2002   :  { %v6897_v40 = vpop.eup %6896  ;;  %4445 = vrot.lane.b32.xlu1 %v6895_v46, %s7032_s29  ;;  %6912 = vpow2.f32 %v5456_v23 }
0x2003   :  { %4443 = vrot.lane.b32.xlu0 %v6897_v40, %s7032_s29  ;;  %6914 = vpow2.f32 %v5459_v16 }
0x2004   :  { %6916 = vpow2.f32 %v5458_v59 }
0x2005   :  { %v6899_v10 = vpop.eup %6898 }
0x2006   :  { %v6901_v48 = vpop.eup %6900  ;;  %4449 = vrot.lane.b32.xlu1 %v6899_v10, %s7032_s29 }
0x2007   :  { %4447 = vrot.lane.b32.xlu0 %v6901_v48, %s7032_s29  ;;  %v6903_v33 = vpop.eup %6902 }
0x2008   :  { %v6905_v2 = vpop.eup %6904  ;;  %v4388_v57 = vadd.f32 1.0, %v6903_v33 }
0x2009   :  { %v6907_v18 = vpop.eup %6906  ;;  %v4387_v54 = vadd.f32 1.0, %v6905_v2 }
0x200a   :  { %v6909_v37 = vpop.eup %6908  ;;  %6918 = vrcp.f32 %v4388_v57  ;;  %v4390_v52 = vadd.f32 1.0, %v6907_v18 }
0x200b   :  { %v6911_v9 = vpop.eup %6910  ;;  %6920 = vrcp.f32 %v4387_v54  ;;  %v4389_v50 = vadd.f32 1.0, %v6909_v37 }
0x200c   :  { %v6913_v28 = vpop.eup %6912  ;;  %6922 = vrcp.f32 %v4390_v52  ;;  %v4392_v36 = vadd.f32 1.0, %v6911_v9 }
0x200d   :  { %v6915_v55 = vpop.eup %6914  ;;  %6924 = vrcp.f32 %v4389_v50  ;;  %v4391_v43 = vadd.f32 1.0, %v6913_v28 }
0x200e   :  { %v6917_v61 = vpop.eup %6916  ;;  %6926 = vrcp.f32 %v4392_v36  ;;  %v4394_v11 = vadd.f32 1.0, %v6915_v55 }
0x200f   :  { %6928 = vrcp.f32 %v4391_v43  ;;  %v4393_v32 = vadd.f32 1.0, %v6917_v61 }
0x2010   :  { %6930 = vrcp.f32 %v4394_v11 }
0x2011   :  { %6932 = vrcp.f32 %v4393_v32 }
0x2014   :  { %v8546_v58 = vpop.eup %6918 }
0x2015   :  { %v8548_v56 = vpop.eup %6920  ;;  %v4420_v50 = vmul.f32 %v8546_v58, %v8179_v14 }
0x2016   :  { %v8553_v10 = vpop.eup %6922  ;;  %v4419_v36 = vmul.f32 %v8548_v56, %v8181_v31 }
0x2017   :  { %v8556_v24 = vpop.eup %6924  ;;  %v4422_v11 = vmul.f32 %v8553_v10, %v8189_v49 }
0x2018   :  { %v8561_v6 = vpop.eup %6926  ;;  %v4421_v14 = vmul.f32 %v8556_v24, %v8191_v22 }
0x2019   :  { %v8564_v16 = vpop.eup %6928 }
0x201a   :  { %v8569_v57 = vpop.eup %6930  ;;  %v4423_v49 = vmul.f32 %v8564_v16, %v8201_v20 }
0x201b   :  { %v8572_v54 = vpop.eup %6932 }
0x206c   :  { %v4438_v8 = vpop.permute.xlu1 %4437 }
0x206d   :  { %v4460_v19 = vmul.f32 %v8546_v58, %v4438_v8  ;;  %v4436_v46 = vpop.permute.xlu0 %4435 }
0x206e   :  { %v4459_v40 = vmul.f32 %v8548_v56, %v4436_v46  ;;  %v4424_v46 = vmul.f32 %v8561_v6, %v8199_v47  ;;  %v4425_v47 = vmul.f32 %v8572_v54, %v8211_v44 }
0x206f   :  { %4477 = vrot.lane.b32.xlu1 %v4460_v19, %s7031_s19 }
0x2070   :  { %v4442_v48 = vpop.permute.xlu1 %4441  ;;  %4475 = vrot.lane.b32.xlu0 %v4459_v40, %s7031_s19 }
0x2071   :  { %v4462_v41 = vmul.f32 %v8553_v10, %v4442_v48  ;;  %v4440_v3 = vpop.permute.xlu0 %4439 }
0x2072   :  { %v4461_v42 = vmul.f32 %v8556_v24, %v4440_v3  ;;  %v4426_v3 = vmul.f32 %v8569_v57, %v8209_v4 }
0x2073   :  { %4481 = vrot.lane.b32.xlu1 %v4462_v41, %s7031_s19 }
0x2074   :  { %v4446_v23 = vpop.permute.xlu1 %4445  ;;  %4479 = vrot.lane.b32.xlu0 %v4461_v42, %s7031_s19 }
0x2075   :  { %v4464_v59 = vmul.f32 %v8561_v6, %v4446_v23  ;;  %v4444_v33 = vpop.permute.xlu0 %4443 }
0x2076   :  { %v4463_v2 = vmul.f32 %v8564_v16, %v4444_v33 }
0x2077   :  { %4485 = vrot.lane.b32.xlu1 %v4464_v59, %s7031_s19 }
0x2078   :  { %v4450_v18 = vpop.permute.xlu1 %4449  ;;  %4483 = vrot.lane.b32.xlu0 %v4463_v2, %s7031_s19 }
0x2079   :  { %v4466_v37 = vmul.f32 %v8569_v57, %v4450_v18  ;;  %v4448_v52 = vpop.permute.xlu0 %4447 }
0x207a   :  { %v4465_v9 = vmul.f32 %v8572_v54, %v4448_v52 }
0x207b   :  { %4489 = vrot.lane.b32.xlu1 %v4466_v37, %s7031_s19 }
0x207c   :  { %4487 = vrot.lane.b32.xlu0 %v4465_v9, %s7031_s19 }
0x20e1   :  { %v4478_v28 = vpop.permute.xlu1 %4477 }
0x20e2   :  { %v8582_v55 = vadd.f32 %v4478_v28, %v4420_v50  ;;  %v4476_v43 = vpop.permute.xlu0 %4475 }
0x20e3   :  { %v8584_v61 = vadd.f32 %v4476_v43, %v4419_v36 }
0x20e4   :  { %6934 = vtanh.f32 %v8582_v55 }
0x20e5   :  { %6936 = vtanh.f32 %v8584_v61  ;;  %v4482_v32 = vpop.permute.xlu1 %4481 }
0x20e6   :  { %v8592_v8 = vadd.f32 %v4482_v32, %v4422_v11  ;;  %v4480_v19 = vpop.permute.xlu0 %4479 }
0x20e7   :  { %v8594_v31 = vadd.f32 %v4480_v19, %v4421_v14 }
0x20e8   :  { %6938 = vtanh.f32 %v8592_v8 }
0x20e9   :  { %6940 = vtanh.f32 %v8594_v31  ;;  %v4486_v40 = vpop.permute.xlu1 %4485 }
0x20ea   :  { %v8602_v48 = vadd.f32 %v4486_v40, %v4424_v46  ;;  %v4484_v41 = vpop.permute.xlu0 %4483 }
0x20eb   :  { %v8604_v22 = vadd.f32 %v4484_v41, %v4423_v49 }
0x20ec   :  { %6942 = vtanh.f32 %v8602_v48 }
0x20ed   :  { %6944 = vtanh.f32 %v8604_v22  ;;  %v4490_v42 = vpop.permute.xlu1 %4489 }
0x20ee   :  { %v6935_v23 = vpop.eup %6934  ;;  %v8612_v59 = vadd.f32 %v4490_v42, %v4426_v3  ;;  %v4488_v20 = vpop.permute.xlu0 %4487 }
0x20ef   :  { %v6937_v33 = vpop.eup %6936  ;;  %v8614_v2 = vadd.f32 %v4488_v20, %v4425_v47  ;;  %4525 = vrot.lane.b32.xlu1 %v6935_v23, %s7031_s19 }
0x20f0   :  { %6946 = vtanh.f32 %v8612_v59  ;;  %4523 = vrot.lane.b32.xlu0 %v6937_v33, %s7031_s19 }
0x20f1   :  { %6948 = vtanh.f32 %v8614_v2 }
0x20f2   :  { %v6939_v4 = vpop.eup %6938 }
0x20f3   :  { %v6941_v18 = vpop.eup %6940  ;;  %4529 = vrot.lane.b32.xlu1 %v6939_v4, %s7031_s19 }
0x20f4   :  { %4527 = vrot.lane.b32.xlu0 %v6941_v18, %s7031_s19 }
0x20f6   :  { %v6943_v44 = vpop.eup %6942 }
0x20f7   :  { %v6945_v37 = vpop.eup %6944  ;;  %4533 = vrot.lane.b32.xlu1 %v6943_v44, %s7031_s19 }
0x20f8   :  { %4531 = vrot.lane.b32.xlu0 %v6945_v37, %s7031_s19 }
0x20fa   :  { %v6947_v52 = vpop.eup %6946 }
0x20fb   :  { %v6949_v9 = vpop.eup %6948  ;;  %4537 = vrot.lane.b32.xlu1 %v6947_v52, %s7031_s19 }
0x20fc   :  { %4535 = vrot.lane.b32.xlu0 %v6949_v9, %s7031_s19 }
0x2161   :  { %v4526_v50 = vpop.permute.xlu1 %4525 }
0x2162   :  { %v4548_v28 = vmul.f32 %v8546_v58, %v4526_v50  ;;  %v4524_v36 = vpop.permute.xlu0 %4523 }
0x2163   :  { %v4547_v43 = vmul.f32 %v8548_v56, %v4524_v36 }
0x2164   :  { %4565 = vrot.lane.b32.xlu1 %v4548_v28, %s7033_s12 }
0x2165   :  { %v4530_v11 = vpop.permute.xlu1 %4529  ;;  %4563 = vrot.lane.b32.xlu0 %v4547_v43, %s7033_s12 }
0x2166   :  { %v4550_v32 = vmul.f32 %v8553_v10, %v4530_v11  ;;  %v4528_v14 = vpop.permute.xlu0 %4527 }
0x2167   :  { %v4549_v19 = vmul.f32 %v8556_v24, %v4528_v14 }
0x2168   :  { %4569 = vrot.lane.b32.xlu1 %v4550_v32, %s7033_s12 }
0x2169   :  { %v4534_v46 = vpop.permute.xlu1 %4533  ;;  %4567 = vrot.lane.b32.xlu0 %v4549_v19, %s7033_s12 }
0x216a   :  { %v4552_v58 = vmul.f32 %v8561_v6, %v4534_v46  ;;  %v4532_v40 = vpop.permute.xlu0 %4531 }
0x216b   :  { %v4551_v56 = vmul.f32 %v8564_v16, %v4532_v40 }
0x216c   :  { %4573 = vrot.lane.b32.xlu1 %v4552_v58, %s7033_s12 }
0x216d   :  { %v4538_v49 = vpop.permute.xlu1 %4537  ;;  %4571 = vrot.lane.b32.xlu0 %v4551_v56, %s7033_s12 }
0x216e   :  { %v4554_v10 = vmul.f32 %v8569_v57, %v4538_v49  ;;  %v4536_v41 = vpop.permute.xlu0 %4535 }
0x216f   :  { %v4553_v24 = vmul.f32 %v8572_v54, %v4536_v41 }
0x2170   :  { %4577 = vrot.lane.b32.xlu1 %v4554_v10, %s7033_s12 }
0x2171   :  { %4575 = vrot.lane.b32.xlu0 %v4553_v24, %s7033_s12 }
0x21d6   :  { %v4566_v3 = vpop.permute.xlu1 %4565 }
0x21d7   :  { %5157 = vst.msk [vmem:[%s9012_s4 + $0x28] sm:$0xff] %vm277_vm2, %v4566_v3  ;;  %v4564_v6 = vpop.permute.xlu0 %4563 }
0x21d8   :  { %5156 = vst.msk [vmem:[%s9012_s4 + $0x20] sm:$0xff] %vm277_vm2, %v4564_v6  ;;  %6098 = vmatprep.mubr.msk.f32.mxu0 %vm277_vm2, %v4564_v6 }
0x21d9   :  { %6099 = vmatmul.mubr.msk.f32.vlgmr.msra.gmra.mrb[40].mxu0 %vm277_vm2, %v4566_v3 }
0x21da   :  { %v4570_v16 = vpop.permute.xlu1 %4569  ;;  %6328 = vmatpush3.bf16.msra.mxu0 %v7361_v7 }
0x21db   :  { %5159 = vst.msk [vmem:[%s9012_s4 + $0x38] sm:$0xff] %vm277_vm2, %v4570_v16  ;;  %v4568_v57 = vpop.permute.xlu0 %4567  ;;  %6330 = vmatprep.subr.bf16.mxu0 %v7393_v29 }
0x21dc   :  { %5158 = vst.msk [vmem:[%s9012_s4 + $0x30] sm:$0xff] %vm277_vm2, %v4568_v57  ;;  %6101 = vmatprep.mubr.msk.f32.mxu0 %vm277_vm2, %v4568_v57 }
0x21dd   :  { %6102 = vmatmul.mubr.msk.f32.gmra.mrb[42].mxu0 %vm277_vm2, %v4570_v16 }
0x21de   :  { %v4574_v54 = vpop.permute.xlu1 %4573  ;;  %6332 = vmatpush3.bf16.msra.mxu0 %v7393_v29 }
0x21df   :  { %5161 = vst.msk [vmem:[%s9012_s4 + $0x48] sm:$0xff] %vm277_vm2, %v4574_v54  ;;  %v4572_v7 = vpop.permute.xlu0 %4571 }
0x21e0   :  { %5160 = vst.msk [vmem:[%s9012_s4 + $0x40] sm:$0xff] %vm277_vm2, %v4572_v7  ;;  %6104 = vmatprep.mubr.msk.f32.mxu0 %vm277_vm2, %v4572_v7 }
0x21e1   :  { %6105 = vmatmul.mubr.msk.f32.gmra.mrb[44].mxu0 %vm277_vm2, %v4574_v54 }
0x21e2   :  { %v4578_v42 = vpop.permute.xlu1 %4577 }
0x21e3   :  { %5163 = vst.msk [vmem:[%s9012_s4 + $0x58] sm:$0xff] %vm277_vm2, %v4578_v42  ;;  %v4576_v29 = vpop.permute.xlu0 %4575 }
0x21e4   :  { %5162 = vst.msk [vmem:[%s9012_s4 + $0x50] sm:$0xff] %vm277_vm2, %v4576_v29  ;;  %6107 = vmatprep.mubr.msk.f32.mxu0 %vm277_vm2, %v4576_v29 }
0x21e5   :  { %6108 = vmatmul.mubr.msk.f32.gmra.mrb[46].mxu0 %vm277_vm2, %v4578_v42 }
0x21e6   :  { %6118 = vmatprep.mubr.msk.f32.mxu0 %vm95_vm1, %v8440_v30 }
0x21e9   :  { %6119 = vmatmul.mubr.msk.f32.vlgmr.msra.gmra.mrb[40].mxu0 %vm95_vm1, %v8438_v63 }
0x21ea   :  { %6121 = vmatprep.mubr.msk.f32.mxu0 %vm95_vm1, %v8446_v0 }
0x21ed   :  { %6122 = vmatmul.mubr.msk.f32.gmra.mrb[42].mxu0 %vm95_vm1, %v8449_v17 }
0x21ee   :  { %6124 = vmatprep.mubr.msk.f32.mxu0 %vm95_vm1, %v8451_v26  ;;  %v7023_v26 = vld [vmem:[%s9009_s1 + $0xc0] ss:$0 sm:$0xff] }
0x21f1   :  { %6125 = vmatmul.mubr.msk.f32.gmra.mrb[44].mxu0 %vm95_vm1, %v8458_v39 }
0x21f2   :  { %6127 = vmatprep.mubr.msk.f32.mxu0 %vm95_vm1, %v8460_v60 }
0x21f5   :  { %6128 = vmatmul.mubr.msk.f32.gmra.mrb[46].mxu0 %vm95_vm1, %v8471_v62 }
0x22bc   :  { %v6120_v30 = vpop.f32.mrb[40].mxu0 }
0x22bd   :  { %v6377_v63 = vadd.f32 %v8310_v15, %v6120_v30  ;;  %v4766_v47 = vpop.f32.mrb[41].mxu0 }
0x22be   :  { %v6378_v0 = vadd.f32 %v8310_v15, %v4766_v47 }
0x22bf   :  { %6950 = vtanh.f32 %v6377_v63  ;;  %v5477_v14 = vmul.f32 -1.442695, %v6377_v63 }
0x22c0   :  { %6952 = vtanh.f32 %v6378_v0  ;;  %v6123_v17 = vpop.f32.mrb[42].mxu0  ;;  %v5476_v19 = vmul.f32 -1.442695, %v6378_v0 }
0x22c1   :  { %v6379_v39 = vadd.f32 %v7023_v26, %v6123_v17  ;;  %v4776_v23 = vpop.f32.mrb[43].mxu0 }
0x22c2   :  { %v6380_v20 = vadd.f32 %v7023_v26, %v4776_v23 }
0x22c3   :  { %6954 = vtanh.f32 %v6379_v39  ;;  %v5479_v46 = vmul.f32 -1.442695, %v6379_v39 }
0x22c4   :  { %6956 = vtanh.f32 %v6380_v20  ;;  %v6126_v60 = vpop.f32.mrb[44].mxu0  ;;  %v5478_v58 = vmul.f32 -1.442695, %v6380_v20 }
0x22c5   :  { %v6381_v62 = vadd.f32 %v7023_v26, %v6126_v60  ;;  %v4786_v33 = vpop.f32.mrb[45].mxu0 }
0x22c6   :  { %v6382_v4 = vadd.f32 %v7023_v26, %v4786_v33 }
0x22c7   :  { %6958 = vtanh.f32 %v6381_v62  ;;  %v5481_v40 = vmul.f32 -1.442695, %v6381_v62 }
0x22c8   :  { %6960 = vtanh.f32 %v6382_v4  ;;  %v6129_v18 = vpop.f32.mrb[46].mxu0  ;;  %v5480_v56 = vmul.f32 -1.442695, %v6382_v4 }
0x22c9   :  { %v6951_v15 = vpop.eup %6950  ;;  %v6383_v44 = vadd.f32 %v7023_v26, %v6129_v18  ;;  %v4796_v37 = vpop.f32.mrb[47].mxu0 }
0x22ca   :  { %v6953_v52 = vpop.eup %6952  ;;  %v6384_v9 = vadd.f32 %v7023_v26, %v4796_v37  ;;  %4887 = vrot.lane.b32.xlu1 %v6951_v15, %s7029_s27 }
0x22cb   :  { %6962 = vtanh.f32 %v6383_v44  ;;  %4885 = vrot.lane.b32.xlu0 %v6953_v52, %s7029_s27  ;;  %v5483_v49 = vmul.f32 -1.442695, %v6383_v44 }
0x22cc   :  { %6964 = vtanh.f32 %v6384_v9  ;;  %v5482_v10 = vmul.f32 -1.442695, %v6384_v9 }
0x22cd   :  { %v6955_v50 = vpop.eup %6954  ;;  %6966 = vpow2.f32 %v5477_v14 }
0x22ce   :  { %v6957_v28 = vpop.eup %6956  ;;  %4891 = vrot.lane.b32.xlu1 %v6955_v50, %s7029_s27  ;;  %6968 = vpow2.f32 %v5476_v19 }
0x22cf   :  { %4889 = vrot.lane.b32.xlu0 %v6957_v28, %s7029_s27  ;;  %6970 = vpow2.f32 %v5479_v46 }
0x22d0   :  { %6972 = vpow2.f32 %v5478_v58 }
0x22d1   :  { %v6959_v36 = vpop.eup %6958  ;;  %6974 = vpow2.f32 %v5481_v40 }
0x22d2   :  { %v6961_v43 = vpop.eup %6960  ;;  %4895 = vrot.lane.b32.xlu1 %v6959_v36, %s7029_s27  ;;  %6976 = vpow2.f32 %v5480_v56 }
0x22d3   :  { %4893 = vrot.lane.b32.xlu0 %v6961_v43, %s7029_s27  ;;  %6978 = vpow2.f32 %v5483_v49 }
0x22d4   :  { %6980 = vpow2.f32 %v5482_v10 }
0x22d5   :  { %v6963_v11 = vpop.eup %6962 }
0x22d6   :  { %v6965_v32 = vpop.eup %6964  ;;  %4899 = vrot.lane.b32.xlu1 %v6963_v11, %s7029_s27 }
0x22d7   :  { %4897 = vrot.lane.b32.xlu0 %v6965_v32, %s7029_s27  ;;  %v6967_v41 = vpop.eup %6966 }
0x22d8   :  { %v6969_v24 = vpop.eup %6968  ;;  %v4838_v3 = vadd.f32 1.0, %v6967_v41 }
0x22d9   :  { %v6971_v6 = vpop.eup %6970  ;;  %v4837_v16 = vadd.f32 1.0, %v6969_v24 }
0x22da   :  { %v6973_v57 = vpop.eup %6972  ;;  %6982 = vrcp.f32 %v4838_v3  ;;  %v4840_v54 = vadd.f32 1.0, %v6971_v6 }
0x22db   :  { %v6975_v7 = vpop.eup %6974  ;;  %6984 = vrcp.f32 %v4837_v16  ;;  %v4839_v42 = vadd.f32 1.0, %v6973_v57 }
0x22dc   :  { %v6977_v29 = vpop.eup %6976  ;;  %6986 = vrcp.f32 %v4840_v54  ;;  %v4842_v30 = vadd.f32 1.0, %v6975_v7 }
0x22dd   :  { %v6979_v63 = vpop.eup %6978  ;;  %6988 = vrcp.f32 %v4839_v42  ;;  %v4841_v47 = vadd.f32 1.0, %v6977_v29 }
0x22de   :  { %v6981_v0 = vpop.eup %6980  ;;  %6990 = vrcp.f32 %v4842_v30  ;;  %v4844_v17 = vadd.f32 1.0, %v6979_v63 }
0x22df   :  { %6992 = vrcp.f32 %v4841_v47  ;;  %v4843_v26 = vadd.f32 1.0, %v6981_v0 }
0x22e0   :  { %6994 = vrcp.f32 %v4844_v17 }
0x22e1   :  { %6996 = vrcp.f32 %v4843_v26 }
0x22e4   :  { %v8714_v39 = vpop.eup %6982 }
0x22e5   :  { %v8716_v20 = vpop.eup %6984  ;;  %v4870_v56 = vmul.f32 %v8714_v39, %v8370_v1 }
0x22e6   :  { %v8721_v4 = vpop.eup %6986  ;;  %v4869_v10 = vmul.f32 %v8716_v20, %v8372_v5 }
0x22e7   :  { %v8724_v15 = vpop.eup %6988  ;;  %v4872_v6 = vmul.f32 %v8721_v4, %v8380_v51 }
0x22e8   :  { %v8729_v9 = vpop.eup %6990  ;;  %v4871_v1 = vmul.f32 %v8724_v15, %v8382_v13 }
0x22e9   :  { %v8732_v28 = vpop.eup %6992  ;;  %v4874_v7 = vmul.f32 %v8729_v9, %v8390_v45 }
0x22ea   :  { %v8737_v32 = vpop.eup %6994  ;;  %v4873_v51 = vmul.f32 %v8732_v28, %v8392_v21 }
0x22eb   :  { %v8740_v19 = vpop.eup %6996  ;;  %v4876_v13 = vmul.f32 %v8737_v32, %v8400_v35 }
0x22ec   :  { %v4875_v45 = vmul.f32 %v8740_v19, %v8402_v27 }
0x233c   :  { %v4888_v23 = vpop.permute.xlu1 %4887 }
0x233d   :  { %v4910_v60 = vmul.f32 %v8714_v39, %v4888_v23  ;;  %v4886_v62 = vpop.permute.xlu0 %4885 }
0x233e   :  { %v4909_v33 = vmul.f32 %v8716_v20, %v4886_v62 }
0x233f   :  { %4927 = vrot.lane.b32.xlu1 %v4910_v60, %s7029_s27 }
0x2340   :  { %v4892_v18 = vpop.permute.xlu1 %4891  ;;  %4925 = vrot.lane.b32.xlu0 %v4909_v33, %s7029_s27 }
0x2341   :  { %v4912_v44 = vmul.f32 %v8721_v4, %v4892_v18  ;;  %v4890_v37 = vpop.permute.xlu0 %4889 }
0x2342   :  { %v4911_v52 = vmul.f32 %v8724_v15, %v4890_v37 }
0x2343   :  { %4931 = vrot.lane.b32.xlu1 %v4912_v44, %s7029_s27 }
0x2344   :  { %v4896_v50 = vpop.permute.xlu1 %4895  ;;  %4929 = vrot.lane.b32.xlu0 %v4911_v52, %s7029_s27 }
0x2345   :  { %v4914_v36 = vmul.f32 %v8729_v9, %v4896_v50  ;;  %v4894_v43 = vpop.permute.xlu0 %4893 }
0x2346   :  { %v4913_v11 = vmul.f32 %v8732_v28, %v4894_v43 }
0x2347   :  { %4935 = vrot.lane.b32.xlu1 %v4914_v36, %s7029_s27 }
0x2348   :  { %v4900_v14 = vpop.permute.xlu1 %4899  ;;  %4933 = vrot.lane.b32.xlu0 %v4913_v11, %s7029_s27 }
0x2349   :  { %v4916_v46 = vmul.f32 %v8737_v32, %v4900_v14  ;;  %v4898_v58 = vpop.permute.xlu0 %4897 }
0x234a   :  { %v4915_v40 = vmul.f32 %v8740_v19, %v4898_v58 }
0x234b   :  { %4939 = vrot.lane.b32.xlu1 %v4916_v46, %s7029_s27 }
0x234c   :  { %4937 = vrot.lane.b32.xlu0 %v4915_v40, %s7029_s27 }
0x23b1   :  { %v4928_v49 = vpop.permute.xlu1 %4927 }
0x23b2   :  { %v8750_v41 = vadd.f32 %v4928_v49, %v4870_v56  ;;  %v4926_v24 = vpop.permute.xlu0 %4925 }
0x23b3   :  { %v8752_v3 = vadd.f32 %v4926_v24, %v4869_v10  ;;  %v1448_v24 = vlaneseq }
0x23b4   :  { %6998 = vtanh.f32 %v8750_v41 }
0x23b5   :  { %7000 = vtanh.f32 %v8752_v3  ;;  %v4932_v16 = vpop.permute.xlu1 %4931  ;;  %vm1450_vm4 = vcmp.lt.s32.totalorder %v1448_v24, 64  ;;  %vm8936_vm5 = vcmp.ge.s32.totalorder %v1448_v24, 64  ;;  %vm8940_vm6 = vcmp.lt.s32.totalorder %v1448_v24, 128 }
0x23b6   :  { %v8760_v57 = vadd.f32 %v4932_v16, %v4872_v6  ;;  %v4930_v54 = vpop.permute.xlu0 %4929  ;;  %v7035_v6 = vmov 1966171168   ;;  %vm2686_vm7 = vmand %vm8936_vm5, %vm8940_vm6 }
0x23b7   :  { %v8762_v5 = vadd.f32 %v4930_v54, %v4871_v1  ;;  %v2668_v16 = vunpack.c.l.s4 %v7035_v6 }
0x23b8   :  { %7002 = vtanh.f32 %v8760_v57 }
0x23b9   :  { %7004 = vtanh.f32 %v8762_v5  ;;  %v4936_v42 = vpop.permute.xlu1 %4935  ;;  %v2669_v1 = vunpack.c.0.s8 %v2668_v16 }
0x23ba   :  { %v4954_v29 = vadd.f32 %v4936_v42, %v4874_v7  ;;  %v4934_v30 = vpop.permute.xlu0 %4933 }
0x23bb   :  { %v8770_v63 = vadd.f32 %v4934_v30, %v4873_v51  ;;  %v9030_v51 = vld [vmem:[#allocation2_spill] sm:$0xff]  ;;  %v9031_v30 = vld [vmem:[#allocation5_spill] sm:$0xff] }
0x23bc   :  { %7006 = vtanh.f32 %v4954_v29 }
0x23bd   :  { %7008 = vtanh.f32 %v8770_v63  ;;  %v4940_v47 = vpop.permute.xlu1 %4939 }
0x23be   :  { %v6999_v0 = vpop.eup %6998  ;;  %v8777_v17 = vadd.f32 %v4940_v47, %v4876_v13  ;;  %v4938_v26 = vpop.permute.xlu0 %4937 }
0x23bf   :  { %v7001_v23 = vpop.eup %7000  ;;  %v8779_v21 = vadd.f32 %v4938_v26, %v4875_v45  ;;  %4975 = vrot.lane.b32.xlu1 %v6999_v0, %s7029_s27 }
0x23c0   :  { %7010 = vtanh.f32 %v8777_v17  ;;  %4973 = vrot.lane.b32.xlu0 %v7001_v23, %s7029_s27 }
0x23c1   :  { %7012 = vtanh.f32 %v8779_v21 }
0x23c2   :  { %v7003_v35 = vpop.eup %7002 }
0x23c3   :  { %v7005_v60 = vpop.eup %7004  ;;  %4979 = vrot.lane.b32.xlu1 %v7003_v35, %s7029_s27 }
0x23c4   :  { %4977 = vrot.lane.b32.xlu0 %v7005_v60, %s7029_s27 }
0x23c6   :  { %v7007_v27 = vpop.eup %7006 }
0x23c7   :  { %v7009_v62 = vpop.eup %7008  ;;  %4983 = vrot.lane.b32.xlu1 %v7007_v27, %s7029_s27 }
0x23c8   :  { %4981 = vrot.lane.b32.xlu0 %v7009_v62, %s7029_s27 }
0x23ca   :  { %v7011_v33 = vpop.eup %7010 }
0x23cb   :  { %v7013_v18 = vpop.eup %7012  ;;  %4987 = vrot.lane.b32.xlu1 %v7011_v33, %s7029_s27 }
0x23cc   :  { %4985 = vrot.lane.b32.xlu0 %v7013_v18, %s7029_s27 }
0x2431   :  { %v4976_v44 = vpop.permute.xlu1 %4975 }
0x2432   :  { %v4998_v37 = vmul.f32 %v8714_v39, %v4976_v44  ;;  %v4974_v52 = vpop.permute.xlu0 %4973 }
0x2433   :  { %v4997_v50 = vmul.f32 %v8716_v20, %v4974_v52 }
0x2434   :  { %5015 = vrot.lane.b32.xlu1 %v4998_v37, %s7030_s16 }
0x2435   :  { %v4980_v36 = vpop.permute.xlu1 %4979  ;;  %5013 = vrot.lane.b32.xlu0 %v4997_v50, %s7030_s16 }
0x2436   :  { %v5000_v43 = vmul.f32 %v8721_v4, %v4980_v36  ;;  %v4978_v11 = vpop.permute.xlu0 %4977 }
0x2437   :  { %v4999_v14 = vmul.f32 %v8724_v15, %v4978_v11 }
0x2438   :  { %5019 = vrot.lane.b32.xlu1 %v5000_v43, %s7030_s16 }
0x2439   :  { %v4984_v46 = vpop.permute.xlu1 %4983  ;;  %5017 = vrot.lane.b32.xlu0 %v4999_v14, %s7030_s16 }
0x243a   :  { %v5002_v39 = vmul.f32 %v8729_v9, %v4984_v46  ;;  %v4982_v58 = vpop.permute.xlu0 %4981  ;;  %v42_v9 = vld [vmem:[%s9009_s1 + $0xd0] sm:$0x1] }
0x243b   :  { %v5001_v20 = vmul.f32 %v8732_v28, %v4982_v58 }
0x243c   :  { %5023 = vrot.lane.b32.xlu1 %v5002_v39, %s7030_s16 }
0x243d   :  { %v4988_v40 = vpop.permute.xlu1 %4987  ;;  %5021 = vrot.lane.b32.xlu0 %v5001_v20, %s7030_s16 }
0x243e   :  { %v5004_v4 = vmul.f32 %v8737_v32, %v4988_v40  ;;  %v4986_v56 = vpop.permute.xlu0 %4985 }
0x243f   :  { %v5003_v15 = vmul.f32 %v8740_v19, %v4986_v56 }
0x2440   :  { %5027 = vrot.lane.b32.xlu1 %v5004_v4, %s7030_s16 }
0x2441   :  { %5025 = vrot.lane.b32.xlu0 %v5003_v15, %s7030_s16 }
0x2445   :  { %1332 = vperm.xlu0 %6436, %v42_v9  }
0x2449   :  { %5144 = vrot.lane.b32.xlu0 %v8505_v25, %s7034_s9 }
0x244d   :  { %5174 = vrot.lane.b32.xlu0 %v8582_v55, %s7034_s9 }
0x2451   :  { %5178 = vrot.lane.b32.xlu0 %v8592_v8, %s7034_s9 }
0x2455   :  { %5182 = vrot.lane.b32.xlu0 %v8602_v48, %s7034_s9 }
0x2459   :  { %5186 = vrot.lane.b32.xlu0 %v8612_v59, %s7034_s9 }
0x245d   :  { %5230 = vrot.lane.b32.xlu0 %v8750_v41, %s7033_s12 }
0x2461   :  { %5234 = vrot.lane.b32.xlu0 %v8760_v57, %s7033_s12  ;;  %v2671_v57 = vshrl.u32 %v1448_v24, 7 }
0x2463   :  { %v8868_v7 = vsub.s32 %v2669_v1, %v2671_v57 }
0x2465   :  { %5238 = vrot.lane.b32.xlu0 %v4954_v29, %s7033_s12 }
0x24a6   :  { %v5016_v25 = vpop.permute.xlu1 %5015 }
0x24a7   :  { %5213 = vst.msk [vmem:[%s9012_s4 + $0xa8] sm:$0xff] %vm95_vm1, %v5016_v25  ;;  %v5014_v55 = vpop.permute.xlu0 %5013 }
0x24a8   :  { %v6334_v8 = vpack.c.bf16 %v5016_v25, %v5014_v55  ;;  %5212 = vst.msk [vmem:[%s9012_s4 + $0xa0] sm:$0xff] %vm95_vm1, %v5014_v55 }
0x24aa   :  { %v5020_v48 = vpop.permute.xlu1 %5019  ;;  %6336 = vmatpush3.bf16.xpose.msk.msra.mxu1 %vm7623_vm3, %v6334_v8 }
0x24ab   :  { %5215 = vst.msk [vmem:[%s9012_s4 + $0xb8] sm:$0xff] %vm95_vm1, %v5020_v48  ;;  %v5018_v59 = vpop.permute.xlu0 %5017  ;;  %6337 = vmatprep.subr.bf16.mxu1 %v9026_v38 }
0x24ac   :  { %5214 = vst.msk [vmem:[%s9012_s4 + $0xb0] sm:$0xff] %vm95_vm1, %v5018_v59  ;;  %v6338_v19 = vpack.c.bf16 %v5020_v48, %v5018_v59 }
0x24ae   :  { %v5024_v28 = vpop.permute.xlu1 %5023 }
0x24af   :  { %5217 = vst.msk [vmem:[%s9012_s4 + $0xc8] sm:$0xff] %vm95_vm1, %v5024_v28  ;;  %v5022_v32 = vpop.permute.xlu0 %5021 }
0x24b0   :  { %5216 = vst.msk [vmem:[%s9012_s4 + $0xc0] sm:$0xff] %vm95_vm1, %v5022_v32  ;;  %v6342_v41 = vpack.c.bf16 %v5024_v28, %v5022_v32 }
0x24b2   :  { %v5028_v49 = vpop.permute.xlu1 %5027  ;;  %6340 = vmatpush3.bf16.xpose.msk.msra.mxu1 %vm7623_vm3, %v6338_v19 }
0x24b3   :  { %5219 = vst.msk [vmem:[%s9012_s4 + $0xd8] sm:$0xff] %vm95_vm1, %v5028_v49  ;;  %v5026_v10 = vpop.permute.xlu0 %5025  ;;  %6341 = vmatprep.subr.bf16.mxu1 %v9026_v38 }
0x24b4   :  { %5218 = vst.msk [vmem:[%s9012_s4 + $0xd0] sm:$0xff] %vm95_vm1, %v5026_v10  ;;  %v6346_v54 = vpack.c.bf16 %v5028_v49, %v5026_v10 }
0x24ba   :  { %6344 = vmatpush3.bf16.xpose.msk.msra.mxu1 %vm7623_vm3, %v6342_v41 }
0x24bb   :  { %6345 = vmatprep.subr.bf16.mxu1 %v9026_v38 }
0x24c2   :  { %6348 = vmatpush3.bf16.xpose.msk.msra.mxu1 %vm7623_vm3, %v6346_v54 }
0x24c4   :  { %v1333_v42 = vpop.permute.xlu0 %1332 }
0x24c5   :  { %v1445_v29 = vadd.f32 %v9030_v51, %v1333_v42  ;;  %v2663_v13 = vadd.f32 %v9031_v30, %v1333_v42  ;;  %v3898_v47 = vadd.f32 %v8497_v34, %v1333_v42  ;;  %v7024_v34 = vld [vmem:[%s9009_s1 + $0xc8] sm:$0x1] }
0x24c7   :  { %v2673_v38 = vrot.slane %v2663_v13, %v8868_v7  ;;  %1452 = vst.msk [vmem:[%s9013_s3] sm:$0x1] %vm1450_vm4, %v1445_v29  ;;  %3901 = vst.msk [vmem:[%s9013_s3 + $0x1] sm:$0x1] %vm1450_vm4, %v3898_v47 }
0x24c8   :  { %v5145_v53 = vpop.permute.xlu0 %5144 }
0x24c9   :  { %5147 = vst.msk [vmem:[%s9012_s4 + $0x18] sm:$0xff] %vm277_vm2, %v5145_v53  ;;  %6147 = vmatmul.mubr.msk.f32.vlgmr.msra.gmra.mrb[46].mxu1 %vm95_vm1, %v7024_v34  ;;  %v2680_v45 = vrot.slane %v2673_v38, %v8868_v7 }
0x24cb   :  { %2681 = vrot.lane.b32.xlu1 %v2680_v45, %s7030_s16 }
0x24cc   :  { %v5175_v0 = vpop.permute.xlu0 %5174 }
0x24cd   :  { %5197 = vst.msk [vmem:[%s9012_s4 + $0x68] sm:$0xff] %vm277_vm2, %v5175_v0 }
0x24cf   :  { %5137 = vrot.lane.b32.xlu1 %v8412_v12, %s7033_s12 }
0x24d0   :  { %v5179_v26 = vpop.permute.xlu0 %5178 }
0x24d1   :  { %5199 = vst.msk [vmem:[%s9012_s4 + $0x78] sm:$0xff] %vm277_vm2, %v5179_v26 }
0x24d3   :  { %5172 = vrot.lane.b32.xlu1 %v8584_v61, %s7034_s9 }
0x24d4   :  { %v5183_v23 = vpop.permute.xlu0 %5182 }
0x24d5   :  { %5201 = vst.msk [vmem:[%s9012_s4 + $0x88] sm:$0xff] %vm277_vm2, %v5183_v23 }
0x24d7   :  { %5176 = vrot.lane.b32.xlu1 %v8594_v31, %s7034_s9 }
0x24d8   :  { %v5187_v35 = vpop.permute.xlu0 %5186 }
0x24d9   :  { %5203 = vst.msk [vmem:[%s9012_s4 + $0x98] sm:$0xff] %vm277_vm2, %v5187_v35 }
0x24db   :  { %5180 = vrot.lane.b32.xlu1 %v8604_v22, %s7034_s9 }
0x24dc   :  { %v5231_v12 = vpop.permute.xlu0 %5230 }
0x24dd   :  { %5253 = vst.msk [vmem:[%s9012_s4 + $0xe8] sm:$0xff] %vm95_vm1, %v5231_v12 }
0x24df   :  { %5184 = vrot.lane.b32.xlu1 %v8614_v2, %s7034_s9 }
0x24e0   :  { %v5235_v61 = vpop.permute.xlu0 %5234 }
0x24e1   :  { %5255 = vst.msk [vmem:[%s9012_s4 + $0xf8] sm:$0xff] %vm95_vm1, %v5235_v61 }
0x24e3   :  { %5228 = vrot.lane.b32.xlu1 %v8752_v3, %s7033_s12 }
0x24e4   :  { %v5239_v31 = vpop.permute.xlu0 %5238 }
0x24e5   :  { %5257 = vst.msk [vmem:[%s9012_s4 + $0x108] sm:$0xff] %vm95_vm1, %v5239_v31 }
0x24e7   :  { %5232 = vrot.lane.b32.xlu1 %v8762_v5, %s7033_s12 }
0x24eb   :  { %5236 = vrot.lane.b32.xlu1 %v8770_v63, %s7033_s12 }
0x24ef   :  { %5240 = vrot.lane.b32.xlu1 %v8779_v21, %s7033_s12 }
0x253d   :  { %v2682_v3 = vpop.permute.xlu1 %2681 }
0x253e   :  { %2687 = vst.msk [vmem:[%s9013_s3] sm:$0x1] %vm2686_vm7, %v2682_v3 }
0x2541   :  { %v5138_v5 = vpop.permute.xlu1 %5137 }
0x2542   :  { %5140 = vst.msk [vmem:[%s9012_s4 + $0x8] sm:$0xff] %vm95_vm1, %v5138_v5 }
0x2545   :  { %v5173_v63 = vpop.permute.xlu1 %5172 }
0x2546   :  { %5196 = vst.msk [vmem:[%s9012_s4 + $0x60] sm:$0xff] %vm277_vm2, %v5173_v63 }
0x2549   :  { %v5177_v21 = vpop.permute.xlu1 %5176 }
0x254a   :  { %5198 = vst.msk [vmem:[%s9012_s4 + $0x70] sm:$0xff] %vm277_vm2, %v5177_v21 }
0x254d   :  { %v5181_v60 = vpop.permute.xlu1 %5180 }
0x254e   :  { %5200 = vst.msk [vmem:[%s9012_s4 + $0x80] sm:$0xff] %vm277_vm2, %v5181_v60 }
0x2551   :  { %v5185_v27 = vpop.permute.xlu1 %5184 }
0x2552   :  { %5202 = vst.msk [vmem:[%s9012_s4 + $0x90] sm:$0xff] %vm277_vm2, %v5185_v27 }
0x2555   :  { %v5229_v62 = vpop.permute.xlu1 %5228 }
0x2556   :  { %5252 = vst.msk [vmem:[%s9012_s4 + $0xe0] sm:$0xff] %vm95_vm1, %v5229_v62 }
0x2559   :  { %v5233_v33 = vpop.permute.xlu1 %5232 }
0x255a   :  { %5254 = vst.msk [vmem:[%s9012_s4 + $0xf0] sm:$0xff] %vm95_vm1, %v5233_v33 }
0x255d   :  { %v5237_v18 = vpop.permute.xlu1 %5236 }
0x255e   :  { %5256 = vst.msk [vmem:[%s9012_s4 + $0x100] sm:$0xff] %vm95_vm1, %v5237_v18 }
0x2561   :  { %v5241_v44 = vpop.permute.xlu1 %5240 }
0x2562   :  { %5258 = vst.msk [vmem:[%s9012_s4 + $0x110] sm:$0xff] %vm95_vm1, %v5241_v44 }
0x259c   :  { %v5111_v37 = vpop.f32.mrb[46].mxu1 }
0x259d   :  { %v5112_v52 = vadd.f32 %v5111_v37, %v1333_v42  ;;  %v6148_v50 = vpop.f32.mrb[47].mxu1 }
0x259f   :  { %v5122_v36 = vrot.slane %v5112_v52, %v8868_v7 }
0x25a1   :  { %v5129_v43 = vrot.slane %v5122_v36, %v8868_v7 }
0x25a3   :  { %5130 = vrot.lane.b32.xlu0 %v5129_v43, %s7030_s16 }
0x25a7   :  { %5242 = vrot.lane.b32.xlu0 %v8777_v17, %s7033_s12 }
0x2615   :  { %v5131_v11 = vpop.permute.xlu0 %5130 }
0x2616   :  { %5133 = vst.msk [vmem:[%s9013_s3 + $0x1] sm:$0x1] %vm2686_vm7, %v5131_v11 }
0x2619   :  { %v5243_v14 = vpop.permute.xlu0 %5242 }
0x261a   :  { %5259 = vst.msk [vmem:[%s9012_s4 + $0x118] sm:$0xff] %vm95_vm1, %v5243_v14 }

</bundles_post_ra>
